<compile_context>
chip_gen: v7x
topology: tpu7x:2x2x1
jax: 0.10.0
libtpu: 0.0.40
codegen_flags: <defaults>
</compile_context>

<pallas_src>
import functools

import jax
import jax.numpy as jnp
from jax import lax
from jax.experimental import pallas as pl
from jax.experimental.pallas import tpu as pltpu

HIDDEN_SIZE = 128
INPUT_LEN = 28
NUM_CLASSES = 10
NUM_LAYERS = 2

SUBLANE_BF16 = 16          # bf16 packs 16 sublanes per vreg
LANE = 128
MAX_BATCH_TILE = 256       # padded batch rows per grid block


def _round_up(n, m):
    return ((n + m - 1) // m) * m


# -------------------- Fused Pallas kernel --------------------

def fused_lstm_kernel(x_ref, wih0_ref, whh0_ref, b0_ref,
                      w1_ref, b1_ref, wout_ref, bout_ref,
                      o_ref, xg_sc):
    """Two stacked LSTM layers (wavefront-interleaved) + final linear.

    x_ref    : (T, BT, DinP)  bf16   time-major, padded input block
    wih0_ref : (DinP, 4H)     bf16   layer-0 W_ih^T (zero-padded rows)
    whh0_ref : (H, 4H)        bf16   layer-0 W_hh^T
    b0_ref   : (1, 4H)        f32    layer-0 b_ih + b_hh
    w1_ref   : (2H, 4H)       bf16   layer-1 stacked [W_ih^T ; W_hh^T]
    b1_ref   : (1, 4H)        f32    layer-1 b_ih + b_hh
    wout_ref : (H, CP)        bf16   W_out^T (zero-padded class columns)
    bout_ref : (1, CP)        f32
    o_ref    : (BT, CP)       f32    logits block (padded, lane-dense)
    xg_sc    : (T, BT, 4H)    f32    scratch: hoisted layer-0 input projections
    """
    T, BT, DinP = x_ref.shape
    H = whh0_ref.shape[0]

    def cell(xg, h_bf16, c, w_ref):
        # gates = xg + h_cat @ W   (MXU, f32 accumulation)
        g = xg + jnp.dot(h_bf16, w_ref[...], preferred_element_type=jnp.float32)
        # PyTorch gate order: i, f, g, o
        i = jax.nn.sigmoid(g[:, 0 * H:1 * H])
        f = jax.nn.sigmoid(g[:, 1 * H:2 * H])
        gg = jnp.tanh(g[:, 2 * H:3 * H])
        o = jax.nn.sigmoid(g[:, 3 * H:4 * H])
        c_new = f * c + i * gg
        h_new = (o * jnp.tanh(c_new)).astype(jnp.bfloat16)   # bf16 carry
        return h_new, c_new

    # ---------- Layer 0 hoisted input projection ----------
    x_all = x_ref[...].reshape(T * BT, DinP)
    xg0 = jnp.dot(x_all, wih0_ref[...], preferred_element_type=jnp.float32)
    xg_sc[...] = xg0.reshape(T, BT, 4 * H) + b0_ref[...]

    b1 = b1_ref[...]                                         # (1, 4H)
    zeros_f32 = jnp.zeros((BT, H), jnp.float32)
    zeros_bf16 = jnp.zeros((BT, H), jnp.bfloat16)

    # ---------- Wavefront recurrence ----------
    # Prologue: layer-0 step 0.
    h0, c0 = cell(xg_sc[0], zeros_bf16, zeros_f32, whh0_ref)

    def wave(s, carry):
        h0, c0, h1, c1 = carry     # h0_{s-1}, c0_{s-1}, h1_{s-2}, c1_{s-2}
        # Layer-1 step s-1: input h0_{s-1}, prev state h1_{s-2} (fused matmul).
        hcat = jnp.concatenate([h0, h1], axis=1)             # (BT, 2H) bf16
        h1_new, c1_new = cell(b1, hcat, c1, w1_ref)
        # Layer-0 step s (independent of the layer-1 cell above).
        h0_new, c0_new = cell(xg_sc[s], h0, c0, whh0_ref)
        return (h0_new, c0_new, h1_new, c1_new)

    h0, c0, h1, c1 = lax.fori_loop(1, T, wave,
                                   (h0, c0, zeros_bf16, zeros_f32),
                                   unroll=True)

    # Epilogue: layer-1 step T-1.
    hcat = jnp.concatenate([h0, h1], axis=1)
    h1, _ = cell(b1, hcat, c1, w1_ref)

    # ---------- Final linear (lane-dense padded class dim) ----------
    o_ref[...] = (jnp.dot(h1, wout_ref[...], preferred_element_type=jnp.float32)
                  + bout_ref[...])


# -------------------- Weight preparation (done once) --------------------

def prepare_params(params):
    """Transpose, pad, stack, fuse biases and cast weights once."""
    prepared = {}
    H = HIDDEN_SIZE

    # Layer 0: padded transposed input weight + recurrent weight.
    w_ih0, w_hh0, b_ih0, b_hh0 = params["l0"]
    din = w_ih0.shape[1]
    din_p = _round_up(din, LANE)
    wih0 = jnp.zeros((din_p, 4 * H), jnp.float32).at[:din].set(w_ih0.T)
    prepared["wih0"] = wih0.astype(jnp.bfloat16)
    prepared["whh0"] = jnp.asarray(w_hh0.T, jnp.bfloat16)
    prepared["b0"] = jnp.asarray((b_ih0 + b_hh0).reshape(1, 4 * H), jnp.float32)

    # Layer 1: stacked [W_ih^T ; W_hh^T] for the fused [h0 ; h1_prev] matmul.
    w_ih1, w_hh1, b_ih1, b_hh1 = params["l1"]
    w1 = jnp.concatenate([w_ih1.T, w_hh1.T], axis=0)          # (2H, 4H)
    prepared["w1"] = jnp.asarray(w1, jnp.bfloat16)
    prepared["b1"] = jnp.asarray((b_ih1 + b_hh1).reshape(1, 4 * H), jnp.float32)

    # Classifier.
    w_out, b_out = params["out"]
    C = w_out.shape[0]
    CP = _round_up(C, LANE)
    wout = jnp.zeros((H, CP), jnp.float32).at[:, :C].set(w_out.T)
    prepared["wout"] = wout.astype(jnp.bfloat16)
    prepared["bout"] = jnp.zeros((1, CP), jnp.float32).at[0, :C].set(b_out)
    return prepared


# -------------------- Forward wrapper --------------------

@functools.partial(jax.jit, static_argnames=("num_classes",))
def lstm_forward(x, prepared, num_classes=NUM_CLASSES):
    """Equivalent of LSTM.forward: x (B, T, D_in) -> logits (B, num_classes)."""
    B, T, Din = x.shape
    H = HIDDEN_SIZE
    DinP = prepared["wih0"].shape[0]
    CP = prepared["wout"].shape[1]

    # Pad batch to 16 sublanes (bf16 packed vregs); tile batch for the grid.
    BP = _round_up(max(B, SUBLANE_BF16), SUBLANE_BF16)
    BT = BP if BP <= MAX_BATCH_TILE else MAX_BATCH_TILE
    BP = _round_up(BP, BT)
    num_blocks = BP // BT

    # batch_first -> time-major, pad, build directly in bf16 (no f32 staging).
    x_t = jnp.transpose(x, (1, 0, 2)).astype(jnp.bfloat16)    # (T, B, Din)
    x_p = jnp.zeros((T, BP, DinP), jnp.bfloat16).at[:, :B, :Din].set(x_t)

    def full_spec(shape):
        return pl.BlockSpec(shape, lambda i: (0,) * len(shape))

    out_padded = pl.pallas_call(
        fused_lstm_kernel,
        out_shape=jax.ShapeDtypeStruct((BP, CP), jnp.float32),
        grid=(num_blocks,),
        in_specs=[
            pl.BlockSpec((T, BT, DinP), lambda i: (0, i, 0)),
            full_spec(prepared["wih0"].shape),
            full_spec(prepared["whh0"].shape),
            full_spec(prepared["b0"].shape),
            full_spec(prepared["w1"].shape),
            full_spec(prepared["b1"].shape),
            full_spec(prepared["wout"].shape),
            full_spec(prepared["bout"].shape),
        ],
        out_specs=pl.BlockSpec((BT, CP), lambda i: (i, 0)),
        scratch_shapes=[
            pltpu.VMEM((T, BT, 4 * H), jnp.float32),   # hoisted layer-0 projections
        ],
        compiler_params=pltpu.CompilerParams(
            dimension_semantics=("parallel",)),
    )(x_p,
      prepared["wih0"], prepared["whh0"], prepared["b0"],
      prepared["w1"], prepared["b1"],
      prepared["wout"], prepared["bout"])

    return out_padded[:B, :num_classes]


# -------------------- Pure-JAX reference (f32, for sanity check) ------------

def lstm_forward_ref(x, params):
    B = x.shape[0]
    h_seq = jnp.transpose(x, (1, 0, 2))
    for layer in range(NUM_LAYERS):
        w_ih, w_hh, b_ih, b_hh = params[f"l{layer}"]
        H = w_hh.shape[1]

        def step(carry, xt):
            h, c = carry
            gates = xt @ w_ih.T + b_ih + h @ w_hh.T + b_hh
            i = jax.nn.sigmoid(gates[:, 0 * H:1 * H])
            f = jax.nn.sigmoid(gates[:, 1 * H:2 * H])
            g = jnp.tanh(gates[:, 2 * H:3 * H])
            o = jax.nn.sigmoid(gates[:, 3 * H:4 * H])
            c = f * c + i * g
            h = o * jnp.tanh(c)
            return (h, c), h

        init = (jnp.zeros((B, H), jnp.float32), jnp.zeros((B, H), jnp.float32))
        _, h_seq = jax.lax.scan(step, init, h_seq)
    last = h_seq[-1]
    w_out, b_out = params["out"]
    return last @ w_out.T + b_out


# -------------------- Parameter init --------------------

def init_params(key):
    params = {}
    k = 1.0 / jnp.sqrt(HIDDEN_SIZE)
    keys = jax.random.split(key, 4 * NUM_LAYERS + 2)
    ki = 0
    for layer in range(NUM_LAYERS):
        din = INPUT_LEN if layer == 0 else HIDDEN_SIZE
        w_ih = jax.random.uniform(keys[ki], (4 * HIDDEN_SIZE, din), jnp.float32, -k, k); ki += 1
        w_hh = jax.random.uniform(keys[ki], (4 * HIDDEN_SIZE, HIDDEN_SIZE), jnp.float32, -k, k); ki += 1
        b_ih = jax.random.uniform(keys[ki], (4 * HIDDEN_SIZE,), jnp.float32, -k, k); ki += 1
        b_hh = jax.random.uniform(keys[ki], (4 * HIDDEN_SIZE,), jnp.float32, -k, k); ki += 1
        params[f"l{layer}"] = (w_ih, w_hh, b_ih, b_hh)
    w_out = jax.random.uniform(keys[ki], (NUM_CLASSES, HIDDEN_SIZE), jnp.float32, -k, k); ki += 1
    b_out = jax.random.uniform(keys[ki], (NUM_CLASSES,), jnp.float32, -k, k)
    params["out"] = (w_out, b_out)
    return params


if __name__ == "__main__":
    key = jax.random.PRNGKey(0)
    pkey, xkey, xkey2 = jax.random.split(key, 3)
    params = init_params(pkey)
    prepared = prepare_params(params)

    # Small test (matches requested small shapes).
    B, T = 2, 8
    x = jax.random.normal(xkey, (B, T, INPUT_LEN), jnp.float32)
    out = jax.block_until_ready(lstm_forward(x, prepared))
    ref = jax.block_until_ready(lstm_forward_ref(x, params))
    assert out.shape == (B, NUM_CLASSES)
    # bf16 MXU operands / bf16 h carry (f32 accumulation & cell state) vs
    # full-f32 reference -> relaxed tolerance.
    assert jnp.allclose(out, ref, rtol=2e-2, atol=2e-2), "mismatch vs reference (T=8)"

    # Full sequence length of the target model (validates T=28 numerics/sizing).
    B2, T2 = 4, 28
    x2 = jax.random.normal(xkey2, (B2, T2, INPUT_LEN), jnp.float32)
    out2 = jax.block_until_ready(lstm_forward(x2, prepared))
    ref2 = jax.block_until_ready(lstm_forward_ref(x2, params))
    assert out2.shape == (B2, NUM_CLASSES)
    assert jnp.allclose(out2, ref2, rtol=5e-2, atol=5e-2), "mismatch vs reference (T=28)"

    print("KERNEL_OK")
</pallas_src>

<mosaic_0001>
module attributes {stable_mosaic.version = 11 : i64} {
  func.func @fused_lstm_kernel(%arg0: i32, %arg1: memref<8x16x128xbf16, #tpu.memory_space<vmem>>, %arg2: memref<128x512xbf16, #tpu.memory_space<vmem>>, %arg3: memref<128x512xbf16, #tpu.memory_space<vmem>>, %arg4: memref<1x512xf32, #tpu.memory_space<vmem>>, %arg5: memref<256x512xbf16, #tpu.memory_space<vmem>>, %arg6: memref<1x512xf32, #tpu.memory_space<vmem>>, %arg7: memref<128x128xbf16, #tpu.memory_space<vmem>>, %arg8: memref<1x128xf32, #tpu.memory_space<vmem>>, %arg9: memref<16x128xf32, #tpu.memory_space<vmem>>, %arg10: memref<8x16x512xf32, #tpu.memory_space<vmem>>) attributes {dimension_semantics = [#tpu.dimension_semantics<parallel>], iteration_bounds = array<i64: 1>, scalar_prefetch = 0 : i64, scratch_operands = 1 : i64, tpu.core_type = #tpu.core_type<tc>, window_params = [{transform_indices = @transform_0, window_bounds = array<i64: 8, 16, 128>}, {pipeline_mode = #tpu.pipeline_mode<synchronous>, transform_indices = @transform_1, window_bounds = array<i64: 128, 512>}, {pipeline_mode = #tpu.pipeline_mode<synchronous>, transform_indices = @transform_2, window_bounds = array<i64: 128, 512>}, {pipeline_mode = #tpu.pipeline_mode<synchronous>, transform_indices = @transform_3, window_bounds = array<i64: 1, 512>}, {pipeline_mode = #tpu.pipeline_mode<synchronous>, transform_indices = @transform_4, window_bounds = array<i64: 256, 512>}, {pipeline_mode = #tpu.pipeline_mode<synchronous>, transform_indices = @transform_5, window_bounds = array<i64: 1, 512>}, {pipeline_mode = #tpu.pipeline_mode<synchronous>, transform_indices = @transform_6, window_bounds = array<i64: 128, 128>}, {pipeline_mode = #tpu.pipeline_mode<synchronous>, transform_indices = @transform_7, window_bounds = array<i64: 1, 128>}, {transform_indices = @transform_8, window_bounds = array<i64: 16, 128>}]} {
    %c0 = arith.constant 0 : index
    %c0_0 = arith.constant 0 : index
    %c0_1 = arith.constant 0 : index
    %0 = vector.load %arg1[%c0, %c0_0, %c0_1] : memref<8x16x128xbf16, #tpu.memory_space<vmem>>, vector<8x16x128xbf16>
    %1 = vector.shape_cast %0 : vector<8x16x128xbf16> to vector<128x128xbf16>
    %c0_2 = arith.constant 0 : index
    %c0_3 = arith.constant 0 : index
    %2 = vector.load %arg2[%c0_2, %c0_3] : memref<128x512xbf16, #tpu.memory_space<vmem>>, vector<128x512xbf16>
    %cst = arith.constant dense<0.000000e+00> : vector<128x512xf32>
    %3 = tpu.matmul %1, %2, %cst {dimension_numbers = #tpu.dot_dimension_numbers<[1], [0], [0], [1], [0, 0, 1, 1], [], []>} : vector<128x128xbf16>, vector<128x512xbf16>, vector<128x512xf32> -> vector<128x512xf32>
    %4 = vector.shape_cast %3 : vector<128x512xf32> to vector<8x16x512xf32>
    %c0_4 = arith.constant 0 : index
    %c0_5 = arith.constant 0 : index
    %5 = vector.load %arg4[%c0_4, %c0_5] : memref<1x512xf32, #tpu.memory_space<vmem>>, vector<1x512xf32>
    %6 = vector.shape_cast %5 : vector<1x512xf32> to vector<1x1x512xf32>
    %7 = vector.broadcast %6 : vector<1x1x512xf32> to vector<8x16x512xf32>
    %8 = arith.addf %4, %7 : vector<8x16x512xf32>
    %c0_6 = arith.constant 0 : index
    %c0_7 = arith.constant 0 : index
    %c0_8 = arith.constant 0 : index
    %9 = vector.load %arg10[%c0_6, %c0_7, %c0_8] : memref<8x16x512xf32, #tpu.memory_space<vmem>>, vector<8x16x512xf32>
    tpu.vector_store %arg10[%c0_6, %c0_7, %c0_8], %8 {strides = array<i32>} : memref<8x16x512xf32, #tpu.memory_space<vmem>>, vector<8x16x512xf32>,
    %c0_9 = arith.constant 0 : index
    %c0_10 = arith.constant 0 : index
    %10 = vector.load %arg6[%c0_9, %c0_10] : memref<1x512xf32, #tpu.memory_space<vmem>>, vector<1x512xf32>
    %cst_11 = arith.constant 0.000000e+00 : f32
    %11 = vector.broadcast %cst_11 : f32 to vector<16x128xf32>
    %cst_12 = arith.constant 0.000000e+00 : bf16
    %12 = vector.broadcast %cst_12 : bf16 to vector<16x128xbf16>
    %c0_13 = arith.constant 0 : index
    %c0_14 = arith.constant 0 : index
    %c0_15 = arith.constant 0 : index
    %13 = vector.load %arg10[%c0_13, %c0_14, %c0_15] : memref<8x16x512xf32, #tpu.memory_space<vmem>>, vector<1x16x512xf32>
    %14 = vector.shape_cast %13 : vector<1x16x512xf32> to vector<16x512xf32>
    %c0_16 = arith.constant 0 : index
    %c0_17 = arith.constant 0 : index
    %15 = vector.load %arg3[%c0_16, %c0_17] : memref<128x512xbf16, #tpu.memory_space<vmem>>, vector<128x512xbf16>
    %cst_18 = arith.constant dense<0.000000e+00> : vector<16x512xf32>
    %16 = tpu.matmul %12, %15, %cst_18 {dimension_numbers = #tpu.dot_dimension_numbers<[1], [0], [0], [1], [0, 0, 1, 1], [], []>} : vector<16x128xbf16>, vector<128x512xbf16>, vector<16x512xf32> -> vector<16x512xf32>
    %17 = arith.addf %14, %16 : vector<16x512xf32>
    %18 = vector.extract_strided_slice %17 {offsets = [0, 0], sizes = [16, 128], strides = [1, 1]} : vector<16x512xf32> to vector<16x128xf32>
    %19 = arith.negf %18 : vector<16x128xf32>
    %20 = math.exp %19 : vector<16x128xf32>
    %cst_19 = arith.constant 1.000000e+00 : f32
    %21 = vector.broadcast %cst_19 : f32 to vector<16x128xf32>
    %22 = arith.addf %21, %20 : vector<16x128xf32>
    %23 = arith.divf %21, %22 : vector<16x128xf32>
    %24 = vector.extract_strided_slice %17 {offsets = [0, 128], sizes = [16, 128], strides = [1, 1]} : vector<16x512xf32> to vector<16x128xf32>
    %25 = arith.negf %24 : vector<16x128xf32>
    %26 = math.exp %25 : vector<16x128xf32>
    %cst_20 = arith.constant 1.000000e+00 : f32
    %27 = vector.broadcast %cst_20 : f32 to vector<16x128xf32>
    %28 = arith.addf %27, %26 : vector<16x128xf32>
    %29 = arith.divf %27, %28 : vector<16x128xf32>
    %30 = vector.extract_strided_slice %17 {offsets = [0, 256], sizes = [16, 128], strides = [1, 1]} : vector<16x512xf32> to vector<16x128xf32>
    %31 = math.tanh %30 : vector<16x128xf32>
    %32 = vector.extract_strided_slice %17 {offsets = [0, 384], sizes = [16, 128], strides = [1, 1]} : vector<16x512xf32> to vector<16x128xf32>
    %33 = arith.negf %32 : vector<16x128xf32>
    %34 = math.exp %33 : vector<16x128xf32>
    %cst_21 = arith.constant 1.000000e+00 : f32
    %35 = vector.broadcast %cst_21 : f32 to vector<16x128xf32>
    %36 = arith.addf %35, %34 : vector<16x128xf32>
    %37 = arith.divf %35, %36 : vector<16x128xf32>
    %38 = arith.mulf %29, %11 : vector<16x128xf32>
    %39 = arith.mulf %23, %31 : vector<16x128xf32>
    %40 = arith.addf %38, %39 : vector<16x128xf32>
    %41 = math.tanh %40 : vector<16x128xf32>
    %42 = arith.mulf %37, %41 : vector<16x128xf32>
    %43 = arith.truncf %42 : vector<16x128xf32> to vector<16x128xbf16>
    %c1_i32 = arith.constant 1 : i32
    %44 = tpu.concatenate %43, %12 in 1 : vector<16x128xbf16>, vector<16x128xbf16> -> vector<16x256xbf16>
    %c0_22 = arith.constant 0 : index
    %c0_23 = arith.constant 0 : index
    %45 = vector.load %arg5[%c0_22, %c0_23] : memref<256x512xbf16, #tpu.memory_space<vmem>>, vector<256x512xbf16>
    %cst_24 = arith.constant dense<0.000000e+00> : vector<16x512xf32>
    %46 = tpu.matmul %44, %45, %cst_24 {dimension_numbers = #tpu.dot_dimension_numbers<[1], [0], [0], [1], [0, 0, 1, 1], [], []>} : vector<16x256xbf16>, vector<256x512xbf16>, vector<16x512xf32> -> vector<16x512xf32>
    %47 = vector.broadcast %10 : vector<1x512xf32> to vector<16x512xf32>
    %48 = arith.addf %47, %46 : vector<16x512xf32>
    %49 = vector.extract_strided_slice %48 {offsets = [0, 0], sizes = [16, 128], strides = [1, 1]} : vector<16x512xf32> to vector<16x128xf32>
    %50 = arith.negf %49 : vector<16x128xf32>
    %51 = math.exp %50 : vector<16x128xf32>
    %cst_25 = arith.constant 1.000000e+00 : f32
    %52 = vector.broadcast %cst_25 : f32 to vector<16x128xf32>
    %53 = arith.addf %52, %51 : vector<16x128xf32>
    %54 = arith.divf %52, %53 : vector<16x128xf32>
    %55 = vector.extract_strided_slice %48 {offsets = [0, 128], sizes = [16, 128], strides = [1, 1]} : vector<16x512xf32> to vector<16x128xf32>
    %56 = arith.negf %55 : vector<16x128xf32>
    %57 = math.exp %56 : vector<16x128xf32>
    %cst_26 = arith.constant 1.000000e+00 : f32
    %58 = vector.broadcast %cst_26 : f32 to vector<16x128xf32>
    %59 = arith.addf %58, %57 : vector<16x128xf32>
    %60 = arith.divf %58, %59 : vector<16x128xf32>
    %61 = vector.extract_strided_slice %48 {offsets = [0, 256], sizes = [16, 128], strides = [1, 1]} : vector<16x512xf32> to vector<16x128xf32>
    %62 = math.tanh %61 : vector<16x128xf32>
    %63 = vector.extract_strided_slice %48 {offsets = [0, 384], sizes = [16, 128], strides = [1, 1]} : vector<16x512xf32> to vector<16x128xf32>
    %64 = arith.negf %63 : vector<16x128xf32>
    %65 = math.exp %64 : vector<16x128xf32>
    %cst_27 = arith.constant 1.000000e+00 : f32
    %66 = vector.broadcast %cst_27 : f32 to vector<16x128xf32>
    %67 = arith.addf %66, %65 : vector<16x128xf32>
    %68 = arith.divf %66, %67 : vector<16x128xf32>
    %69 = arith.mulf %60, %11 : vector<16x128xf32>
    %70 = arith.mulf %54, %62 : vector<16x128xf32>
    %71 = arith.addf %69, %70 : vector<16x128xf32>
    %72 = math.tanh %71 : vector<16x128xf32>
    %73 = arith.mulf %68, %72 : vector<16x128xf32>
    %74 = arith.truncf %73 : vector<16x128xf32> to vector<16x128xbf16>
    %75 = arith.index_cast %c1_i32 : i32 to index
    %c0_28 = arith.constant 0 : index
    %c0_29 = arith.constant 0 : index
    %76 = vector.load %arg10[%75, %c0_28, %c0_29] : memref<8x16x512xf32, #tpu.memory_space<vmem>>, vector<1x16x512xf32>
    %77 = vector.shape_cast %76 : vector<1x16x512xf32> to vector<16x512xf32>
    %c0_30 = arith.constant 0 : index
    %c0_31 = arith.constant 0 : index
    %78 = vector.load %arg3[%c0_30, %c0_31] : memref<128x512xbf16, #tpu.memory_space<vmem>>, vector<128x512xbf16>
    %cst_32 = arith.constant dense<0.000000e+00> : vector<16x512xf32>
    %79 = tpu.matmul %43, %78, %cst_32 {dimension_numbers = #tpu.dot_dimension_numbers<[1], [0], [0], [1], [0, 0, 1, 1], [], []>} : vector<16x128xbf16>, vector<128x512xbf16>, vector<16x512xf32> -> vector<16x512xf32>
    %80 = arith.addf %77, %79 : vector<16x512xf32>
    %81 = vector.extract_strided_slice %80 {offsets = [0, 0], sizes = [16, 128], strides = [1, 1]} : vector<16x512xf32> to vector<16x128xf32>
    %82 = arith.negf %81 : vector<16x128xf32>
    %83 = math.exp %82 : vector<16x128xf32>
    %cst_33 = arith.constant 1.000000e+00 : f32
    %84 = vector.broadcast %cst_33 : f32 to vector<16x128xf32>
    %85 = arith.addf %84, %83 : vector<16x128xf32>
    %86 = arith.divf %84, %85 : vector<16x128xf32>
    %87 = vector.extract_strided_slice %80 {offsets = [0, 128], sizes = [16, 128], strides = [1, 1]} : vector<16x512xf32> to vector<16x128xf32>
    %88 = arith.negf %87 : vector<16x128xf32>
    %89 = math.exp %88 : vector<16x128xf32>
    %cst_34 = arith.constant 1.000000e+00 : f32
    %90 = vector.broadcast %cst_34 : f32 to vector<16x128xf32>
    %91 = arith.addf %90, %89 : vector<16x128xf32>
    %92 = arith.divf %90, %91 : vector<16x128xf32>
    %93 = vector.extract_strided_slice %80 {offsets = [0, 256], sizes = [16, 128], strides = [1, 1]} : vector<16x512xf32> to vector<16x128xf32>
    %94 = math.tanh %93 : vector<16x128xf32>
    %95 = vector.extract_strided_slice %80 {offsets = [0, 384], sizes = [16, 128], strides = [1, 1]} : vector<16x512xf32> to vector<16x128xf32>
    %96 = arith.negf %95 : vector<16x128xf32>
    %97 = math.exp %96 : vector<16x128xf32>
    %cst_35 = arith.constant 1.000000e+00 : f32
    %98 = vector.broadcast %cst_35 : f32 to vector<16x128xf32>
    %99 = arith.addf %98, %97 : vector<16x128xf32>
    %100 = arith.divf %98, %99 : vector<16x128xf32>
    %101 = arith.mulf %92, %40 : vector<16x128xf32>
    %102 = arith.mulf %86, %94 : vector<16x128xf32>
    %103 = arith.addf %101, %102 : vector<16x128xf32>
    %104 = math.tanh %103 : vector<16x128xf32>
    %105 = arith.mulf %100, %104 : vector<16x128xf32>
    %106 = arith.truncf %105 : vector<16x128xf32> to vector<16x128xbf16>
    %c2_i32 = arith.constant 2 : i32
    %107 = tpu.concatenate %106, %74 in 1 : vector<16x128xbf16>, vector<16x128xbf16> -> vector<16x256xbf16>
    %c0_36 = arith.constant 0 : index
    %c0_37 = arith.constant 0 : index
    %108 = vector.load %arg5[%c0_36, %c0_37] : memref<256x512xbf16, #tpu.memory_space<vmem>>, vector<256x512xbf16>
    %cst_38 = arith.constant dense<0.000000e+00> : vector<16x512xf32>
    %109 = tpu.matmul %107, %108, %cst_38 {dimension_numbers = #tpu.dot_dimension_numbers<[1], [0], [0], [1], [0, 0, 1, 1], [], []>} : vector<16x256xbf16>, vector<256x512xbf16>, vector<16x512xf32> -> vector<16x512xf32>
    %110 = vector.broadcast %10 : vector<1x512xf32> to vector<16x512xf32>
    %111 = arith.addf %110, %109 : vector<16x512xf32>
    %112 = vector.extract_strided_slice %111 {offsets = [0, 0], sizes = [16, 128], strides = [1, 1]} : vector<16x512xf32> to vector<16x128xf32>
    %113 = arith.negf %112 : vector<16x128xf32>
    %114 = math.exp %113 : vector<16x128xf32>
    %cst_39 = arith.constant 1.000000e+00 : f32
    %115 = vector.broadcast %cst_39 : f32 to vector<16x128xf32>
    %116 = arith.addf %115, %114 : vector<16x128xf32>
    %117 = arith.divf %115, %116 : vector<16x128xf32>
    %118 = vector.extract_strided_slice %111 {offsets = [0, 128], sizes = [16, 128], strides = [1, 1]} : vector<16x512xf32> to vector<16x128xf32>
    %119 = arith.negf %118 : vector<16x128xf32>
    %120 = math.exp %119 : vector<16x128xf32>
    %cst_40 = arith.constant 1.000000e+00 : f32
    %121 = vector.broadcast %cst_40 : f32 to vector<16x128xf32>
    %122 = arith.addf %121, %120 : vector<16x128xf32>
    %123 = arith.divf %121, %122 : vector<16x128xf32>
    %124 = vector.extract_strided_slice %111 {offsets = [0, 256], sizes = [16, 128], strides = [1, 1]} : vector<16x512xf32> to vector<16x128xf32>
    %125 = math.tanh %124 : vector<16x128xf32>
    %126 = vector.extract_strided_slice %111 {offsets = [0, 384], sizes = [16, 128], strides = [1, 1]} : vector<16x512xf32> to vector<16x128xf32>
    %127 = arith.negf %126 : vector<16x128xf32>
    %128 = math.exp %127 : vector<16x128xf32>
    %cst_41 = arith.constant 1.000000e+00 : f32
    %129 = vector.broadcast %cst_41 : f32 to vector<16x128xf32>
    %130 = arith.addf %129, %128 : vector<16x128xf32>
    %131 = arith.divf %129, %130 : vector<16x128xf32>
    %132 = arith.mulf %123, %71 : vector<16x128xf32>
    %133 = arith.mulf %117, %125 : vector<16x128xf32>
    %134 = arith.addf %132, %133 : vector<16x128xf32>
    %135 = math.tanh %134 : vector<16x128xf32>
    %136 = arith.mulf %131, %135 : vector<16x128xf32>
    %137 = arith.truncf %136 : vector<16x128xf32> to vector<16x128xbf16>
    %138 = arith.index_cast %c2_i32 : i32 to index
    %c0_42 = arith.constant 0 : index
    %c0_43 = arith.constant 0 : index
    %139 = vector.load %arg10[%138, %c0_42, %c0_43] : memref<8x16x512xf32, #tpu.memory_space<vmem>>, vector<1x16x512xf32>
    %140 = vector.shape_cast %139 : vector<1x16x512xf32> to vector<16x512xf32>
    %c0_44 = arith.constant 0 : index
    %c0_45 = arith.constant 0 : index
    %141 = vector.load %arg3[%c0_44, %c0_45] : memref<128x512xbf16, #tpu.memory_space<vmem>>, vector<128x512xbf16>
    %cst_46 = arith.constant dense<0.000000e+00> : vector<16x512xf32>
    %142 = tpu.matmul %106, %141, %cst_46 {dimension_numbers = #tpu.dot_dimension_numbers<[1], [0], [0], [1], [0, 0, 1, 1], [], []>} : vector<16x128xbf16>, vector<128x512xbf16>, vector<16x512xf32> -> vector<16x512xf32>
    %143 = arith.addf %140, %142 : vector<16x512xf32>
    %144 = vector.extract_strided_slice %143 {offsets = [0, 0], sizes = [16, 128], strides = [1, 1]} : vector<16x512xf32> to vector<16x128xf32>
    %145 = arith.negf %144 : vector<16x128xf32>
    %146 = math.exp %145 : vector<16x128xf32>
    %cst_47 = arith.constant 1.000000e+00 : f32
    %147 = vector.broadcast %cst_47 : f32 to vector<16x128xf32>
    %148 = arith.addf %147, %146 : vector<16x128xf32>
    %149 = arith.divf %147, %148 : vector<16x128xf32>
    %150 = vector.extract_strided_slice %143 {offsets = [0, 128], sizes = [16, 128], strides = [1, 1]} : vector<16x512xf32> to vector<16x128xf32>
    %151 = arith.negf %150 : vector<16x128xf32>
    %152 = math.exp %151 : vector<16x128xf32>
    %cst_48 = arith.constant 1.000000e+00 : f32
    %153 = vector.broadcast %cst_48 : f32 to vector<16x128xf32>
    %154 = arith.addf %153, %152 : vector<16x128xf32>
    %155 = arith.divf %153, %154 : vector<16x128xf32>
    %156 = vector.extract_strided_slice %143 {offsets = [0, 256], sizes = [16, 128], strides = [1, 1]} : vector<16x512xf32> to vector<16x128xf32>
    %157 = math.tanh %156 : vector<16x128xf32>
    %158 = vector.extract_strided_slice %143 {offsets = [0, 384], sizes = [16, 128], strides = [1, 1]} : vector<16x512xf32> to vector<16x128xf32>
    %159 = arith.negf %158 : vector<16x128xf32>
    %160 = math.exp %159 : vector<16x128xf32>
    %cst_49 = arith.constant 1.000000e+00 : f32
    %161 = vector.broadcast %cst_49 : f32 to vector<16x128xf32>
    %162 = arith.addf %161, %160 : vector<16x128xf32>
    %163 = arith.divf %161, %162 : vector<16x128xf32>
    %164 = arith.mulf %155, %103 : vector<16x128xf32>
    %165 = arith.mulf %149, %157 : vector<16x128xf32>
    %166 = arith.addf %164, %165 : vector<16x128xf32>
    %167 = math.tanh %166 : vector<16x128xf32>
    %168 = arith.mulf %163, %167 : vector<16x128xf32>
    %169 = arith.truncf %168 : vector<16x128xf32> to vector<16x128xbf16>
    %c3_i32 = arith.constant 3 : i32
    %170 = tpu.concatenate %169, %137 in 1 : vector<16x128xbf16>, vector<16x128xbf16> -> vector<16x256xbf16>
    %c0_50 = arith.constant 0 : index
    %c0_51 = arith.constant 0 : index
    %171 = vector.load %arg5[%c0_50, %c0_51] : memref<256x512xbf16, #tpu.memory_space<vmem>>, vector<256x512xbf16>
    %cst_52 = arith.constant dense<0.000000e+00> : vector<16x512xf32>
    %172 = tpu.matmul %170, %171, %cst_52 {dimension_numbers = #tpu.dot_dimension_numbers<[1], [0], [0], [1], [0, 0, 1, 1], [], []>} : vector<16x256xbf16>, vector<256x512xbf16>, vector<16x512xf32> -> vector<16x512xf32>
    %173 = vector.broadcast %10 : vector<1x512xf32> to vector<16x512xf32>
    %174 = arith.addf %173, %172 : vector<16x512xf32>
    %175 = vector.extract_strided_slice %174 {offsets = [0, 0], sizes = [16, 128], strides = [1, 1]} : vector<16x512xf32> to vector<16x128xf32>
    %176 = arith.negf %175 : vector<16x128xf32>
    %177 = math.exp %176 : vector<16x128xf32>
    %cst_53 = arith.constant 1.000000e+00 : f32
    %178 = vector.broadcast %cst_53 : f32 to vector<16x128xf32>
    %179 = arith.addf %178, %177 : vector<16x128xf32>
    %180 = arith.divf %178, %179 : vector<16x128xf32>
    %181 = vector.extract_strided_slice %174 {offsets = [0, 128], sizes = [16, 128], strides = [1, 1]} : vector<16x512xf32> to vector<16x128xf32>
    %182 = arith.negf %181 : vector<16x128xf32>
    %183 = math.exp %182 : vector<16x128xf32>
    %cst_54 = arith.constant 1.000000e+00 : f32
    %184 = vector.broadcast %cst_54 : f32 to vector<16x128xf32>
    %185 = arith.addf %184, %183 : vector<16x128xf32>
    %186 = arith.divf %184, %185 : vector<16x128xf32>
    %187 = vector.extract_strided_slice %174 {offsets = [0, 256], sizes = [16, 128], strides = [1, 1]} : vector<16x512xf32> to vector<16x128xf32>
    %188 = math.tanh %187 : vector<16x128xf32>
    %189 = vector.extract_strided_slice %174 {offsets = [0, 384], sizes = [16, 128], strides = [1, 1]} : vector<16x512xf32> to vector<16x128xf32>
    %190 = arith.negf %189 : vector<16x128xf32>
    %191 = math.exp %190 : vector<16x128xf32>
    %cst_55 = arith.constant 1.000000e+00 : f32
    %192 = vector.broadcast %cst_55 : f32 to vector<16x128xf32>
    %193 = arith.addf %192, %191 : vector<16x128xf32>
    %194 = arith.divf %192, %193 : vector<16x128xf32>
    %195 = arith.mulf %186, %134 : vector<16x128xf32>
    %196 = arith.mulf %180, %188 : vector<16x128xf32>
    %197 = arith.addf %195, %196 : vector<16x128xf32>
    %198 = math.tanh %197 : vector<16x128xf32>
    %199 = arith.mulf %194, %198 : vector<16x128xf32>
    %200 = arith.truncf %199 : vector<16x128xf32> to vector<16x128xbf16>
    %201 = arith.index_cast %c3_i32 : i32 to index
    %c0_56 = arith.constant 0 : index
    %c0_57 = arith.constant 0 : index
    %202 = vector.load %arg10[%201, %c0_56, %c0_57] : memref<8x16x512xf32, #tpu.memory_space<vmem>>, vector<1x16x512xf32>
    %203 = vector.shape_cast %202 : vector<1x16x512xf32> to vector<16x512xf32>
    %c0_58 = arith.constant 0 : index
    %c0_59 = arith.constant 0 : index
    %204 = vector.load %arg3[%c0_58, %c0_59] : memref<128x512xbf16, #tpu.memory_space<vmem>>, vector<128x512xbf16>
    %cst_60 = arith.constant dense<0.000000e+00> : vector<16x512xf32>
    %205 = tpu.matmul %169, %204, %cst_60 {dimension_numbers = #tpu.dot_dimension_numbers<[1], [0], [0], [1], [0, 0, 1, 1], [], []>} : vector<16x128xbf16>, vector<128x512xbf16>, vector<16x512xf32> -> vector<16x512xf32>
    %206 = arith.addf %203, %205 : vector<16x512xf32>
    %207 = vector.extract_strided_slice %206 {offsets = [0, 0], sizes = [16, 128], strides = [1, 1]} : vector<16x512xf32> to vector<16x128xf32>
    %208 = arith.negf %207 : vector<16x128xf32>
    %209 = math.exp %208 : vector<16x128xf32>
    %cst_61 = arith.constant 1.000000e+00 : f32
    %210 = vector.broadcast %cst_61 : f32 to vector<16x128xf32>
    %211 = arith.addf %210, %209 : vector<16x128xf32>
    %212 = arith.divf %210, %211 : vector<16x128xf32>
    %213 = vector.extract_strided_slice %206 {offsets = [0, 128], sizes = [16, 128], strides = [1, 1]} : vector<16x512xf32> to vector<16x128xf32>
    %214 = arith.negf %213 : vector<16x128xf32>
    %215 = math.exp %214 : vector<16x128xf32>
    %cst_62 = arith.constant 1.000000e+00 : f32
    %216 = vector.broadcast %cst_62 : f32 to vector<16x128xf32>
    %217 = arith.addf %216, %215 : vector<16x128xf32>
    %218 = arith.divf %216, %217 : vector<16x128xf32>
    %219 = vector.extract_strided_slice %206 {offsets = [0, 256], sizes = [16, 128], strides = [1, 1]} : vector<16x512xf32> to vector<16x128xf32>
    %220 = math.tanh %219 : vector<16x128xf32>
    %221 = vector.extract_strided_slice %206 {offsets = [0, 384], sizes = [16, 128], strides = [1, 1]} : vector<16x512xf32> to vector<16x128xf32>
    %222 = arith.negf %221 : vector<16x128xf32>
    %223 = math.exp %222 : vector<16x128xf32>
    %cst_63 = arith.constant 1.000000e+00 : f32
    %224 = vector.broadcast %cst_63 : f32 to vector<16x128xf32>
    %225 = arith.addf %224, %223 : vector<16x128xf32>
    %226 = arith.divf %224, %225 : vector<16x128xf32>
    %227 = arith.mulf %218, %166 : vector<16x128xf32>
    %228 = arith.mulf %212, %220 : vector<16x128xf32>
    %229 = arith.addf %227, %228 : vector<16x128xf32>
    %230 = math.tanh %229 : vector<16x128xf32>
    %231 = arith.mulf %226, %230 : vector<16x128xf32>
    %232 = arith.truncf %231 : vector<16x128xf32> to vector<16x128xbf16>
    %c4_i32 = arith.constant 4 : i32
    %233 = tpu.concatenate %232, %200 in 1 : vector<16x128xbf16>, vector<16x128xbf16> -> vector<16x256xbf16>
    %c0_64 = arith.constant 0 : index
    %c0_65 = arith.constant 0 : index
    %234 = vector.load %arg5[%c0_64, %c0_65] : memref<256x512xbf16, #tpu.memory_space<vmem>>, vector<256x512xbf16>
    %cst_66 = arith.constant dense<0.000000e+00> : vector<16x512xf32>
    %235 = tpu.matmul %233, %234, %cst_66 {dimension_numbers = #tpu.dot_dimension_numbers<[1], [0], [0], [1], [0, 0, 1, 1], [], []>} : vector<16x256xbf16>, vector<256x512xbf16>, vector<16x512xf32> -> vector<16x512xf32>
    %236 = vector.broadcast %10 : vector<1x512xf32> to vector<16x512xf32>
    %237 = arith.addf %236, %235 : vector<16x512xf32>
    %238 = vector.extract_strided_slice %237 {offsets = [0, 0], sizes = [16, 128], strides = [1, 1]} : vector<16x512xf32> to vector<16x128xf32>
    %239 = arith.negf %238 : vector<16x128xf32>
    %240 = math.exp %239 : vector<16x128xf32>
    %cst_67 = arith.constant 1.000000e+00 : f32
    %241 = vector.broadcast %cst_67 : f32 to vector<16x128xf32>
    %242 = arith.addf %241, %240 : vector<16x128xf32>
    %243 = arith.divf %241, %242 : vector<16x128xf32>
    %244 = vector.extract_strided_slice %237 {offsets = [0, 128], sizes = [16, 128], strides = [1, 1]} : vector<16x512xf32> to vector<16x128xf32>
    %245 = arith.negf %244 : vector<16x128xf32>
    %246 = math.exp %245 : vector<16x128xf32>
    %cst_68 = arith.constant 1.000000e+00 : f32
    %247 = vector.broadcast %cst_68 : f32 to vector<16x128xf32>
    %248 = arith.addf %247, %246 : vector<16x128xf32>
    %249 = arith.divf %247, %248 : vector<16x128xf32>
    %250 = vector.extract_strided_slice %237 {offsets = [0, 256], sizes = [16, 128], strides = [1, 1]} : vector<16x512xf32> to vector<16x128xf32>
    %251 = math.tanh %250 : vector<16x128xf32>
    %252 = vector.extract_strided_slice %237 {offsets = [0, 384], sizes = [16, 128], strides = [1, 1]} : vector<16x512xf32> to vector<16x128xf32>
    %253 = arith.negf %252 : vector<16x128xf32>
    %254 = math.exp %253 : vector<16x128xf32>
    %cst_69 = arith.constant 1.000000e+00 : f32
    %255 = vector.broadcast %cst_69 : f32 to vector<16x128xf32>
    %256 = arith.addf %255, %254 : vector<16x128xf32>
    %257 = arith.divf %255, %256 : vector<16x128xf32>
    %258 = arith.mulf %249, %197 : vector<16x128xf32>
    %259 = arith.mulf %243, %251 : vector<16x128xf32>
    %260 = arith.addf %258, %259 : vector<16x128xf32>
    %261 = math.tanh %260 : vector<16x128xf32>
    %262 = arith.mulf %257, %261 : vector<16x128xf32>
    %263 = arith.truncf %262 : vector<16x128xf32> to vector<16x128xbf16>
    %264 = arith.index_cast %c4_i32 : i32 to index
    %c0_70 = arith.constant 0 : index
    %c0_71 = arith.constant 0 : index
    %265 = vector.load %arg10[%264, %c0_70, %c0_71] : memref<8x16x512xf32, #tpu.memory_space<vmem>>, vector<1x16x512xf32>
    %266 = vector.shape_cast %265 : vector<1x16x512xf32> to vector<16x512xf32>
    %c0_72 = arith.constant 0 : index
    %c0_73 = arith.constant 0 : index
    %267 = vector.load %arg3[%c0_72, %c0_73] : memref<128x512xbf16, #tpu.memory_space<vmem>>, vector<128x512xbf16>
    %cst_74 = arith.constant dense<0.000000e+00> : vector<16x512xf32>
    %268 = tpu.matmul %232, %267, %cst_74 {dimension_numbers = #tpu.dot_dimension_numbers<[1], [0], [0], [1], [0, 0, 1, 1], [], []>} : vector<16x128xbf16>, vector<128x512xbf16>, vector<16x512xf32> -> vector<16x512xf32>
    %269 = arith.addf %266, %268 : vector<16x512xf32>
    %270 = vector.extract_strided_slice %269 {offsets = [0, 0], sizes = [16, 128], strides = [1, 1]} : vector<16x512xf32> to vector<16x128xf32>
    %271 = arith.negf %270 : vector<16x128xf32>
    %272 = math.exp %271 : vector<16x128xf32>
    %cst_75 = arith.constant 1.000000e+00 : f32
    %273 = vector.broadcast %cst_75 : f32 to vector<16x128xf32>
    %274 = arith.addf %273, %272 : vector<16x128xf32>
    %275 = arith.divf %273, %274 : vector<16x128xf32>
    %276 = vector.extract_strided_slice %269 {offsets = [0, 128], sizes = [16, 128], strides = [1, 1]} : vector<16x512xf32> to vector<16x128xf32>
    %277 = arith.negf %276 : vector<16x128xf32>
    %278 = math.exp %277 : vector<16x128xf32>
    %cst_76 = arith.constant 1.000000e+00 : f32
    %279 = vector.broadcast %cst_76 : f32 to vector<16x128xf32>
    %280 = arith.addf %279, %278 : vector<16x128xf32>
    %281 = arith.divf %279, %280 : vector<16x128xf32>
    %282 = vector.extract_strided_slice %269 {offsets = [0, 256], sizes = [16, 128], strides = [1, 1]} : vector<16x512xf32> to vector<16x128xf32>
    %283 = math.tanh %282 : vector<16x128xf32>
    %284 = vector.extract_strided_slice %269 {offsets = [0, 384], sizes = [16, 128], strides = [1, 1]} : vector<16x512xf32> to vector<16x128xf32>
    %285 = arith.negf %284 : vector<16x128xf32>
    %286 = math.exp %285 : vector<16x128xf32>
    %cst_77 = arith.constant 1.000000e+00 : f32
    %287 = vector.broadcast %cst_77 : f32 to vector<16x128xf32>
    %288 = arith.addf %287, %286 : vector<16x128xf32>
    %289 = arith.divf %287, %288 : vector<16x128xf32>
    %290 = arith.mulf %281, %229 : vector<16x128xf32>
    %291 = arith.mulf %275, %283 : vector<16x128xf32>
    %292 = arith.addf %290, %291 : vector<16x128xf32>
    %293 = math.tanh %292 : vector<16x128xf32>
    %294 = arith.mulf %289, %293 : vector<16x128xf32>
    %295 = arith.truncf %294 : vector<16x128xf32> to vector<16x128xbf16>
    %c5_i32 = arith.constant 5 : i32
    %296 = tpu.concatenate %295, %263 in 1 : vector<16x128xbf16>, vector<16x128xbf16> -> vector<16x256xbf16>
    %c0_78 = arith.constant 0 : index
    %c0_79 = arith.constant 0 : index
    %297 = vector.load %arg5[%c0_78, %c0_79] : memref<256x512xbf16, #tpu.memory_space<vmem>>, vector<256x512xbf16>
    %cst_80 = arith.constant dense<0.000000e+00> : vector<16x512xf32>
    %298 = tpu.matmul %296, %297, %cst_80 {dimension_numbers = #tpu.dot_dimension_numbers<[1], [0], [0], [1], [0, 0, 1, 1], [], []>} : vector<16x256xbf16>, vector<256x512xbf16>, vector<16x512xf32> -> vector<16x512xf32>
    %299 = vector.broadcast %10 : vector<1x512xf32> to vector<16x512xf32>
    %300 = arith.addf %299, %298 : vector<16x512xf32>
    %301 = vector.extract_strided_slice %300 {offsets = [0, 0], sizes = [16, 128], strides = [1, 1]} : vector<16x512xf32> to vector<16x128xf32>
    %302 = arith.negf %301 : vector<16x128xf32>
    %303 = math.exp %302 : vector<16x128xf32>
    %cst_81 = arith.constant 1.000000e+00 : f32
    %304 = vector.broadcast %cst_81 : f32 to vector<16x128xf32>
    %305 = arith.addf %304, %303 : vector<16x128xf32>
    %306 = arith.divf %304, %305 : vector<16x128xf32>
    %307 = vector.extract_strided_slice %300 {offsets = [0, 128], sizes = [16, 128], strides = [1, 1]} : vector<16x512xf32> to vector<16x128xf32>
    %308 = arith.negf %307 : vector<16x128xf32>
    %309 = math.exp %308 : vector<16x128xf32>
    %cst_82 = arith.constant 1.000000e+00 : f32
    %310 = vector.broadcast %cst_82 : f32 to vector<16x128xf32>
    %311 = arith.addf %310, %309 : vector<16x128xf32>
    %312 = arith.divf %310, %311 : vector<16x128xf32>
    %313 = vector.extract_strided_slice %300 {offsets = [0, 256], sizes = [16, 128], strides = [1, 1]} : vector<16x512xf32> to vector<16x128xf32>
    %314 = math.tanh %313 : vector<16x128xf32>
    %315 = vector.extract_strided_slice %300 {offsets = [0, 384], sizes = [16, 128], strides = [1, 1]} : vector<16x512xf32> to vector<16x128xf32>
    %316 = arith.negf %315 : vector<16x128xf32>
    %317 = math.exp %316 : vector<16x128xf32>
    %cst_83 = arith.constant 1.000000e+00 : f32
    %318 = vector.broadcast %cst_83 : f32 to vector<16x128xf32>
    %319 = arith.addf %318, %317 : vector<16x128xf32>
    %320 = arith.divf %318, %319 : vector<16x128xf32>
    %321 = arith.mulf %312, %260 : vector<16x128xf32>
    %322 = arith.mulf %306, %314 : vector<16x128xf32>
    %323 = arith.addf %321, %322 : vector<16x128xf32>
    %324 = math.tanh %323 : vector<16x128xf32>
    %325 = arith.mulf %320, %324 : vector<16x128xf32>
    %326 = arith.truncf %325 : vector<16x128xf32> to vector<16x128xbf16>
    %327 = arith.index_cast %c5_i32 : i32 to index
    %c0_84 = arith.constant 0 : index
    %c0_85 = arith.constant 0 : index
    %328 = vector.load %arg10[%327, %c0_84, %c0_85] : memref<8x16x512xf32, #tpu.memory_space<vmem>>, vector<1x16x512xf32>
    %329 = vector.shape_cast %328 : vector<1x16x512xf32> to vector<16x512xf32>
    %c0_86 = arith.constant 0 : index
    %c0_87 = arith.constant 0 : index
    %330 = vector.load %arg3[%c0_86, %c0_87] : memref<128x512xbf16, #tpu.memory_space<vmem>>, vector<128x512xbf16>
    %cst_88 = arith.constant dense<0.000000e+00> : vector<16x512xf32>
    %331 = tpu.matmul %295, %330, %cst_88 {dimension_numbers = #tpu.dot_dimension_numbers<[1], [0], [0], [1], [0, 0, 1, 1], [], []>} : vector<16x128xbf16>, vector<128x512xbf16>, vector<16x512xf32> -> vector<16x512xf32>
    %332 = arith.addf %329, %331 : vector<16x512xf32>
    %333 = vector.extract_strided_slice %332 {offsets = [0, 0], sizes = [16, 128], strides = [1, 1]} : vector<16x512xf32> to vector<16x128xf32>
    %334 = arith.negf %333 : vector<16x128xf32>
    %335 = math.exp %334 : vector<16x128xf32>
    %cst_89 = arith.constant 1.000000e+00 : f32
    %336 = vector.broadcast %cst_89 : f32 to vector<16x128xf32>
    %337 = arith.addf %336, %335 : vector<16x128xf32>
    %338 = arith.divf %336, %337 : vector<16x128xf32>
    %339 = vector.extract_strided_slice %332 {offsets = [0, 128], sizes = [16, 128], strides = [1, 1]} : vector<16x512xf32> to vector<16x128xf32>
    %340 = arith.negf %339 : vector<16x128xf32>
    %341 = math.exp %340 : vector<16x128xf32>
    %cst_90 = arith.constant 1.000000e+00 : f32
    %342 = vector.broadcast %cst_90 : f32 to vector<16x128xf32>
    %343 = arith.addf %342, %341 : vector<16x128xf32>
    %344 = arith.divf %342, %343 : vector<16x128xf32>
    %345 = vector.extract_strided_slice %332 {offsets = [0, 256], sizes = [16, 128], strides = [1, 1]} : vector<16x512xf32> to vector<16x128xf32>
    %346 = math.tanh %345 : vector<16x128xf32>
    %347 = vector.extract_strided_slice %332 {offsets = [0, 384], sizes = [16, 128], strides = [1, 1]} : vector<16x512xf32> to vector<16x128xf32>
    %348 = arith.negf %347 : vector<16x128xf32>
    %349 = math.exp %348 : vector<16x128xf32>
    %cst_91 = arith.constant 1.000000e+00 : f32
    %350 = vector.broadcast %cst_91 : f32 to vector<16x128xf32>
    %351 = arith.addf %350, %349 : vector<16x128xf32>
    %352 = arith.divf %350, %351 : vector<16x128xf32>
    %353 = arith.mulf %344, %292 : vector<16x128xf32>
    %354 = arith.mulf %338, %346 : vector<16x128xf32>
    %355 = arith.addf %353, %354 : vector<16x128xf32>
    %356 = math.tanh %355 : vector<16x128xf32>
    %357 = arith.mulf %352, %356 : vector<16x128xf32>
    %358 = arith.truncf %357 : vector<16x128xf32> to vector<16x128xbf16>
    %c6_i32 = arith.constant 6 : i32
    %359 = tpu.concatenate %358, %326 in 1 : vector<16x128xbf16>, vector<16x128xbf16> -> vector<16x256xbf16>
    %c0_92 = arith.constant 0 : index
    %c0_93 = arith.constant 0 : index
    %360 = vector.load %arg5[%c0_92, %c0_93] : memref<256x512xbf16, #tpu.memory_space<vmem>>, vector<256x512xbf16>
    %cst_94 = arith.constant dense<0.000000e+00> : vector<16x512xf32>
    %361 = tpu.matmul %359, %360, %cst_94 {dimension_numbers = #tpu.dot_dimension_numbers<[1], [0], [0], [1], [0, 0, 1, 1], [], []>} : vector<16x256xbf16>, vector<256x512xbf16>, vector<16x512xf32> -> vector<16x512xf32>
    %362 = vector.broadcast %10 : vector<1x512xf32> to vector<16x512xf32>
    %363 = arith.addf %362, %361 : vector<16x512xf32>
    %364 = vector.extract_strided_slice %363 {offsets = [0, 0], sizes = [16, 128], strides = [1, 1]} : vector<16x512xf32> to vector<16x128xf32>
    %365 = arith.negf %364 : vector<16x128xf32>
    %366 = math.exp %365 : vector<16x128xf32>
    %cst_95 = arith.constant 1.000000e+00 : f32
    %367 = vector.broadcast %cst_95 : f32 to vector<16x128xf32>
    %368 = arith.addf %367, %366 : vector<16x128xf32>
    %369 = arith.divf %367, %368 : vector<16x128xf32>
    %370 = vector.extract_strided_slice %363 {offsets = [0, 128], sizes = [16, 128], strides = [1, 1]} : vector<16x512xf32> to vector<16x128xf32>
    %371 = arith.negf %370 : vector<16x128xf32>
    %372 = math.exp %371 : vector<16x128xf32>
    %cst_96 = arith.constant 1.000000e+00 : f32
    %373 = vector.broadcast %cst_96 : f32 to vector<16x128xf32>
    %374 = arith.addf %373, %372 : vector<16x128xf32>
    %375 = arith.divf %373, %374 : vector<16x128xf32>
    %376 = vector.extract_strided_slice %363 {offsets = [0, 256], sizes = [16, 128], strides = [1, 1]} : vector<16x512xf32> to vector<16x128xf32>
    %377 = math.tanh %376 : vector<16x128xf32>
    %378 = vector.extract_strided_slice %363 {offsets = [0, 384], sizes = [16, 128], strides = [1, 1]} : vector<16x512xf32> to vector<16x128xf32>
    %379 = arith.negf %378 : vector<16x128xf32>
    %380 = math.exp %379 : vector<16x128xf32>
    %cst_97 = arith.constant 1.000000e+00 : f32
    %381 = vector.broadcast %cst_97 : f32 to vector<16x128xf32>
    %382 = arith.addf %381, %380 : vector<16x128xf32>
    %383 = arith.divf %381, %382 : vector<16x128xf32>
    %384 = arith.mulf %375, %323 : vector<16x128xf32>
    %385 = arith.mulf %369, %377 : vector<16x128xf32>
    %386 = arith.addf %384, %385 : vector<16x128xf32>
    %387 = math.tanh %386 : vector<16x128xf32>
    %388 = arith.mulf %383, %387 : vector<16x128xf32>
    %389 = arith.truncf %388 : vector<16x128xf32> to vector<16x128xbf16>
    %390 = arith.index_cast %c6_i32 : i32 to index
    %c0_98 = arith.constant 0 : index
    %c0_99 = arith.constant 0 : index
    %391 = vector.load %arg10[%390, %c0_98, %c0_99] : memref<8x16x512xf32, #tpu.memory_space<vmem>>, vector<1x16x512xf32>
    %392 = vector.shape_cast %391 : vector<1x16x512xf32> to vector<16x512xf32>
    %c0_100 = arith.constant 0 : index
    %c0_101 = arith.constant 0 : index
    %393 = vector.load %arg3[%c0_100, %c0_101] : memref<128x512xbf16, #tpu.memory_space<vmem>>, vector<128x512xbf16>
    %cst_102 = arith.constant dense<0.000000e+00> : vector<16x512xf32>
    %394 = tpu.matmul %358, %393, %cst_102 {dimension_numbers = #tpu.dot_dimension_numbers<[1], [0], [0], [1], [0, 0, 1, 1], [], []>} : vector<16x128xbf16>, vector<128x512xbf16>, vector<16x512xf32> -> vector<16x512xf32>
    %395 = arith.addf %392, %394 : vector<16x512xf32>
    %396 = vector.extract_strided_slice %395 {offsets = [0, 0], sizes = [16, 128], strides = [1, 1]} : vector<16x512xf32> to vector<16x128xf32>
    %397 = arith.negf %396 : vector<16x128xf32>
    %398 = math.exp %397 : vector<16x128xf32>
    %cst_103 = arith.constant 1.000000e+00 : f32
    %399 = vector.broadcast %cst_103 : f32 to vector<16x128xf32>
    %400 = arith.addf %399, %398 : vector<16x128xf32>
    %401 = arith.divf %399, %400 : vector<16x128xf32>
    %402 = vector.extract_strided_slice %395 {offsets = [0, 128], sizes = [16, 128], strides = [1, 1]} : vector<16x512xf32> to vector<16x128xf32>
    %403 = arith.negf %402 : vector<16x128xf32>
    %404 = math.exp %403 : vector<16x128xf32>
    %cst_104 = arith.constant 1.000000e+00 : f32
    %405 = vector.broadcast %cst_104 : f32 to vector<16x128xf32>
    %406 = arith.addf %405, %404 : vector<16x128xf32>
    %407 = arith.divf %405, %406 : vector<16x128xf32>
    %408 = vector.extract_strided_slice %395 {offsets = [0, 256], sizes = [16, 128], strides = [1, 1]} : vector<16x512xf32> to vector<16x128xf32>
    %409 = math.tanh %408 : vector<16x128xf32>
    %410 = vector.extract_strided_slice %395 {offsets = [0, 384], sizes = [16, 128], strides = [1, 1]} : vector<16x512xf32> to vector<16x128xf32>
    %411 = arith.negf %410 : vector<16x128xf32>
    %412 = math.exp %411 : vector<16x128xf32>
    %cst_105 = arith.constant 1.000000e+00 : f32
    %413 = vector.broadcast %cst_105 : f32 to vector<16x128xf32>
    %414 = arith.addf %413, %412 : vector<16x128xf32>
    %415 = arith.divf %413, %414 : vector<16x128xf32>
    %416 = arith.mulf %407, %355 : vector<16x128xf32>
    %417 = arith.mulf %401, %409 : vector<16x128xf32>
    %418 = arith.addf %416, %417 : vector<16x128xf32>
    %419 = math.tanh %418 : vector<16x128xf32>
    %420 = arith.mulf %415, %419 : vector<16x128xf32>
    %421 = arith.truncf %420 : vector<16x128xf32> to vector<16x128xbf16>
    %c7_i32 = arith.constant 7 : i32
    %422 = tpu.concatenate %421, %389 in 1 : vector<16x128xbf16>, vector<16x128xbf16> -> vector<16x256xbf16>
    %c0_106 = arith.constant 0 : index
    %c0_107 = arith.constant 0 : index
    %423 = vector.load %arg5[%c0_106, %c0_107] : memref<256x512xbf16, #tpu.memory_space<vmem>>, vector<256x512xbf16>
    %cst_108 = arith.constant dense<0.000000e+00> : vector<16x512xf32>
    %424 = tpu.matmul %422, %423, %cst_108 {dimension_numbers = #tpu.dot_dimension_numbers<[1], [0], [0], [1], [0, 0, 1, 1], [], []>} : vector<16x256xbf16>, vector<256x512xbf16>, vector<16x512xf32> -> vector<16x512xf32>
    %425 = vector.broadcast %10 : vector<1x512xf32> to vector<16x512xf32>
    %426 = arith.addf %425, %424 : vector<16x512xf32>
    %427 = vector.extract_strided_slice %426 {offsets = [0, 0], sizes = [16, 128], strides = [1, 1]} : vector<16x512xf32> to vector<16x128xf32>
    %428 = arith.negf %427 : vector<16x128xf32>
    %429 = math.exp %428 : vector<16x128xf32>
    %cst_109 = arith.constant 1.000000e+00 : f32
    %430 = vector.broadcast %cst_109 : f32 to vector<16x128xf32>
    %431 = arith.addf %430, %429 : vector<16x128xf32>
    %432 = arith.divf %430, %431 : vector<16x128xf32>
    %433 = vector.extract_strided_slice %426 {offsets = [0, 128], sizes = [16, 128], strides = [1, 1]} : vector<16x512xf32> to vector<16x128xf32>
    %434 = arith.negf %433 : vector<16x128xf32>
    %435 = math.exp %434 : vector<16x128xf32>
    %cst_110 = arith.constant 1.000000e+00 : f32
    %436 = vector.broadcast %cst_110 : f32 to vector<16x128xf32>
    %437 = arith.addf %436, %435 : vector<16x128xf32>
    %438 = arith.divf %436, %437 : vector<16x128xf32>
    %439 = vector.extract_strided_slice %426 {offsets = [0, 256], sizes = [16, 128], strides = [1, 1]} : vector<16x512xf32> to vector<16x128xf32>
    %440 = math.tanh %439 : vector<16x128xf32>
    %441 = vector.extract_strided_slice %426 {offsets = [0, 384], sizes = [16, 128], strides = [1, 1]} : vector<16x512xf32> to vector<16x128xf32>
    %442 = arith.negf %441 : vector<16x128xf32>
    %443 = math.exp %442 : vector<16x128xf32>
    %cst_111 = arith.constant 1.000000e+00 : f32
    %444 = vector.broadcast %cst_111 : f32 to vector<16x128xf32>
    %445 = arith.addf %444, %443 : vector<16x128xf32>
    %446 = arith.divf %444, %445 : vector<16x128xf32>
    %447 = arith.mulf %438, %386 : vector<16x128xf32>
    %448 = arith.mulf %432, %440 : vector<16x128xf32>
    %449 = arith.addf %447, %448 : vector<16x128xf32>
    %450 = math.tanh %449 : vector<16x128xf32>
    %451 = arith.mulf %446, %450 : vector<16x128xf32>
    %452 = arith.truncf %451 : vector<16x128xf32> to vector<16x128xbf16>
    %453 = arith.index_cast %c7_i32 : i32 to index
    %c0_112 = arith.constant 0 : index
    %c0_113 = arith.constant 0 : index
    %454 = vector.load %arg10[%453, %c0_112, %c0_113] : memref<8x16x512xf32, #tpu.memory_space<vmem>>, vector<1x16x512xf32>
    %455 = vector.shape_cast %454 : vector<1x16x512xf32> to vector<16x512xf32>
    %c0_114 = arith.constant 0 : index
    %c0_115 = arith.constant 0 : index
    %456 = vector.load %arg3[%c0_114, %c0_115] : memref<128x512xbf16, #tpu.memory_space<vmem>>, vector<128x512xbf16>
    %cst_116 = arith.constant dense<0.000000e+00> : vector<16x512xf32>
    %457 = tpu.matmul %421, %456, %cst_116 {dimension_numbers = #tpu.dot_dimension_numbers<[1], [0], [0], [1], [0, 0, 1, 1], [], []>} : vector<16x128xbf16>, vector<128x512xbf16>, vector<16x512xf32> -> vector<16x512xf32>
    %458 = arith.addf %455, %457 : vector<16x512xf32>
    %459 = vector.extract_strided_slice %458 {offsets = [0, 0], sizes = [16, 128], strides = [1, 1]} : vector<16x512xf32> to vector<16x128xf32>
    %460 = arith.negf %459 : vector<16x128xf32>
    %461 = math.exp %460 : vector<16x128xf32>
    %cst_117 = arith.constant 1.000000e+00 : f32
    %462 = vector.broadcast %cst_117 : f32 to vector<16x128xf32>
    %463 = arith.addf %462, %461 : vector<16x128xf32>
    %464 = arith.divf %462, %463 : vector<16x128xf32>
    %465 = vector.extract_strided_slice %458 {offsets = [0, 128], sizes = [16, 128], strides = [1, 1]} : vector<16x512xf32> to vector<16x128xf32>
    %466 = arith.negf %465 : vector<16x128xf32>
    %467 = math.exp %466 : vector<16x128xf32>
    %cst_118 = arith.constant 1.000000e+00 : f32
    %468 = vector.broadcast %cst_118 : f32 to vector<16x128xf32>
    %469 = arith.addf %468, %467 : vector<16x128xf32>
    %470 = arith.divf %468, %469 : vector<16x128xf32>
    %471 = vector.extract_strided_slice %458 {offsets = [0, 256], sizes = [16, 128], strides = [1, 1]} : vector<16x512xf32> to vector<16x128xf32>
    %472 = math.tanh %471 : vector<16x128xf32>
    %473 = vector.extract_strided_slice %458 {offsets = [0, 384], sizes = [16, 128], strides = [1, 1]} : vector<16x512xf32> to vector<16x128xf32>
    %474 = arith.negf %473 : vector<16x128xf32>
    %475 = math.exp %474 : vector<16x128xf32>
    %cst_119 = arith.constant 1.000000e+00 : f32
    %476 = vector.broadcast %cst_119 : f32 to vector<16x128xf32>
    %477 = arith.addf %476, %475 : vector<16x128xf32>
    %478 = arith.divf %476, %477 : vector<16x128xf32>
    %479 = arith.mulf %470, %418 : vector<16x128xf32>
    %480 = arith.mulf %464, %472 : vector<16x128xf32>
    %481 = arith.addf %479, %480 : vector<16x128xf32>
    %482 = math.tanh %481 : vector<16x128xf32>
    %483 = arith.mulf %478, %482 : vector<16x128xf32>
    %484 = arith.truncf %483 : vector<16x128xf32> to vector<16x128xbf16>
    %c7_i32_120 = arith.constant 7 : i32
    %485 = tpu.concatenate %484, %452 in 1 : vector<16x128xbf16>, vector<16x128xbf16> -> vector<16x256xbf16>
    %c0_121 = arith.constant 0 : index
    %c0_122 = arith.constant 0 : index
    %486 = vector.load %arg5[%c0_121, %c0_122] : memref<256x512xbf16, #tpu.memory_space<vmem>>, vector<256x512xbf16>
    %cst_123 = arith.constant dense<0.000000e+00> : vector<16x512xf32>
    %487 = tpu.matmul %485, %486, %cst_123 {dimension_numbers = #tpu.dot_dimension_numbers<[1], [0], [0], [1], [0, 0, 1, 1], [], []>} : vector<16x256xbf16>, vector<256x512xbf16>, vector<16x512xf32> -> vector<16x512xf32>
    %488 = vector.broadcast %10 : vector<1x512xf32> to vector<16x512xf32>
    %489 = arith.addf %488, %487 : vector<16x512xf32>
    %490 = vector.extract_strided_slice %489 {offsets = [0, 0], sizes = [16, 128], strides = [1, 1]} : vector<16x512xf32> to vector<16x128xf32>
    %491 = arith.negf %490 : vector<16x128xf32>
    %492 = math.exp %491 : vector<16x128xf32>
    %cst_124 = arith.constant 1.000000e+00 : f32
    %493 = vector.broadcast %cst_124 : f32 to vector<16x128xf32>
    %494 = arith.addf %493, %492 : vector<16x128xf32>
    %495 = arith.divf %493, %494 : vector<16x128xf32>
    %496 = vector.extract_strided_slice %489 {offsets = [0, 128], sizes = [16, 128], strides = [1, 1]} : vector<16x512xf32> to vector<16x128xf32>
    %497 = arith.negf %496 : vector<16x128xf32>
    %498 = math.exp %497 : vector<16x128xf32>
    %cst_125 = arith.constant 1.000000e+00 : f32
    %499 = vector.broadcast %cst_125 : f32 to vector<16x128xf32>
    %500 = arith.addf %499, %498 : vector<16x128xf32>
    %501 = arith.divf %499, %500 : vector<16x128xf32>
    %502 = vector.extract_strided_slice %489 {offsets = [0, 256], sizes = [16, 128], strides = [1, 1]} : vector<16x512xf32> to vector<16x128xf32>
    %503 = math.tanh %502 : vector<16x128xf32>
    %504 = vector.extract_strided_slice %489 {offsets = [0, 384], sizes = [16, 128], strides = [1, 1]} : vector<16x512xf32> to vector<16x128xf32>
    %505 = arith.negf %504 : vector<16x128xf32>
    %506 = math.exp %505 : vector<16x128xf32>
    %cst_126 = arith.constant 1.000000e+00 : f32
    %507 = vector.broadcast %cst_126 : f32 to vector<16x128xf32>
    %508 = arith.addf %507, %506 : vector<16x128xf32>
    %509 = arith.divf %507, %508 : vector<16x128xf32>
    %510 = arith.mulf %501, %449 : vector<16x128xf32>
    %511 = arith.mulf %495, %503 : vector<16x128xf32>
    %512 = arith.addf %510, %511 : vector<16x128xf32>
    %513 = math.tanh %512 : vector<16x128xf32>
    %514 = arith.mulf %509, %513 : vector<16x128xf32>
    %515 = arith.truncf %514 : vector<16x128xf32> to vector<16x128xbf16>
    %c0_127 = arith.constant 0 : index
    %c0_128 = arith.constant 0 : index
    %516 = vector.load %arg7[%c0_127, %c0_128] : memref<128x128xbf16, #tpu.memory_space<vmem>>, vector<128x128xbf16>
    %cst_129 = arith.constant dense<0.000000e+00> : vector<16x128xf32>
    %517 = tpu.matmul %515, %516, %cst_129 {dimension_numbers = #tpu.dot_dimension_numbers<[1], [0], [0], [1], [0, 0, 1, 1], [], []>} : vector<16x128xbf16>, vector<128x128xbf16>, vector<16x128xf32> -> vector<16x128xf32>
    %c0_130 = arith.constant 0 : index
    %c0_131 = arith.constant 0 : index
    %518 = vector.load %arg8[%c0_130, %c0_131] : memref<1x128xf32, #tpu.memory_space<vmem>>, vector<1x128xf32>
    %519 = vector.broadcast %518 : vector<1x128xf32> to vector<16x128xf32>
    %520 = arith.addf %517, %519 : vector<16x128xf32>
    %c0_132 = arith.constant 0 : index
    %c0_133 = arith.constant 0 : index
    %521 = vector.load %arg9[%c0_132, %c0_133] : memref<16x128xf32, #tpu.memory_space<vmem>>, vector<16x128xf32>
    tpu.vector_store %arg9[%c0_132, %c0_133], %520 {strides = array<i32>} : memref<16x128xf32, #tpu.memory_space<vmem>>, vector<16x128xf32>,
    return
  }
  func.func @transform_0(%arg0: i32) -> (i32, i32, i32) {
    %c0_i32 = arith.constant 0 : i32
    %c0_i32_0 = arith.constant 0 : i32
    %c0_i32_1 = arith.constant 0 : i32
    return %c0_i32, %arg0, %c0_i32_0 : i32, i32, i32
  }
  func.func @transform_1(%arg0: i32) -> (i32, i32) {
    %c0_i32 = arith.constant 0 : i32
    %c0_i32_0 = arith.constant 0 : i32
    %c0_i32_1 = arith.constant 0 : i32
    return %c0_i32, %c0_i32_0 : i32, i32
  }
  func.func @transform_2(%arg0: i32) -> (i32, i32) {
    %c0_i32 = arith.constant 0 : i32
    %c0_i32_0 = arith.constant 0 : i32
    %c0_i32_1 = arith.constant 0 : i32
    return %c0_i32, %c0_i32_0 : i32, i32
  }
  func.func @transform_3(%arg0: i32) -> (i32, i32) {
    %c0_i32 = arith.constant 0 : i32
    %c0_i32_0 = arith.constant 0 : i32
    %c0_i32_1 = arith.constant 0 : i32
    return %c0_i32, %c0_i32_0 : i32, i32
  }
  func.func @transform_4(%arg0: i32) -> (i32, i32) {
    %c0_i32 = arith.constant 0 : i32
    %c0_i32_0 = arith.constant 0 : i32
    %c0_i32_1 = arith.constant 0 : i32
    return %c0_i32, %c0_i32_0 : i32, i32
  }
  func.func @transform_5(%arg0: i32) -> (i32, i32) {
    %c0_i32 = arith.constant 0 : i32
    %c0_i32_0 = arith.constant 0 : i32
    %c0_i32_1 = arith.constant 0 : i32
    return %c0_i32, %c0_i32_0 : i32, i32
  }
  func.func @transform_6(%arg0: i32) -> (i32, i32) {
    %c0_i32 = arith.constant 0 : i32
    %c0_i32_0 = arith.constant 0 : i32
    %c0_i32_1 = arith.constant 0 : i32
    return %c0_i32, %c0_i32_0 : i32, i32
  }
  func.func @transform_7(%arg0: i32) -> (i32, i32) {
    %c0_i32 = arith.constant 0 : i32
    %c0_i32_0 = arith.constant 0 : i32
    %c0_i32_1 = arith.constant 0 : i32
    return %c0_i32, %c0_i32_0 : i32, i32
  }
  func.func @transform_8(%arg0: i32) -> (i32, i32) {
    %c0_i32 = arith.constant 0 : i32
    %c0_i32_0 = arith.constant 0 : i32
    return %arg0, %c0_i32 : i32, i32
  }
}

</mosaic_0001>

<bundles_post_ra>
// kernel: lstm_forward.1
= control target key start
LH: loop header
LB: loop body
LE: loop exit
PB: predicated region body
PF: predicated region fallthrough
CT: control target
= control target key end

     0   :  { %13 = vsyncpa [#allocation4], 0  ;;  %s7006_s0 = inlined_call_operand.vmem [shape: bf16[8,16,128], index: 0, kind: input, shape index: {}]   ;;  %s7007_s1 = inlined_call_operand.hbm [shape: bf16[128,512], index: 1, kind: input, shape index: {}]   ;;  %s7008_s2 = inlined_call_operand.hbm [shape: bf16[128,512], index: 2, kind: input, shape index: {}]   ;;  %s7009_s3 = inlined_call_operand.vmem [shape: f32[1,512], index: 3, kind: input, shape index: {}]   ;;  %s7010_s4 = inlined_call_operand.hbm [shape: bf16[256,512], index: 4, kind: input, shape index: {}]   ;;  %s7011_s5 = inlined_call_operand.vmem [shape: f32[1,512], index: 5, kind: input, shape index: {}]   ;;  %s7012_s6 = inlined_call_operand.vmem [shape: bf16[128,128], index: 6, kind: input, shape index: {}]   ;;  %s7013_s7 = inlined_call_operand.vmem [shape: f32[1,128], index: 7, kind: input, shape index: {}]   ;;  %s7014_s8 = inlined_call_operand.vmem [shape: f32[16,128], index: 8, kind: output, shape index: {}]  }
   0x1   :  { %14 = vsyncpa [#allocation6], 0  ;;  %s5168_s27 = smov [#allocation5]   ;;  %s5169_s29 = smov [#allocation3]  }
   0x2   :  { %s34_s28 = sshll.u32 %s5168_s27, 4  ;;  %s22_s30 = sshll.u32 %s5169_s29, 4  ;;  %s35_s28 = int_to_ptr.vmem [resolvable:$true] %s34_s28  ;;  %s5221_s30 = int_to_ptr.vmem [resolvable:$true] %s22_s30 }
   0x3   :  { %s5098_s11 = scalar_lea.hbm %s7008_s2, 4096 }
   0x4   :  { %p5099_p0 = scmp.ne.s32.totalorder %s7008_s2, %s5098_s11  ;;  %p5102_p1 = scmp.lt.u32.totalorder %s5098_s11, %s7008_s2 }
   0x6   :  { %p5104_p2 = pnand %p5102_p1, %p5099_p0 }
   0x8   :  { %5107 = shalt.err (!%p5104_p2)
}
   0x9   :  { %s5108_s16 = scalar_lea.vmem %s35_s28, 4096  ;;  %p5113_p4 = scmp.lt.s32.totalorder %s35_s28, %s35_s28 }
   0xa   :  { %p5109_p3 = scmp.ne.s32.totalorder %s35_s28, %s5108_s16  ;;  %p5114_p5 = scmp.lt.s32.totalorder %s5108_s16, %s5108_s16 }
   0xc   :  { %p5115_p6 = por %p5114_p5, %p5113_p4 }
   0xe   :  { %p5116_p7 = pnand %p5115_p6, %p5109_p3 }
  0x10   :  { %5119 = shalt.err (!%p5116_p7)
}
  0x11   :  { %s5170_s17 = smov 256   ;;  %s5171_s18 = smov 16  }
  0x12   :  { %40 = dma.hbm_to_vmem [thread:$0]  %s7008_s2, 4096, %s35_s28, [#allocation6], %s5170_s17, %s5170_s17, %s5171_s18  }
  0x13   :  { %s5120_s23 = scalar_lea.hbm %s7007_s1, 4096 }
  0x14   :  { %p5121_p8 = scmp.ne.s32.totalorder %s7007_s1, %s5120_s23  ;;  %p5124_p9 = scmp.lt.u32.totalorder %s5120_s23, %s7007_s1 }
  0x16   :  { %p5126_p10 = pnand %p5124_p9, %p5121_p8 }
  0x18   :  { %5129 = shalt.err (!%p5126_p10)
}
  0x19   :  { %s5130_s29 = scalar_lea.vmem %s5221_s30, 4096  ;;  %p5135_p12 = scmp.lt.s32.totalorder %s5221_s30, %s5221_s30 }
  0x1a   :  { %p5131_p11 = scmp.ne.s32.totalorder %s5221_s30, %s5130_s29  ;;  %p5136_p13 = scmp.lt.s32.totalorder %s5130_s29, %s5130_s29 }
  0x1c   :  { %p5137_p0 = por %p5136_p13, %p5135_p12 }
  0x1e   :  { %p5138_p1 = pnand %p5137_p0, %p5131_p11 }
  0x20   :  { %5141 = shalt.err (!%p5138_p1)
}
  0x21   :  { %28 = dma.hbm_to_vmem [thread:$0]  %s7007_s1, 4096, %s5221_s30, [#allocation4], %s5170_s17, %s5170_s17, %s5171_s18  }
  0x22   :  { %s5172_s9 = smov [#allocation7]   ;;  %s5142_s13 = scalar_lea.hbm %s7010_s4, 8192 }
  0x23   :  { %s48_s10 = sshll.u32 %s5172_s9, 4  ;;  %p5143_p2 = scmp.ne.s32.totalorder %s7010_s4, %s5142_s13  ;;  %s49_s10 = int_to_ptr.vmem [resolvable:$true] %s48_s10 }
  0x24   :  { %p5146_p3 = scmp.lt.u32.totalorder %s5142_s13, %s7010_s4 }
  0x26   :  { %p5148_p4 = pnand %p5146_p3, %p5143_p2 }
  0x28   :  { %5151 = shalt.err (!%p5148_p4)
}
  0x29   :  { %s5152_s20 = scalar_lea.vmem %s49_s10, 8192  ;;  %p5157_p6 = scmp.lt.s32.totalorder %s49_s10, %s49_s10 }
  0x2a   :  { %p5153_p5 = scmp.ne.s32.totalorder %s49_s10, %s5152_s20  ;;  %p5158_p7 = scmp.lt.s32.totalorder %s5152_s20, %s5152_s20 }
  0x2c   :  { %p5159_p8 = por %p5158_p7, %p5157_p6 }
  0x2e   :  { %p5160_p9 = pnand %p5159_p8, %p5153_p5 }
  0x30   :  { %5163 = shalt.err (!%p5160_p9)
}
  0x31   :  { %54 = dma.hbm_to_vmem [thread:$0]  %s7010_s4, 8192, %s49_s10, [#allocation6], %s5170_s17, %s5170_s17, %s5171_s18  }
  0x32   :  { %5164 = dma.done.wait [#allocation4], 4096  }
  0x33   :  { %5165 = vsyncadd [#allocation4], 4294963200 }
  0x34   :  { %5166 = dma.done.wait [#allocation6], 12288  }
  0x35   :  { %5167 = vsyncadd [#allocation6], 4294955008  ;;  %v7015_v0 = vmov 0   ;;  %v4186_v1 = vld [vmem:[#allocation3 + $0x4] ss:$16 sps:$4 sm:$0xff]   ;;  %v4238_v43 = vld [vmem:[%s7006_s0 + $0x8] sm:$0xff]  }
  0x36   :  { %359 = vmatprep.mubr.bf16.mxu0 %v7015_v0  ;;  %472 = vmatprep.mubr.bf16.mxu1 %v7015_v0  ;;  %v4188_v2 = vld [vmem:[#allocation3 + $0xc] ss:$16 sps:$4 sm:$0xff]   ;;  %v4190_v3 = vld [vmem:[#allocation3] ss:$16 sps:$4 sm:$0xff]   ;;  %v4191_v4 = vld [vmem:[#allocation3 + $0x8] ss:$16 sps:$4 sm:$0xff]  }
  0x37   :  { %327 = vmatprep.subr.bf16.mxu0 %v4186_v1  ;;  %440 = vmatprep.subr.bf16.mxu1 %v4188_v2  ;;  %v4192_v5 = vld [vmem:[#allocation3 + $0x24] ss:$16 sps:$4 sm:$0xff]   ;;  %v4194_v6 = vld [vmem:[#allocation3 + $0x2c] ss:$16 sps:$4 sm:$0xff]   ;;  %v4196_v7 = vld [vmem:[#allocation3 + $0x20] ss:$16 sps:$4 sm:$0xff]  }
  0x38   :  { %328 = vmatpush1.bf16.msra.mxu0 %v4190_v3  ;;  %441 = vmatpush1.bf16.msra.mxu1 %v4191_v4  ;;  %v4197_v8 = vld [vmem:[#allocation3 + $0x28] ss:$16 sps:$4 sm:$0xff]   ;;  %v4198_v9 = vld [vmem:[#allocation3 + $0x44] ss:$16 sps:$4 sm:$0xff]   ;;  %v4200_v10 = vld [vmem:[#allocation3 + $0x4c] ss:$16 sps:$4 sm:$0xff]  }
  0x39   :  { %329 = vmatprep.subr.bf16.mxu0 %v4192_v5  ;;  %442 = vmatprep.subr.bf16.mxu1 %v4194_v6  ;;  %v4202_v11 = vld [vmem:[#allocation3 + $0x40] ss:$16 sps:$4 sm:$0xff]   ;;  %v4203_v12 = vld [vmem:[#allocation3 + $0x48] ss:$16 sps:$4 sm:$0xff]   ;;  %v4204_v13 = vld [vmem:[#allocation3 + $0x64] ss:$16 sps:$4 sm:$0xff]  }
  0x3a   :  { %v4206_v14 = vld [vmem:[#allocation3 + $0x6c] ss:$16 sps:$4 sm:$0xff]   ;;  %v4208_v15 = vld [vmem:[#allocation3 + $0x60] ss:$16 sps:$4 sm:$0xff]   ;;  %v4209_v16 = vld [vmem:[#allocation3 + $0x68] ss:$16 sps:$4 sm:$0xff]  }
  0x3b   :  { %v4210_v17 = vld [vmem:[#allocation3 + $0x84] ss:$16 sps:$4 sm:$0xff]   ;;  %v4212_v18 = vld [vmem:[#allocation3 + $0x8c] ss:$16 sps:$4 sm:$0xff]   ;;  %v4214_v19 = vld [vmem:[#allocation3 + $0x80] ss:$16 sps:$4 sm:$0xff]  }
  0x3c   :  { %330 = vmatpush1.bf16.msra.mxu0 %v4196_v7  ;;  %443 = vmatpush1.bf16.msra.mxu1 %v4197_v8  ;;  %v4215_v20 = vld [vmem:[#allocation3 + $0x88] ss:$16 sps:$4 sm:$0xff]   ;;  %v4216_v21 = vld [vmem:[#allocation3 + $0xa4] ss:$16 sps:$4 sm:$0xff]   ;;  %v4218_v22 = vld [vmem:[#allocation3 + $0xac] ss:$16 sps:$4 sm:$0xff]  }
  0x3d   :  { %331 = vmatprep.subr.bf16.mxu0 %v4198_v9  ;;  %444 = vmatprep.subr.bf16.mxu1 %v4200_v10  ;;  %v4220_v23 = vld [vmem:[#allocation3 + $0xa0] ss:$16 sps:$4 sm:$0xff]   ;;  %v4221_v24 = vld [vmem:[#allocation3 + $0xa8] ss:$16 sps:$4 sm:$0xff]   ;;  %v4222_v25 = vld [vmem:[#allocation3 + $0xc4] ss:$16 sps:$4 sm:$0xff]  }
  0x3e   :  { %v4224_v26 = vld [vmem:[#allocation3 + $0xcc] ss:$16 sps:$4 sm:$0xff]   ;;  %v4226_v27 = vld [vmem:[#allocation3 + $0xc0] ss:$16 sps:$4 sm:$0xff]   ;;  %v4227_v28 = vld [vmem:[#allocation3 + $0xc8] ss:$16 sps:$4 sm:$0xff]  }
  0x3f   :  { %v4228_v29 = vld [vmem:[#allocation3 + $0xe4] ss:$16 sps:$4 sm:$0xff]   ;;  %v4230_v30 = vld [vmem:[#allocation3 + $0xec] ss:$16 sps:$4 sm:$0xff]   ;;  %v4232_v31 = vld [vmem:[#allocation3 + $0xe0] ss:$16 sps:$4 sm:$0xff]  }
  0x40   :  { %332 = vmatpush1.bf16.msra.mxu0 %v4202_v11  ;;  %445 = vmatpush1.bf16.msra.mxu1 %v4203_v12  ;;  %v4233_v32 = vld [vmem:[#allocation3 + $0xe8] ss:$16 sps:$4 sm:$0xff]   ;;  %v5275_v33 = vld [vmem:[#allocation5 + $0x4] ss:$16 sps:$4 sm:$0xff]   ;;  %v5277_v34 = vld [vmem:[#allocation5 + $0xc] ss:$16 sps:$4 sm:$0xff]  }
  0x41   :  { %333 = vmatprep.subr.bf16.mxu0 %v4204_v13  ;;  %446 = vmatprep.subr.bf16.mxu1 %v4206_v14  ;;  %v4234_v35 = vld [vmem:[%s7006_s0] sm:$0xff]   ;;  %v5288_v38 = vld [vmem:[#allocation5 + $0x8] ss:$16 sps:$4 sm:$0xff]   ;;  %v5290_v39 = vld [vmem:[#allocation5 + $0x2c] ss:$16 sps:$4 sm:$0xff]   ;;  %vm5175_vm0 = vmmov 0  }
  0x42   :  { %v5282_v36 = vld [vmem:[#allocation5] ss:$16 sps:$4 sm:$0xff]   ;;  %v5285_v37 = vld [vmem:[#allocation5 + $0x24] ss:$16 sps:$4 sm:$0xff]   ;;  %v5301_v42 = vld [vmem:[#allocation5 + $0x28] ss:$16 sps:$4 sm:$0xff]  }
  0x43   :  { %v5294_v40 = vld [vmem:[#allocation5 + $0x20] ss:$16 sps:$4 sm:$0xff]   ;;  %v5298_v41 = vld [vmem:[#allocation5 + $0x44] ss:$16 sps:$4 sm:$0xff]   ;;  %v5313_v46 = vld [vmem:[#allocation5 + $0x4c] ss:$16 sps:$4 sm:$0xff]  }
  0x44   :  { %334 = vmatpush1.bf16.msra.mxu0 %v4208_v15  ;;  %447 = vmatpush1.bf16.msra.mxu1 %v4209_v16  ;;  %v5308_v44 = vld [vmem:[#allocation5 + $0x40] ss:$16 sps:$4 sm:$0xff]   ;;  %v5310_v45 = vld [vmem:[#allocation5 + $0x64] ss:$16 sps:$4 sm:$0xff]   ;;  %v5316_v47 = vld [vmem:[#allocation5 + $0x48] ss:$16 sps:$4 sm:$0xff]  }
  0x45   :  { %335 = vmatprep.subr.bf16.mxu0 %v4210_v17  ;;  %448 = vmatprep.subr.bf16.mxu1 %v4212_v18  ;;  %v5318_v48 = vld [vmem:[#allocation5 + $0x6c] ss:$16 sps:$4 sm:$0xff]   ;;  %v5323_v49 = vld [vmem:[#allocation5 + $0x60] ss:$16 sps:$4 sm:$0xff]   ;;  %v5326_v50 = vld [vmem:[#allocation5 + $0x84] ss:$16 sps:$4 sm:$0xff]  }
  0x46   :  { %v5330_v51 = vld [vmem:[#allocation5 + $0x68] ss:$16 sps:$4 sm:$0xff]   ;;  %v4244_v52 = vld [vmem:[%s7006_s0 + $0x10] sm:$0xff]   ;;  %v5339_v54 = vld [vmem:[#allocation5 + $0x8c] ss:$16 sps:$4 sm:$0xff]  }
  0x47   :  { %v5336_v53 = vld [vmem:[#allocation5 + $0x80] ss:$16 sps:$4 sm:$0xff]   ;;  %v5342_v55 = vld [vmem:[#allocation5 + $0xa4] ss:$16 sps:$4 sm:$0xff]   ;;  %v5345_v56 = vld [vmem:[#allocation5 + $0x88] ss:$16 sps:$4 sm:$0xff]  }
  0x48   :  { %336 = vmatpush1.bf16.msra.mxu0 %v4214_v19  ;;  %449 = vmatpush1.bf16.msra.mxu1 %v4215_v20  ;;  %v5347_v57 = vld [vmem:[#allocation5 + $0xac] ss:$16 sps:$4 sm:$0xff]   ;;  %v5351_v58 = vld [vmem:[#allocation5 + $0xa0] ss:$16 sps:$4 sm:$0xff]   ;;  %v5355_v59 = vld [vmem:[#allocation5 + $0xc4] ss:$16 sps:$4 sm:$0xff]  }
  0x49   :  { %337 = vmatprep.subr.bf16.mxu0 %v4216_v21  ;;  %450 = vmatprep.subr.bf16.mxu1 %v4218_v22  ;;  %v5359_v60 = vld [vmem:[#allocation5 + $0xa8] ss:$16 sps:$4 sm:$0xff]   ;;  %v5365_v62 = vld [vmem:[#allocation5 + $0xc0] ss:$16 sps:$4 sm:$0xff]   ;;  %v5368_v63 = vld [vmem:[#allocation5 + $0xcc] ss:$16 sps:$4 sm:$0xff]  }
  0x4a   :  { %v4251_v61 = vld [vmem:[%s7006_s0 + $0x18] sm:$0xff]   ;;  %v5372_v1 = vld [vmem:[#allocation5 + $0xe4] ss:$16 sps:$4 sm:$0xff]   ;;  %v5380_v4 = vld [vmem:[#allocation5 + $0xe0] ss:$16 sps:$4 sm:$0xff]  }
  0x4b   :  { %v5374_v2 = vld [vmem:[#allocation5 + $0xc8] ss:$16 sps:$4 sm:$0xff]   ;;  %v5376_v3 = vld [vmem:[#allocation5 + $0xec] ss:$16 sps:$4 sm:$0xff]   ;;  %v4258_v5 = vld [vmem:[%s7006_s0 + $0x20] sm:$0xff]  }
  0x4c   :  { %338 = vmatpush1.bf16.msra.mxu0 %v4220_v23  ;;  %451 = vmatpush1.bf16.msra.mxu1 %v4221_v24  ;;  %v5387_v6 = vld [vmem:[#allocation5 + $0xe8] ss:$16 sps:$4 sm:$0xff]   ;;  %v5389_v7 = vld [vmem:[#allocation7 + $0x4] ss:$16 sps:$4 sm:$0xff]   ;;  %v5394_v8 = vld [vmem:[#allocation7 + $0xc] ss:$16 sps:$4 sm:$0xff]  }
  0x4d   :  { %339 = vmatprep.subr.bf16.mxu0 %v4222_v25  ;;  %452 = vmatprep.subr.bf16.mxu1 %v4224_v26  ;;  %v4265_v9 = vld [vmem:[%s7006_s0 + $0x28] sm:$0xff]   ;;  %v4272_v10 = vld [vmem:[%s7006_s0 + $0x30] sm:$0xff]   ;;  %v4280_v11 = vld [vmem:[%s7006_s0 + $0x38] sm:$0xff]  }
  0x4e   :  { %v5417_v12 = vld [vmem:[#allocation7] ss:$16 sps:$4 sm:$0xff]   ;;  %v5419_v13 = vld [vmem:[#allocation7 + $0x8] ss:$16 sps:$4 sm:$0xff]   ;;  %v5421_v14 = vld [vmem:[#allocation7 + $0x24] ss:$16 sps:$4 sm:$0xff]  }
  0x4f   :  { %v5423_v15 = vld [vmem:[#allocation7 + $0x2c] ss:$16 sps:$4 sm:$0xff]   ;;  %v5429_v16 = vld [vmem:[#allocation7 + $0x20] ss:$16 sps:$4 sm:$0xff]   ;;  %v5431_v17 = vld [vmem:[#allocation7 + $0x28] ss:$16 sps:$4 sm:$0xff]  }
  0x50   :  { %340 = vmatpush1.bf16.msra.mxu0 %v4226_v27  ;;  %453 = vmatpush1.bf16.msra.mxu1 %v4227_v28  ;;  %v5435_v18 = vld [vmem:[#allocation7 + $0x44] ss:$16 sps:$4 sm:$0xff]   ;;  %v5437_v19 = vld [vmem:[#allocation7 + $0x4c] ss:$16 sps:$4 sm:$0xff]   ;;  %v5443_v20 = vld [vmem:[#allocation7 + $0x40] ss:$16 sps:$4 sm:$0xff]  }
  0x51   :  { %341 = vmatprep.subr.bf16.mxu0 %v4228_v29  ;;  %454 = vmatprep.subr.bf16.mxu1 %v4230_v30  ;;  %v5445_v21 = vld [vmem:[#allocation7 + $0x48] ss:$16 sps:$4 sm:$0xff]   ;;  %v5449_v22 = vld [vmem:[#allocation7 + $0x64] ss:$16 sps:$4 sm:$0xff]   ;;  %v5451_v23 = vld [vmem:[#allocation7 + $0x6c] ss:$16 sps:$4 sm:$0xff]  }
  0x52   :  { %7388 = vst [vmem:[#allocation10_spill] sm:$0xff] %v5449_v22  ;;  %7389 = vst [vmem:[#allocation11_spill] sm:$0xff] %v5451_v23  ;;  %v5455_v24 = vld [vmem:[#allocation7 + $0x60] ss:$16 sps:$4 sm:$0xff]   ;;  %v5457_v25 = vld [vmem:[#allocation7 + $0x68] ss:$16 sps:$4 sm:$0xff]  }
  0x53   :  { %7390 = vst [vmem:[#allocation12_spill] sm:$0xff] %v5455_v24  ;;  %7391 = vst [vmem:[#allocation13_spill] sm:$0xff] %v5457_v25  ;;  %v5463_v26 = vld [vmem:[#allocation7 + $0x84] ss:$16 sps:$4 sm:$0xff]   ;;  %v5465_v27 = vld [vmem:[#allocation7 + $0x8c] ss:$16 sps:$4 sm:$0xff]  }
  0x54   :  { %342 = vmatpush1.bf16.msra.mxu0 %v4232_v31  ;;  %455 = vmatpush1.bf16.msra.mxu1 %v4233_v32  ;;  %7392 = vst [vmem:[#allocation14_spill] sm:$0xff] %v5463_v26  ;;  %7393 = vst [vmem:[#allocation15_spill] sm:$0xff] %v5465_v27  ;;  %v5467_v28 = vld [vmem:[#allocation7 + $0x80] ss:$16 sps:$4 sm:$0xff]   ;;  %v5469_v29 = vld [vmem:[#allocation7 + $0x88] ss:$16 sps:$4 sm:$0xff]  }
  0x55   :  { %904 = vmatprep.subr.bf16.mxu0 %v5275_v33  ;;  %947 = vmatprep.subr.bf16.mxu1 %v5277_v34  ;;  %7394 = vst [vmem:[#allocation16_spill] sm:$0xff] %v5467_v28  ;;  %7395 = vst [vmem:[#allocation17_spill] sm:$0xff] %v5469_v29  ;;  %v5475_v30 = vld [vmem:[#allocation7 + $0xa4] ss:$16 sps:$4 sm:$0xff]   ;;  %v5477_v31 = vld [vmem:[#allocation7 + $0xac] ss:$16 sps:$4 sm:$0xff]  }
  0x56   :  { %7396 = vst [vmem:[#allocation18_spill] sm:$0xff] %v5475_v30  ;;  %7397 = vst [vmem:[#allocation19_spill] sm:$0xff] %v5477_v31  ;;  %v5479_v32 = vld [vmem:[#allocation7 + $0xa0] ss:$16 sps:$4 sm:$0xff]  }
  0x57   :  { %360 = vmatmul.mubr.bf16.vlgmr.msra.gmra.mrb[0].mxu0 %v4234_v35  ;;  %473 = vmatmul.mubr.bf16.vlgmr.msra.gmra.mrb[0].mxu1 %v4234_v35  ;;  %7398 = vst [vmem:[#allocation20_spill] sm:$0xff] %v5479_v32  ;;  %v5481_v35 = vld [vmem:[#allocation7 + $0xa8] ss:$16 sps:$4 sm:$0xff]  }
  0x58   :  { %905 = vmatpush1.bf16.msra.mxu0 %v5282_v36  ;;  %369 = vmatprep.mubr.bf16.mxu0 %v7015_v0  ;;  %7399 = vst [vmem:[#allocation21_spill] sm:$0xff] %v5481_v35 }
  0x59   :  { %482 = vmatprep.mubr.bf16.mxu1 %v7015_v0  ;;  %906 = vmatprep.subr.bf16.mxu0 %v5285_v37 }
  0x5a   :  { %948 = vmatpush1.bf16.msra.mxu1 %v5288_v38 }
  0x5b   :  { %949 = vmatprep.subr.bf16.mxu1 %v5290_v39 }
  0x5c   :  { %907 = vmatpush1.bf16.msra.mxu0 %v5294_v40 }
  0x5d   :  { %908 = vmatprep.subr.bf16.mxu0 %v5298_v41 }
  0x5e   :  { %950 = vmatpush1.bf16.msra.mxu1 %v5301_v42 }
  0x5f   :  { %370 = vmatmul.mubr.bf16.gmra.mrb[4].mxu0 %v4238_v43  ;;  %483 = vmatmul.mubr.bf16.gmra.mrb[4].mxu1 %v4238_v43  ;;  %v5487_v43 = vld [vmem:[#allocation7 + $0xc4] ss:$16 sps:$4 sm:$0xff]  }
  0x60   :  { %379 = vmatprep.mubr.bf16.mxu0 %v7015_v0  ;;  %492 = vmatprep.mubr.bf16.mxu1 %v7015_v0  ;;  %7400 = vst [vmem:[#allocation22_spill] sm:$0xff] %v5487_v43 }
  0x61   :  { %909 = vmatpush1.bf16.msra.mxu0 %v5308_v44  ;;  %951 = vmatprep.subr.bf16.mxu1 %v5313_v46 }
  0x62   :  { %910 = vmatprep.subr.bf16.mxu0 %v5310_v45  ;;  %952 = vmatpush1.bf16.msra.mxu1 %v5316_v47 }
  0x63   :  { %953 = vmatprep.subr.bf16.mxu1 %v5318_v48 }
  0x65   :  { %911 = vmatpush1.bf16.msra.mxu0 %v5323_v49 }
  0x66   :  { %912 = vmatprep.subr.bf16.mxu0 %v5326_v50  ;;  %954 = vmatpush1.bf16.msra.mxu1 %v5330_v51 }
  0x67   :  { %380 = vmatmul.mubr.bf16.gmra.mrb[8].mxu0 %v4244_v52  ;;  %493 = vmatmul.mubr.bf16.gmra.mrb[8].mxu1 %v4244_v52  ;;  %v5489_v52 = vld [vmem:[#allocation7 + $0xcc] ss:$16 sps:$4 sm:$0xff]  }
  0x68   :  { %389 = vmatprep.mubr.bf16.mxu0 %v7015_v0  ;;  %502 = vmatprep.mubr.bf16.mxu1 %v7015_v0  ;;  %7401 = vst [vmem:[#allocation23_spill] sm:$0xff] %v5489_v52 }
  0x69   :  { %913 = vmatpush1.bf16.msra.mxu0 %v5336_v53  ;;  %955 = vmatprep.subr.bf16.mxu1 %v5339_v54 }
  0x6a   :  { %914 = vmatprep.subr.bf16.mxu0 %v5342_v55  ;;  %956 = vmatpush1.bf16.msra.mxu1 %v5345_v56 }
  0x6b   :  { %957 = vmatprep.subr.bf16.mxu1 %v5347_v57 }
  0x6d   :  { %915 = vmatpush1.bf16.msra.mxu0 %v5351_v58 }
  0x6e   :  { %916 = vmatprep.subr.bf16.mxu0 %v5355_v59  ;;  %958 = vmatpush1.bf16.msra.mxu1 %v5359_v60 }
  0x6f   :  { %390 = vmatmul.mubr.bf16.gmra.mrb[12].mxu0 %v4251_v61  ;;  %503 = vmatmul.mubr.bf16.gmra.mrb[12].mxu1 %v4251_v61  ;;  %v5491_v61 = vld [vmem:[#allocation7 + $0xc0] ss:$16 sps:$4 sm:$0xff]  }
  0x70   :  { %399 = vmatprep.mubr.bf16.mxu0 %v7015_v0  ;;  %512 = vmatprep.mubr.bf16.mxu1 %v7015_v0  ;;  %7402 = vst [vmem:[#allocation24_spill] sm:$0xff] %v5491_v61 }
  0x71   :  { %917 = vmatpush1.bf16.msra.mxu0 %v5365_v62  ;;  %959 = vmatprep.subr.bf16.mxu1 %v5368_v63 }
  0x72   :  { %918 = vmatprep.subr.bf16.mxu0 %v5372_v1  ;;  %960 = vmatpush1.bf16.msra.mxu1 %v5374_v2 }
  0x73   :  { %961 = vmatprep.subr.bf16.mxu1 %v5376_v3 }
  0x75   :  { %919 = vmatpush1.bf16.msra.mxu0 %v5380_v4 }
  0x76   :  { %962 = vmatpush1.bf16.msra.mxu1 %v5387_v6  ;;  %1431 = vmatprep.subr.bf16.mxu0 %v5389_v7 }
  0x77   :  { %400 = vmatmul.mubr.bf16.gmra.mrb[16].mxu0 %v4258_v5  ;;  %513 = vmatmul.mubr.bf16.gmra.mrb[16].mxu1 %v4258_v5  ;;  %v5493_v5 = vld [vmem:[#allocation7 + $0xc8] ss:$16 sps:$4 sm:$0xff]  }
  0x78   :  { %409 = vmatprep.mubr.bf16.mxu0 %v7015_v0  ;;  %522 = vmatprep.mubr.bf16.mxu1 %v7015_v0  ;;  %7403 = vst [vmem:[#allocation25_spill] sm:$0xff] %v5493_v5 }
  0x79   :  { %1474 = vmatprep.subr.bf16.mxu1 %v5394_v8 }
  0x7f   :  { %410 = vmatmul.mubr.bf16.gmra.mrb[20].mxu0 %v4265_v9  ;;  %523 = vmatmul.mubr.bf16.gmra.mrb[20].mxu1 %v4265_v9  ;;  %v5499_v9 = vld [vmem:[#allocation7 + $0xe4] ss:$16 sps:$4 sm:$0xff]  }
  0x80   :  { %419 = vmatprep.mubr.bf16.mxu0 %v7015_v0  ;;  %532 = vmatprep.mubr.bf16.mxu1 %v7015_v0  ;;  %7404 = vst [vmem:[#allocation26_spill] sm:$0xff] %v5499_v9 }
  0x87   :  { %420 = vmatmul.mubr.bf16.gmra.mrb[24].mxu0 %v4272_v10  ;;  %533 = vmatmul.mubr.bf16.gmra.mrb[24].mxu1 %v4272_v10  ;;  %v5501_v10 = vld [vmem:[#allocation7 + $0xec] ss:$16 sps:$4 sm:$0xff]  }
  0x88   :  { %429 = vmatprep.mubr.bf16.mxu0 %v7015_v0  ;;  %542 = vmatprep.mubr.bf16.mxu1 %v7015_v0  ;;  %7405 = vst [vmem:[#allocation27_spill] sm:$0xff] %v5501_v10 }
  0x8f   :  { %430 = vmatmul.mubr.bf16.gmra.mrb[28].mxu0 %v4280_v11  ;;  %543 = vmatmul.mubr.bf16.gmra.mrb[28].mxu1 %v4280_v11  ;;  %v5503_v11 = vld [vmem:[#allocation7 + $0xe0] ss:$16 sps:$4 sm:$0xff]  }
  0x90   :  { %936 = vmatprep.mubr.bf16.mxu0 %v7015_v0  ;;  %979 = vmatprep.mubr.bf16.mxu1 %v7015_v0  ;;  %7406 = vst [vmem:[#allocation28_spill] sm:$0xff] %v5503_v11 }
  0x97   :  { %937 = vmatmul.mubr.bf16.vlgmr.msra.gmra.mrb[0].mxu0 %v7015_v0  ;;  %980 = vmatmul.mubr.bf16.vlgmr.msra.gmra.mrb[0].mxu1 %v7015_v0 }
  0x98   :  { %1432 = vmatpush1.bf16.msra.mxu0 %v5417_v12  ;;  %1475 = vmatpush1.bf16.msra.mxu1 %v5419_v13 }
  0x99   :  { %1433 = vmatprep.subr.bf16.mxu0 %v5421_v14  ;;  %1476 = vmatprep.subr.bf16.mxu1 %v5423_v15 }
  0x9a   :  { %1463 = vmatprep.mubr.bf16.mxu0 %v7015_v0  ;;  %1506 = vmatprep.mubr.bf16.mxu1 %v7015_v0  ;;  %v5505_v0 = vld [vmem:[#allocation7 + $0xe8] ss:$16 sps:$4 sm:$0xff]  }
  0x9b   :  { %7407 = vst [vmem:[#allocation29_spill] sm:$0xff] %v5505_v0 }
  0x9c   :  { %1434 = vmatpush1.bf16.msra.mxu0 %v5429_v16  ;;  %1477 = vmatpush1.bf16.msra.mxu1 %v5431_v17 }
  0x9d   :  { %1435 = vmatprep.subr.bf16.mxu0 %v5435_v18  ;;  %1478 = vmatprep.subr.bf16.mxu1 %v5437_v19 }
  0xa0   :  { %1436 = vmatpush1.bf16.msra.mxu0 %v5443_v20  ;;  %1479 = vmatpush1.bf16.msra.mxu1 %v5445_v21 }
  0xa1   :  { %1437 = vmatprep.subr.bf16.mxu0 %v5449_v22  ;;  %1480 = vmatprep.subr.bf16.mxu1 %v5451_v23 }
  0xa4   :  { %1438 = vmatpush1.bf16.msra.mxu0 %v5455_v24  ;;  %1481 = vmatpush1.bf16.msra.mxu1 %v5457_v25 }
  0xa5   :  { %1439 = vmatprep.subr.bf16.mxu0 %v5463_v26  ;;  %1482 = vmatprep.subr.bf16.mxu1 %v5465_v27 }
  0xa8   :  { %1440 = vmatpush1.bf16.msra.mxu0 %v5467_v28  ;;  %1483 = vmatpush1.bf16.msra.mxu1 %v5469_v29 }
  0xa9   :  { %1441 = vmatprep.subr.bf16.mxu0 %v5475_v30  ;;  %1484 = vmatprep.subr.bf16.mxu1 %v5477_v31 }
  0xac   :  { %1442 = vmatpush1.bf16.msra.mxu0 %v5479_v32  ;;  %1485 = vmatpush1.bf16.msra.mxu1 %v5481_v35  ;;  %v5569_v35 = vld [vmem:[#allocation7 + $0x1a4] ss:$16 sps:$4 sm:$0xff]  }
  0xad   :  { %1443 = vmatprep.subr.bf16.mxu0 %v5487_v43  ;;  %1486 = vmatprep.subr.bf16.mxu1 %v5489_v52  ;;  %v5511_v52 = vld [vmem:[#allocation7 + $0x104] ss:$16 sps:$4 sm:$0xff]   ;;  %v5517_v43 = vld [vmem:[#allocation7 + $0x108] ss:$16 sps:$4 sm:$0xff]   ;;  %7428 = vst [vmem:[#allocation50_spill] sm:$0xff] %v5569_v35 }
  0xae   :  { %7408 = vst [vmem:[#allocation30_spill] sm:$0xff] %v5511_v52  ;;  %7411 = vst [vmem:[#allocation33_spill] sm:$0xff] %v5517_v43 }
  0xb0   :  { %1444 = vmatpush1.bf16.msra.mxu0 %v5491_v61  ;;  %1487 = vmatpush1.bf16.msra.mxu1 %v5493_v5  ;;  %v5513_v61 = vld [vmem:[#allocation7 + $0x10c] ss:$16 sps:$4 sm:$0xff]   ;;  %v5515_v5 = vld [vmem:[#allocation7 + $0x100] ss:$16 sps:$4 sm:$0xff]  }
  0xb1   :  { %1445 = vmatprep.subr.bf16.mxu0 %v5499_v9  ;;  %1488 = vmatprep.subr.bf16.mxu1 %v5501_v10  ;;  %7409 = vst [vmem:[#allocation31_spill] sm:$0xff] %v5513_v61  ;;  %7410 = vst [vmem:[#allocation32_spill] sm:$0xff] %v5515_v5  ;;  %v5523_v10 = vld [vmem:[#allocation7 + $0x124] ss:$16 sps:$4 sm:$0xff]   ;;  %v5529_v9 = vld [vmem:[#allocation7 + $0x128] ss:$16 sps:$4 sm:$0xff]  }
  0xb2   :  { %7412 = vst [vmem:[#allocation34_spill] sm:$0xff] %v5523_v10  ;;  %7415 = vst [vmem:[#allocation37_spill] sm:$0xff] %v5529_v9 }
  0xb4   :  { %1446 = vmatpush1.bf16.msra.mxu0 %v5503_v11  ;;  %1489 = vmatpush1.bf16.msra.mxu1 %v5505_v0  ;;  %v5525_v11 = vld [vmem:[#allocation7 + $0x12c] ss:$16 sps:$4 sm:$0xff]   ;;  %v5527_v0 = vld [vmem:[#allocation7 + $0x120] ss:$16 sps:$4 sm:$0xff]  }
  0xb5   :  { %1447 = vmatprep.subr.bf16.mxu0 %v5511_v52  ;;  %1490 = vmatprep.subr.bf16.mxu1 %v5513_v61  ;;  %7413 = vst [vmem:[#allocation35_spill] sm:$0xff] %v5525_v11  ;;  %7414 = vst [vmem:[#allocation36_spill] sm:$0xff] %v5527_v0  ;;  %v5535_v61 = vld [vmem:[#allocation7 + $0x144] ss:$16 sps:$4 sm:$0xff]   ;;  %v5541_v52 = vld [vmem:[#allocation7 + $0x148] ss:$16 sps:$4 sm:$0xff]  }
  0xb6   :  { %7416 = vst [vmem:[#allocation38_spill] sm:$0xff] %v5535_v61  ;;  %7419 = vst [vmem:[#allocation41_spill] sm:$0xff] %v5541_v52 }
  0xb8   :  { %1448 = vmatpush1.bf16.msra.mxu0 %v5515_v5  ;;  %1491 = vmatpush1.bf16.msra.mxu1 %v5517_v43  ;;  %v5537_v5 = vld [vmem:[#allocation7 + $0x14c] ss:$16 sps:$4 sm:$0xff]   ;;  %v5539_v43 = vld [vmem:[#allocation7 + $0x140] ss:$16 sps:$4 sm:$0xff]  }
  0xb9   :  { %1449 = vmatprep.subr.bf16.mxu0 %v5523_v10  ;;  %1492 = vmatprep.subr.bf16.mxu1 %v5525_v11  ;;  %7417 = vst [vmem:[#allocation39_spill] sm:$0xff] %v5537_v5  ;;  %7418 = vst [vmem:[#allocation40_spill] sm:$0xff] %v5539_v43  ;;  %v5547_v11 = vld [vmem:[#allocation7 + $0x164] ss:$16 sps:$4 sm:$0xff]   ;;  %v5553_v10 = vld [vmem:[#allocation7 + $0x168] ss:$16 sps:$4 sm:$0xff]  }
  0xba   :  { %7420 = vst [vmem:[#allocation42_spill] sm:$0xff] %v5547_v11  ;;  %7423 = vst [vmem:[#allocation45_spill] sm:$0xff] %v5553_v10 }
  0xbc   :  { %1450 = vmatpush1.bf16.msra.mxu0 %v5527_v0  ;;  %1493 = vmatpush1.bf16.msra.mxu1 %v5529_v9  ;;  %v5549_v0 = vld [vmem:[#allocation7 + $0x16c] ss:$16 sps:$4 sm:$0xff]   ;;  %v5551_v9 = vld [vmem:[#allocation7 + $0x160] ss:$16 sps:$4 sm:$0xff]  }
  0xbd   :  { %1451 = vmatprep.subr.bf16.mxu0 %v5535_v61  ;;  %1494 = vmatprep.subr.bf16.mxu1 %v5537_v5  ;;  %7421 = vst [vmem:[#allocation43_spill] sm:$0xff] %v5549_v0  ;;  %7422 = vst [vmem:[#allocation44_spill] sm:$0xff] %v5551_v9  ;;  %v5559_v5 = vld [vmem:[#allocation7 + $0x184] ss:$16 sps:$4 sm:$0xff]   ;;  %v5565_v61 = vld [vmem:[#allocation7 + $0x188] ss:$16 sps:$4 sm:$0xff]  }
  0xbe   :  { %7424 = vst [vmem:[#allocation46_spill] sm:$0xff] %v5559_v5  ;;  %7427 = vst [vmem:[#allocation49_spill] sm:$0xff] %v5565_v61 }
  0xc0   :  { %1452 = vmatpush1.bf16.msra.mxu0 %v5539_v43  ;;  %1495 = vmatpush1.bf16.msra.mxu1 %v5541_v52  ;;  %v5561_v43 = vld [vmem:[#allocation7 + $0x18c] ss:$16 sps:$4 sm:$0xff]   ;;  %v5563_v52 = vld [vmem:[#allocation7 + $0x180] ss:$16 sps:$4 sm:$0xff]  }
  0xc1   :  { %1453 = vmatprep.subr.bf16.mxu0 %v5547_v11  ;;  %1496 = vmatprep.subr.bf16.mxu1 %v5549_v0  ;;  %7425 = vst [vmem:[#allocation47_spill] sm:$0xff] %v5561_v43  ;;  %7426 = vst [vmem:[#allocation48_spill] sm:$0xff] %v5563_v52  ;;  %v5571_v11 = vld [vmem:[#allocation7 + $0x1ac] ss:$16 sps:$4 sm:$0xff]   ;;  %v5581_v0 = vld [vmem:[#allocation7 + $0x1c4] ss:$16 sps:$4 sm:$0xff]  }
  0xc2   :  { %7429 = vst [vmem:[#allocation51_spill] sm:$0xff] %v5571_v11  ;;  %7432 = vst [vmem:[#allocation54_spill] sm:$0xff] %v5581_v0 }
  0xc4   :  { %1454 = vmatpush1.bf16.msra.mxu0 %v5551_v9  ;;  %1497 = vmatpush1.bf16.msra.mxu1 %v5553_v10  ;;  %v5575_v10 = vld [vmem:[#allocation7 + $0x1a0] ss:$16 sps:$4 sm:$0xff]   ;;  %v5577_v9 = vld [vmem:[#allocation7 + $0x1a8] ss:$16 sps:$4 sm:$0xff]  }
  0xc5   :  { %1455 = vmatprep.subr.bf16.mxu0 %v5559_v5  ;;  %1498 = vmatprep.subr.bf16.mxu1 %v5561_v43  ;;  %7430 = vst [vmem:[#allocation52_spill] sm:$0xff] %v5575_v10  ;;  %7431 = vst [vmem:[#allocation53_spill] sm:$0xff] %v5577_v9  ;;  %v5583_v5 = vld [vmem:[#allocation7 + $0x1cc] ss:$16 sps:$4 sm:$0xff]   ;;  %v5587_v43 = vld [vmem:[#allocation7 + $0x1c0] ss:$16 sps:$4 sm:$0xff]  }
  0xc6   :  { %7433 = vst [vmem:[#allocation55_spill] sm:$0xff] %v5583_v5  ;;  %7434 = vst [vmem:[#allocation56_spill] sm:$0xff] %v5587_v43 }
  0xc8   :  { %1456 = vmatpush1.bf16.msra.mxu0 %v5563_v52  ;;  %1499 = vmatpush1.bf16.msra.mxu1 %v5565_v61  ;;  %v5589_v52 = vld [vmem:[#allocation7 + $0x1c8] ss:$16 sps:$4 sm:$0xff]   ;;  %v5593_v61 = vld [vmem:[#allocation7 + $0x1e4] ss:$16 sps:$4 sm:$0xff]  }
  0xc9   :  { %1457 = vmatprep.subr.bf16.mxu0 %v5569_v35  ;;  %1500 = vmatprep.subr.bf16.mxu1 %v5571_v11  ;;  %7435 = vst [vmem:[#allocation57_spill] sm:$0xff] %v5589_v52  ;;  %7436 = vst [vmem:[#allocation58_spill] sm:$0xff] %v5593_v61  ;;  %v5595_v35 = vld [vmem:[#allocation7 + $0x1ec] ss:$16 sps:$4 sm:$0xff]   ;;  %v5599_v11 = vld [vmem:[#allocation7 + $0x1e0] ss:$16 sps:$4 sm:$0xff]  }
  0xca   :  { %7437 = vst [vmem:[#allocation59_spill] sm:$0xff] %v5595_v35  ;;  %7438 = vst [vmem:[#allocation60_spill] sm:$0xff] %v5599_v11 }
  0xcc   :  { %1458 = vmatpush1.bf16.msra.mxu0 %v5575_v10  ;;  %1501 = vmatpush1.bf16.msra.mxu1 %v5577_v9  ;;  %v5601_v10 = vld [vmem:[#allocation7 + $0x1e8] ss:$16 sps:$4 sm:$0xff]  }
  0xcd   :  { %1459 = vmatprep.subr.bf16.mxu0 %v5581_v0  ;;  %1502 = vmatprep.subr.bf16.mxu1 %v5583_v5  ;;  %7439 = vst [vmem:[#allocation61_spill] sm:$0xff] %v5601_v10  ;;  %v555_v5 = vlaneseq  ;;  %v553_v0 = vld [vmem:[%s7009_s3] sm:$0xf] }
  0xd0   :  { %1460 = vmatpush1.bf16.msra.mxu0 %v5587_v43  ;;  %1503 = vmatpush1.bf16.msra.mxu1 %v5589_v52  ;;  %v5609_v43 = vshrl.u32 %v555_v5, 7 }
  0xd1   :  { %1461 = vmatprep.subr.bf16.mxu0 %v5593_v61  ;;  %1504 = vmatprep.subr.bf16.mxu1 %v5595_v35 }
  0xd2   :  { %v7109_v52 = vsub.s32 0, %v5609_v43  ;;  %v7114_v61 = vsub.s32 1, %v5609_v43  ;;  %v7123_v5 = vsub.s32 3, %v5609_v43 }
  0xd4   :  { %1462 = vmatpush1.bf16.msra.mxu0 %v5599_v11  ;;  %1505 = vmatpush1.bf16.msra.mxu1 %v5601_v10  ;;  %v5618_v11 = vrot.slane %v553_v0, %v7109_v52  ;;  %v7126_v52 = vsub.s32 2, %v5609_v43  ;;  %v5631_v24 = vrot.slane %v553_v0, %v7123_v5 }
  0xd5   :  { %1604 = vmatprep.subr.bf16.mxu0 %v5275_v33  ;;  %1647 = vmatprep.subr.bf16.mxu1 %v5277_v34  ;;  %v5622_v33 = vrot.slane %v553_v0, %v7114_v61 }
  0xd6   :  { %7440 = vst [vmem:[#allocation62_spill] sm:$0xff] %v5618_v11 }
  0xd7   :  { %7441 = vst [vmem:[#allocation63_spill] sm:$0xff] %v5622_v33 }
 0x16a   :  { %v938_v34 = vpop.f32.mrb[0].mxu0  ;;  %v981_v10 = vpop.f32.mrb[0].mxu1 }
 0x16b   :  { %v4050_v35 = vadd.f32 %v938_v34, %v5618_v11  ;;  %v940_v9 = vpop.f32.mrb[1].mxu0  ;;  %v983_v32 = vpop.f32.mrb[1].mxu1 }
 0x16c   :  { %v4051_v31 = vadd.f32 %v940_v9, %v5622_v33  ;;  %v942_v30 = vpop.f32.mrb[2].mxu0  ;;  %v985_v29 = vpop.f32.mrb[2].mxu1  ;;  %v4083_v22 = vadd.f32 %v983_v32, %v5631_v24 }
 0x16d   :  { %v3852_v28 = vmul.f32 -1.442695, %v4050_v35  ;;  %v4052_v27 = vadd.f32 %v942_v30, %v5618_v11  ;;  %v944_v26 = vpop.f32.mrb[3].mxu0  ;;  %v987_v61 = vpop.f32.mrb[3].mxu1  ;;  %v5636_v35 = vrot.slane %v553_v0, %v7126_v52 }
 0x16e   :  { %v3854_v25 = vmul.f32 -1.442695, %v4051_v31  ;;  %v4053_v34 = vadd.f32 %v944_v26, %v5622_v33  ;;  %v3856_v31 = vmul.f32 -1.442695, %v4083_v22  ;;  %v4085_v5 = vadd.f32 %v987_v61, %v5631_v24 }
 0x16f   :  { %4394 = vpow2.f32 %v3852_v28  ;;  %v3853_v23 = vmul.f32 -1.442695, %v4052_v27  ;;  %7442 = vst [vmem:[#allocation64_spill] sm:$0xff] %v5636_v35  ;;  %v4082_v30 = vadd.f32 %v981_v10, %v5636_v35  ;;  %v4084_v11 = vadd.f32 %v985_v29, %v5636_v35 }
 0x170   :  { %4396 = vpow2.f32 %v3854_v25  ;;  %v3855_v9 = vmul.f32 -1.442695, %v4053_v34  ;;  %v3857_v28 = vmul.f32 -1.442695, %v4085_v5 }
 0x171   :  { %4398 = vpow2.f32 %v3853_v23 }
 0x172   :  { %4400 = vpow2.f32 %v3855_v9 }
 0x173   :  { %4402 = vtanh.f32 %v4082_v30 }
 0x174   :  { %4404 = vpow2.f32 %v3856_v31 }
 0x175   :  { %4406 = vtanh.f32 %v4084_v11 }
 0x179   :  { %v4395_v26 = vpop.eup %4394 }
 0x17a   :  { %v4397_v27 = vpop.eup %4396  ;;  %v1004_v25 = vadd.f32 1.0, %v4395_v26 }
 0x17b   :  { %v1016_v34 = vadd.f32 1.0, %v4397_v27  ;;  %v4399_v0 = vpop.eup %4398 }
 0x17c   :  { %4408 = vrcp.f32 %v1004_v25  ;;  %v1005_v23 = vadd.f32 1.0, %v4399_v0  ;;  %v4401_v32 = vpop.eup %4400 }
 0x17d   :  { %4410 = vrcp.f32 %v1016_v34  ;;  %v1017_v22 = vadd.f32 1.0, %v4401_v32  ;;  %v4403_v61 = vpop.eup %4402 }
 0x17e   :  { %4412 = vpow2.f32 %v3857_v28  ;;  %v4405_v10 = vpop.eup %4404 }
 0x17f   :  { %4414 = vrcp.f32 %v1005_v23  ;;  %v4407_v29 = vpop.eup %4406  ;;  %v1030_v27 = vadd.f32 1.0, %v4405_v10 }
 0x180   :  { %4416 = vrcp.f32 %v1017_v22 }
 0x181   :  { %4418 = vrcp.f32 %v1030_v27  ;;  %v7481_v27 = vld [vmem:[#allocation47_spill] sm:$0xff] }
 0x186   :  { %v4409_v9 = vpop.eup %4408 }
 0x187   :  { %v4411_v30 = vpop.eup %4410  ;;  %v1038_v52 = vmul.f32 %v4409_v9, %v4403_v61 }
 0x188   :  { %v4413_v26 = vpop.eup %4412  ;;  %v1036_v31 = vmul.f32 0.0, %v4411_v30  ;;  %v7477_v30 = vld [vmem:[#allocation43_spill] sm:$0xff] }
 0x189   :  { %v4415_v5 = vpop.eup %4414  ;;  %v1031_v0 = vadd.f32 1.0, %v4413_v26  ;;  %v7478_v26 = vld [vmem:[#allocation44_spill] sm:$0xff] }
 0x18a   :  { %v5642_v11 = vadd.f32 %v1038_v52, %v1036_v31  ;;  %v1039_v25 = vmul.f32 %v4415_v5, %v4407_v29  ;;  %v4417_v34 = vpop.eup %4416  ;;  %v7476_v29 = vld [vmem:[#allocation42_spill] sm:$0xff]  ;;  %v7479_v31 = vld [vmem:[#allocation45_spill] sm:$0xff] }
 0x18b   :  { %v1037_v35 = vmul.f32 0.0, %v4417_v34  ;;  %v4419_v23 = vpop.eup %4418  ;;  %v7480_v5 = vld [vmem:[#allocation46_spill] sm:$0xff]  ;;  %v7483_v34 = vld [vmem:[#allocation49_spill] sm:$0xff] }
 0x18c   :  { %4420 = vtanh.f32 %v5642_v11 }
 0x18d   :  { %v5645_v28 = vadd.f32 %v1039_v25, %v1037_v35  ;;  %4422 = vrcp.f32 %v1031_v0  ;;  %v7443_v35 = vmov 0   ;;  %v7482_v25 = vld [vmem:[#allocation48_spill] sm:$0xff]  ;;  %v7484_v0 = vld [vmem:[#allocation50_spill] sm:$0xff] }
 0x18f   :  { %4424 = vtanh.f32 %v5645_v28 }
 0x196   :  { %v4421_v32 = vpop.eup %4420 }
 0x197   :  { %v4423_v22 = vpop.eup %4422  ;;  %v1044_v9 = vmul.f32 %v4421_v32, %v4419_v23  ;;  %v7485_v23 = vld [vmem:[#allocation51_spill] sm:$0xff]  ;;  %v7486_v32 = vld [vmem:[#allocation52_spill] sm:$0xff] }
 0x199   :  { %v4425_v61 = vpop.eup %4424 }
 0x19a   :  { %v1045_v10 = vmul.f32 %v4425_v61, %v4423_v22  ;;  %v7487_v22 = vld [vmem:[#allocation53_spill] sm:$0xff]  ;;  %v7488_v61 = vld [vmem:[#allocation54_spill] sm:$0xff] }
 0x19c   :  { %v1046_v52 = vpack.c.bf16 %v1045_v10, %v1044_v9  ;;  %v7489_v9 = vld [vmem:[#allocation55_spill] sm:$0xff]  ;;  %v7490_v10 = vld [vmem:[#allocation56_spill] sm:$0xff] }
 0x19e   :  { %1464 = vmatmul.mubr.bf16.vlgmr.msra.gmra.mrb[32].mxu0 %v1046_v52  ;;  %1507 = vmatmul.mubr.bf16.vlgmr.msra.gmra.mrb[32].mxu1 %v1046_v52 }
 0x19f   :  { %1605 = vmatpush1.bf16.msra.mxu0 %v5282_v36  ;;  %1648 = vmatpush1.bf16.msra.mxu1 %v5288_v38  ;;  %v7444_v36 = vld [vmem:[#allocation10_spill] sm:$0xff]  ;;  %v7446_v38 = vld [vmem:[#allocation12_spill] sm:$0xff] }
 0x1a0   :  { %1606 = vmatprep.subr.bf16.mxu0 %v5285_v37  ;;  %1649 = vmatprep.subr.bf16.mxu1 %v5290_v39  ;;  %v7445_v37 = vld [vmem:[#allocation11_spill] sm:$0xff]  ;;  %v7447_v39 = vld [vmem:[#allocation13_spill] sm:$0xff] }
 0x1a1   :  { %1636 = vmatprep.mubr.bf16.mxu0 %v7443_v35  ;;  %1679 = vmatprep.mubr.bf16.mxu1 %v7443_v35 }
 0x1a3   :  { %1607 = vmatpush1.bf16.msra.mxu0 %v5294_v40  ;;  %1650 = vmatpush1.bf16.msra.mxu1 %v5301_v42  ;;  %v7448_v40 = vld [vmem:[#allocation14_spill] sm:$0xff]  ;;  %v7450_v42 = vld [vmem:[#allocation16_spill] sm:$0xff] }
 0x1a4   :  { %1608 = vmatprep.subr.bf16.mxu0 %v5298_v41  ;;  %1651 = vmatprep.subr.bf16.mxu1 %v5313_v46  ;;  %v7449_v41 = vld [vmem:[#allocation15_spill] sm:$0xff] }
 0x1a5   :  { %v7453_v46 = vld [vmem:[#allocation19_spill] sm:$0xff] }
 0x1a7   :  { %1609 = vmatpush1.bf16.msra.mxu0 %v5308_v44  ;;  %1652 = vmatpush1.bf16.msra.mxu1 %v5316_v47  ;;  %v7451_v44 = vld [vmem:[#allocation17_spill] sm:$0xff]  ;;  %v7454_v47 = vld [vmem:[#allocation20_spill] sm:$0xff] }
 0x1a8   :  { %1610 = vmatprep.subr.bf16.mxu0 %v5310_v45  ;;  %1653 = vmatprep.subr.bf16.mxu1 %v5318_v48  ;;  %v7452_v45 = vld [vmem:[#allocation18_spill] sm:$0xff]  ;;  %v7455_v48 = vld [vmem:[#allocation21_spill] sm:$0xff] }
 0x1ab   :  { %1611 = vmatpush1.bf16.msra.mxu0 %v5323_v49  ;;  %1654 = vmatpush1.bf16.msra.mxu1 %v5330_v51  ;;  %v7456_v49 = vld [vmem:[#allocation22_spill] sm:$0xff]  ;;  %v7458_v51 = vld [vmem:[#allocation24_spill] sm:$0xff] }
 0x1ac   :  { %1612 = vmatprep.subr.bf16.mxu0 %v5326_v50  ;;  %1655 = vmatprep.subr.bf16.mxu1 %v5339_v54  ;;  %v7457_v50 = vld [vmem:[#allocation23_spill] sm:$0xff]  ;;  %v7460_v54 = vld [vmem:[#allocation26_spill] sm:$0xff] }
 0x1af   :  { %1613 = vmatpush1.bf16.msra.mxu0 %v5336_v53  ;;  %1656 = vmatpush1.bf16.msra.mxu1 %v5345_v56  ;;  %v7459_v53 = vld [vmem:[#allocation25_spill] sm:$0xff]  ;;  %v7462_v56 = vld [vmem:[#allocation28_spill] sm:$0xff] }
 0x1b0   :  { %1614 = vmatprep.subr.bf16.mxu0 %v5342_v55  ;;  %1657 = vmatprep.subr.bf16.mxu1 %v5347_v57  ;;  %v7461_v55 = vld [vmem:[#allocation27_spill] sm:$0xff]  ;;  %v7463_v57 = vld [vmem:[#allocation29_spill] sm:$0xff] }
 0x1b3   :  { %1615 = vmatpush1.bf16.msra.mxu0 %v5351_v58  ;;  %1658 = vmatpush1.bf16.msra.mxu1 %v5359_v60  ;;  %v7464_v58 = vld [vmem:[#allocation30_spill] sm:$0xff]  ;;  %v7466_v60 = vld [vmem:[#allocation32_spill] sm:$0xff] }
 0x1b4   :  { %1616 = vmatprep.subr.bf16.mxu0 %v5355_v59  ;;  %1659 = vmatprep.subr.bf16.mxu1 %v5368_v63  ;;  %v7465_v59 = vld [vmem:[#allocation31_spill] sm:$0xff]  ;;  %v7468_v63 = vld [vmem:[#allocation34_spill] sm:$0xff] }
 0x1b7   :  { %1617 = vmatpush1.bf16.msra.mxu0 %v5365_v62  ;;  %1660 = vmatpush1.bf16.msra.mxu1 %v5374_v2  ;;  %v7467_v62 = vld [vmem:[#allocation33_spill] sm:$0xff]  ;;  %v7470_v2 = vld [vmem:[#allocation36_spill] sm:$0xff] }
 0x1b8   :  { %1618 = vmatprep.subr.bf16.mxu0 %v5372_v1  ;;  %1661 = vmatprep.subr.bf16.mxu1 %v5376_v3  ;;  %v7469_v1 = vld [vmem:[#allocation35_spill] sm:$0xff]  ;;  %v7471_v3 = vld [vmem:[#allocation37_spill] sm:$0xff] }
 0x1bb   :  { %1619 = vmatpush1.bf16.msra.mxu0 %v5380_v4  ;;  %1662 = vmatpush1.bf16.msra.mxu1 %v5387_v6  ;;  %v7472_v4 = vld [vmem:[#allocation38_spill] sm:$0xff]  ;;  %v7473_v6 = vld [vmem:[#allocation39_spill] sm:$0xff] }
 0x1bc   :  { %1747 = vmatprep.subr.bf16.mxu0 %v5389_v7  ;;  %1790 = vmatprep.subr.bf16.mxu1 %v5394_v8  ;;  %v7474_v7 = vld [vmem:[#allocation40_spill] sm:$0xff]  ;;  %v7475_v8 = vld [vmem:[#allocation41_spill] sm:$0xff] }
 0x1be   :  { %1637 = vmatmul.mubr.bf16.vlgmr.msra.gmra.mrb[4].mxu0 %v1046_v52  ;;  %1680 = vmatmul.mubr.bf16.vlgmr.msra.gmra.mrb[4].mxu1 %v1046_v52  ;;  %v7491_v52 = vld [vmem:[#allocation57_spill] sm:$0xff] }
 0x1bf   :  { %1748 = vmatpush1.bf16.msra.mxu0 %v5417_v12  ;;  %1791 = vmatpush1.bf16.msra.mxu1 %v5419_v13 }
 0x1c0   :  { %1749 = vmatprep.subr.bf16.mxu0 %v5421_v14  ;;  %1792 = vmatprep.subr.bf16.mxu1 %v5423_v15 }
 0x1c3   :  { %1750 = vmatpush1.bf16.msra.mxu0 %v5429_v16  ;;  %1793 = vmatpush1.bf16.msra.mxu1 %v5431_v17 }
 0x1c4   :  { %1751 = vmatprep.subr.bf16.mxu0 %v5435_v18  ;;  %1794 = vmatprep.subr.bf16.mxu1 %v5437_v19 }
 0x1c7   :  { %1752 = vmatpush1.bf16.msra.mxu0 %v5443_v20  ;;  %1795 = vmatpush1.bf16.msra.mxu1 %v5445_v21 }
 0x1c8   :  { %1753 = vmatprep.subr.bf16.mxu0 %v7444_v36  ;;  %1796 = vmatprep.subr.bf16.mxu1 %v7445_v37 }
 0x1cb   :  { %1754 = vmatpush1.bf16.msra.mxu0 %v7446_v38  ;;  %1797 = vmatpush1.bf16.msra.mxu1 %v7447_v39 }
 0x1cc   :  { %1755 = vmatprep.subr.bf16.mxu0 %v7448_v40  ;;  %1798 = vmatprep.subr.bf16.mxu1 %v7449_v41 }
 0x1cf   :  { %1756 = vmatpush1.bf16.msra.mxu0 %v7450_v42  ;;  %1799 = vmatpush1.bf16.msra.mxu1 %v7451_v44 }
 0x1d0   :  { %1757 = vmatprep.subr.bf16.mxu0 %v7452_v45  ;;  %1800 = vmatprep.subr.bf16.mxu1 %v7453_v46 }
 0x1d3   :  { %1758 = vmatpush1.bf16.msra.mxu0 %v7454_v47  ;;  %1801 = vmatpush1.bf16.msra.mxu1 %v7455_v48 }
 0x1d4   :  { %1759 = vmatprep.subr.bf16.mxu0 %v7456_v49  ;;  %1802 = vmatprep.subr.bf16.mxu1 %v7457_v50 }
 0x1d7   :  { %1760 = vmatpush1.bf16.msra.mxu0 %v7458_v51  ;;  %1803 = vmatpush1.bf16.msra.mxu1 %v7459_v53 }
 0x1d8   :  { %1761 = vmatprep.subr.bf16.mxu0 %v7460_v54  ;;  %1804 = vmatprep.subr.bf16.mxu1 %v7461_v55 }
 0x1db   :  { %1762 = vmatpush1.bf16.msra.mxu0 %v7462_v56  ;;  %1805 = vmatpush1.bf16.msra.mxu1 %v7463_v57 }
 0x1dc   :  { %1763 = vmatprep.subr.bf16.mxu0 %v7464_v58  ;;  %1806 = vmatprep.subr.bf16.mxu1 %v7465_v59 }
 0x1df   :  { %1764 = vmatpush1.bf16.msra.mxu0 %v7466_v60  ;;  %1807 = vmatpush1.bf16.msra.mxu1 %v7467_v62 }
 0x1e0   :  { %1765 = vmatprep.subr.bf16.mxu0 %v7468_v63  ;;  %1808 = vmatprep.subr.bf16.mxu1 %v7469_v1 }
 0x1e3   :  { %1766 = vmatpush1.bf16.msra.mxu0 %v7470_v2  ;;  %1809 = vmatpush1.bf16.msra.mxu1 %v7471_v3 }
 0x1e4   :  { %1767 = vmatprep.subr.bf16.mxu0 %v7472_v4  ;;  %1810 = vmatprep.subr.bf16.mxu1 %v7473_v6 }
 0x1e7   :  { %1768 = vmatpush1.bf16.msra.mxu0 %v7474_v7  ;;  %1811 = vmatpush1.bf16.msra.mxu1 %v7475_v8  ;;  %v7501_v7 = vsub.s32 3, %v5609_v43 }
 0x1e8   :  { %1769 = vmatprep.subr.bf16.mxu0 %v7476_v29  ;;  %1812 = vmatprep.subr.bf16.mxu1 %v7477_v30 }
 0x1eb   :  { %1770 = vmatpush1.bf16.msra.mxu0 %v7478_v26  ;;  %1813 = vmatpush1.bf16.msra.mxu1 %v7479_v31 }
 0x1ec   :  { %1771 = vmatprep.subr.bf16.mxu0 %v7480_v5  ;;  %1814 = vmatprep.subr.bf16.mxu1 %v7481_v27  ;;  %v7492_v27 = vld [vmem:[#allocation58_spill] sm:$0xff] }
 0x1ef   :  { %1772 = vmatpush1.bf16.msra.mxu0 %v7482_v25  ;;  %1815 = vmatpush1.bf16.msra.mxu1 %v7483_v34  ;;  %v7493_v25 = vld [vmem:[#allocation59_spill] sm:$0xff]  ;;  %v7494_v34 = vld [vmem:[#allocation60_spill] sm:$0xff] }
 0x1f0   :  { %1773 = vmatprep.subr.bf16.mxu0 %v7484_v0  ;;  %1816 = vmatprep.subr.bf16.mxu1 %v7485_v23  ;;  %v7495_v0 = vld [vmem:[#allocation61_spill] sm:$0xff]  ;;  %v5744_v23 = vld [vmem:[#allocation5 + $0x4] ss:$16 sps:$4 sm:$0xff]  }
 0x1f1   :  { %7496 = vst [vmem:[#allocation10_spill] sm:$0xff] %v5744_v23 }
 0x1f3   :  { %1774 = vmatpush1.bf16.msra.mxu0 %v7486_v32  ;;  %1817 = vmatpush1.bf16.msra.mxu1 %v7487_v22  ;;  %v5747_v22 = vld [vmem:[#allocation5 + $0xc] ss:$16 sps:$4 sm:$0xff]  }
 0x1f4   :  { %1775 = vmatprep.subr.bf16.mxu0 %v7488_v61  ;;  %1818 = vmatprep.subr.bf16.mxu1 %v7489_v9  ;;  %7497 = vst [vmem:[#allocation11_spill] sm:$0xff] %v5747_v22 }
 0x1f7   :  { %1776 = vmatpush1.bf16.msra.mxu0 %v7490_v10  ;;  %1819 = vmatpush1.bf16.msra.mxu1 %v7491_v52  ;;  %v703_v52 = vld [vmem:[%s7011_s5] sm:$0xf] }
 0x1f8   :  { %1777 = vmatprep.subr.bf16.mxu0 %v7492_v27  ;;  %1820 = vmatprep.subr.bf16.mxu1 %v7493_v25  ;;  %v7498_v27 = vsub.s32 0, %v5609_v43 }
 0x1fa   :  { %v5755_v10 = vrot.slane %v703_v52, %v7498_v27 }
 0x1fb   :  { %1778 = vmatpush1.bf16.msra.mxu0 %v7494_v34  ;;  %1821 = vmatpush1.bf16.msra.mxu1 %v7495_v0  ;;  %v7500_v34 = vsub.s32 1, %v5609_v43 }
 0x1fc   :  { %1899 = vmatprep.subr.bf16.mxu0 %v5744_v23  ;;  %1942 = vmatprep.subr.bf16.mxu1 %v5747_v22  ;;  %7499 = vst [vmem:[#allocation12_spill] sm:$0xff] %v5755_v10 }
 0x1fd   :  { %v5759_v25 = vrot.slane %v703_v52, %v7500_v34  ;;  %v5766_v34 = vrot.slane %v703_v52, %v7501_v7 }
 0x1ff   :  { %7502 = vst [vmem:[#allocation13_spill] sm:$0xff] %v5766_v34 }
 0x271   :  { %v1465_v0 = vpop.f32.mrb[32].mxu0  ;;  %v1508_v9 = vpop.f32.mrb[32].mxu1 }
 0x272   :  { %v1538_v23 = vadd.f32 %v5755_v10, %v1465_v0  ;;  %v1467_v61 = vpop.f32.mrb[33].mxu0  ;;  %v1510_v32 = vpop.f32.mrb[33].mxu1 }
 0x273   :  { %v1539_v22 = vadd.f32 %v5759_v25, %v1467_v61  ;;  %v1469_v5 = vpop.f32.mrb[34].mxu0  ;;  %v1512_v31 = vpop.f32.mrb[34].mxu1  ;;  %v7503_v61 = vsub.s32 2, %v5609_v43 }
 0x274   :  { %v3922_v26 = vmul.f32 -1.442695, %v1538_v23  ;;  %v1542_v30 = vadd.f32 %v5755_v10, %v1469_v5  ;;  %v1471_v29 = vpop.f32.mrb[35].mxu0  ;;  %v1514_v27 = vpop.f32.mrb[35].mxu1  ;;  %v1541_v23 = vadd.f32 %v5766_v34, %v1510_v32 }
 0x275   :  { %v3924_v8 = vmul.f32 -1.442695, %v1539_v22  ;;  %v1543_v6 = vadd.f32 %v5759_v25, %v1471_v29  ;;  %v5771_v3 = vrot.slane %v703_v52, %v7503_v61  ;;  %v1545_v5 = vadd.f32 %v5766_v34, %v1514_v27 }
 0x276   :  { %4426 = vpow2.f32 %v3922_v26  ;;  %v3923_v0 = vmul.f32 -1.442695, %v1542_v30  ;;  %v3926_v7 = vmul.f32 -1.442695, %v1541_v23 }
 0x277   :  { %4428 = vpow2.f32 %v3924_v8  ;;  %v3925_v4 = vmul.f32 -1.442695, %v1543_v6  ;;  %7504 = vst [vmem:[#allocation14_spill] sm:$0xff] %v5771_v3  ;;  %v1540_v22 = vadd.f32 %v5771_v3, %v1508_v9  ;;  %v3927_v10 = vmul.f32 -1.442695, %v1545_v5 }
 0x278   :  { %4430 = vpow2.f32 %v3923_v0  ;;  %v1544_v6 = vadd.f32 %v5771_v3, %v1512_v31 }
 0x279   :  { %4432 = vpow2.f32 %v3925_v4 }
 0x27a   :  { %4434 = vtanh.f32 %v1540_v22 }
 0x27b   :  { %4436 = vpow2.f32 %v3926_v7 }
 0x27c   :  { %4438 = vpow2.f32 %v3927_v10 }
 0x280   :  { %v4427_v2 = vpop.eup %4426 }
 0x281   :  { %v4429_v29 = vpop.eup %4428  ;;  %v1552_v30 = vadd.f32 1.0, %v4427_v2 }
 0x282   :  { %v1564_v43 = vadd.f32 1.0, %v4429_v29  ;;  %v4431_v8 = vpop.eup %4430 }
 0x283   :  { %4440 = vrcp.f32 %v1552_v30  ;;  %v1553_v26 = vadd.f32 1.0, %v4431_v8  ;;  %v4433_v32 = vpop.eup %4432  ;;  %v7505_v8 = vld [vmem:[#allocation62_spill] sm:$0xff] }
 0x284   :  { %4442 = vrcp.f32 %v1564_v43  ;;  %v1565_v4 = vadd.f32 1.0, %v4433_v32  ;;  %v4435_v9 = vpop.eup %4434 }
 0x285   :  { %4444 = vtanh.f32 %v1544_v6  ;;  %v4437_v52 = vpop.eup %4436 }
 0x286   :  { %4446 = vrcp.f32 %v1553_v26  ;;  %v4439_v27 = vpop.eup %4438  ;;  %v1578_v31 = vadd.f32 1.0, %v4437_v52 }
 0x287   :  { %4448 = vrcp.f32 %v1565_v4  ;;  %v1579_v10 = vadd.f32 1.0, %v4439_v27 }
 0x288   :  { %4450 = vrcp.f32 %v1578_v31 }
 0x289   :  { %4452 = vrcp.f32 %v1579_v10 }
 0x28d   :  { %v4441_v0 = vpop.eup %4440 }
 0x28e   :  { %v4443_v61 = vpop.eup %4442  ;;  %v1586_v2 = vmul.f32 %v4441_v0, %v4435_v9 }
 0x28f   :  { %v4445_v23 = vpop.eup %4444  ;;  %v1584_v5 = vmul.f32 0.0, %v4443_v61 }
 0x290   :  { %v4447_v22 = vpop.eup %4446 }
 0x291   :  { %v5777_v7 = vadd.f32 %v1586_v2, %v1584_v5  ;;  %v1587_v29 = vmul.f32 %v4447_v22, %v4445_v23  ;;  %v1638_v30 = vpop.f32.mrb[4].mxu0  ;;  %v1681_v43 = vpop.f32.mrb[4].mxu1 }
 0x292   :  { %v4449_v6 = vpop.eup %4448  ;;  %v4054_v26 = vadd.f32 %v1638_v30, %v7505_v8  ;;  %v1640_v32 = vpop.f32.mrb[5].mxu0 }
 0x293   :  { %v1683_v4 = vpop.f32.mrb[5].mxu1  ;;  %v1585_v34 = vmul.f32 0.0, %v4449_v6  ;;  %v4055_v3 = vadd.f32 %v1640_v32, %v5622_v33  ;;  %v1642_v9 = vpop.f32.mrb[6].mxu0  ;;  %4454 = vtanh.f32 %v5777_v7 }
 0x294   :  { %v1685_v0 = vpop.f32.mrb[6].mxu1  ;;  %v3928_v52 = vmul.f32 -1.442695, %v4054_v26  ;;  %v4056_v27 = vadd.f32 %v1642_v9, %v7505_v8  ;;  %v1644_v61 = vpop.f32.mrb[7].mxu0  ;;  %v4087_v10 = vadd.f32 %v1683_v4, %v5631_v24  ;;  %v7506_v26 = vld [vmem:[#allocation64_spill] sm:$0xff] }
 0x295   :  { %v1687_v2 = vpop.f32.mrb[7].mxu1  ;;  %v5783_v23 = vadd.f32 %v1587_v29, %v1585_v34  ;;  %v3930_v5 = vmul.f32 -1.442695, %v4055_v3  ;;  %v4057_v22 = vadd.f32 %v1644_v61, %v5622_v33  ;;  %v4451_v6 = vpop.eup %4450  ;;  %v4086_v32 = vadd.f32 %v1681_v43, %v7506_v26 }
 0x296   :  { %4456 = vpow2.f32 %v3928_v52  ;;  %v3929_v31 = vmul.f32 -1.442695, %v4056_v27  ;;  %v4453_v9 = vpop.eup %4452  ;;  %v3932_v8 = vmul.f32 -1.442695, %v4087_v10  ;;  %v4089_v34 = vadd.f32 %v1687_v2, %v5631_v24 }
 0x297   :  { %4458 = vtanh.f32 %v5783_v23  ;;  %v3931_v30 = vmul.f32 -1.442695, %v4057_v22  ;;  %v4088_v52 = vadd.f32 %v1685_v0, %v7506_v26 }
 0x298   :  { %4460 = vpow2.f32 %v3930_v5  ;;  %v3933_v22 = vmul.f32 -1.442695, %v4089_v34 }
 0x299   :  { %4462 = vpow2.f32 %v3929_v31 }
 0x29a   :  { %4464 = vpow2.f32 %v3931_v30 }
 0x29b   :  { %4466 = vtanh.f32 %v4086_v32 }
 0x29c   :  { %4468 = vpow2.f32 %v3932_v8 }
 0x29d   :  { %v4455_v3 = vpop.eup %4454 }
 0x29e   :  { %v1592_v4 = vmul.f32 %v4455_v3, %v4451_v6 }
 0x2a0   :  { %v4457_v29 = vpop.eup %4456 }
 0x2a1   :  { %v4459_v27 = vpop.eup %4458  ;;  %v1704_v61 = vadd.f32 1.0, %v4457_v29 }
 0x2a2   :  { %v4461_v5 = vpop.eup %4460  ;;  %v1593_v31 = vmul.f32 %v4459_v27, %v4453_v9 }
 0x2a3   :  { %4470 = vrcp.f32 %v1704_v61  ;;  %v1716_v30 = vadd.f32 1.0, %v4461_v5  ;;  %v4463_v33 = vpop.eup %4462 }
 0x2a4   :  { %4472 = vtanh.f32 %v4088_v52  ;;  %v1594_v43 = vpack.c.bf16 %v1593_v31, %v1592_v4  ;;  %v1705_v10 = vadd.f32 1.0, %v4463_v33  ;;  %v4465_v2 = vpop.eup %4464 }
 0x2a5   :  { %4474 = vrcp.f32 %v1716_v30  ;;  %v1717_v0 = vadd.f32 1.0, %v4465_v2  ;;  %v4467_v32 = vpop.eup %4466 }
 0x2a6   :  { %4476 = vpow2.f32 %v3933_v22  ;;  %1779 = vmatprep.mubr.bf16.mxu0 %v1594_v43  ;;  %1822 = vmatprep.mubr.bf16.mxu1 %v1594_v43  ;;  %v4469_v29 = vpop.eup %4468 }
 0x2a7   :  { %4478 = vrcp.f32 %v1705_v10  ;;  %v1730_v61 = vadd.f32 1.0, %v4469_v29 }
 0x2a8   :  { %4480 = vrcp.f32 %v1717_v0 }
 0x2a9   :  { %4482 = vrcp.f32 %v1730_v61  ;;  %v5829_v61 = vld [vmem:[#allocation5 + $0x40] ss:$16 sps:$4 sm:$0xff]  }
 0x2ad   :  { %v4471_v8 = vpop.eup %4470 }
 0x2ae   :  { %v4473_v34 = vpop.eup %4472  ;;  %v1738_v6 = vmul.f32 %v4471_v8, %v4467_v32  ;;  %v5806_v8 = vld [vmem:[#allocation5 + $0x8] ss:$16 sps:$4 sm:$0xff]  }
 0x2af   :  { %v4475_v9 = vpop.eup %4474 }
 0x2b0   :  { %v4477_v3 = vpop.eup %4476  ;;  %v1736_v27 = vmul.f32 %v4475_v9, %v5642_v11  ;;  %v5817_v9 = vld [vmem:[#allocation5 + $0x20] ss:$16 sps:$4 sm:$0xff]  }
 0x2b1   :  { %v4479_v52 = vpop.eup %4478  ;;  %v1731_v4 = vadd.f32 1.0, %v4477_v3  ;;  %v5820_v3 = vld [vmem:[#allocation5 + $0x28] ss:$16 sps:$4 sm:$0xff]  }
 0x2b2   :  { %v5792_v5 = vadd.f32 %v1738_v6, %v1736_v27  ;;  %v1739_v33 = vmul.f32 %v4479_v52, %v4473_v34  ;;  %v4481_v22 = vpop.eup %4480  ;;  %v5809_v34 = vld [vmem:[#allocation5 + $0x24] ss:$16 sps:$4 sm:$0xff]   ;;  %v5812_v6 = vld [vmem:[#allocation5 + $0x2c] ss:$16 sps:$4 sm:$0xff]  }
 0x2b3   :  { %v1737_v31 = vmul.f32 %v4481_v22, %v5645_v28  ;;  %v4483_v43 = vpop.eup %4482  ;;  %v5803_v28 = vld [vmem:[#allocation5] ss:$16 sps:$4 sm:$0xff]   ;;  %v5823_v27 = vld [vmem:[#allocation5 + $0x44] ss:$16 sps:$4 sm:$0xff]   ;;  %v5826_v52 = vld [vmem:[#allocation5 + $0x4c] ss:$16 sps:$4 sm:$0xff]  }
 0x2b4   :  { %4484 = vtanh.f32 %v5792_v5  ;;  %v5835_v22 = vld [vmem:[#allocation5 + $0x64] ss:$16 sps:$4 sm:$0xff]  }
 0x2b5   :  { %v5796_v30 = vadd.f32 %v1739_v33, %v1737_v31  ;;  %4486 = vrcp.f32 %v1731_v4  ;;  %v5832_v33 = vld [vmem:[#allocation5 + $0x48] ss:$16 sps:$4 sm:$0xff]   ;;  %v5838_v4 = vld [vmem:[#allocation5 + $0x6c] ss:$16 sps:$4 sm:$0xff]   ;;  %v5841_v31 = vld [vmem:[#allocation5 + $0x60] ss:$16 sps:$4 sm:$0xff]  }
 0x2b7   :  { %4488 = vtanh.f32 %v5796_v30 }
 0x2be   :  { %v4485_v10 = vpop.eup %4484 }
 0x2bf   :  { %v4487_v11 = vpop.eup %4486  ;;  %v1744_v0 = vmul.f32 %v4485_v10, %v4483_v43  ;;  %v5844_v43 = vld [vmem:[#allocation5 + $0x68] ss:$16 sps:$4 sm:$0xff]   ;;  %v5847_v10 = vld [vmem:[#allocation5 + $0x84] ss:$16 sps:$4 sm:$0xff]  }
 0x2c0   :  { %7507 = vst [vmem:[#allocation15_spill] sm:$0xff] %v5844_v43  ;;  %7508 = vst [vmem:[#allocation16_spill] sm:$0xff] %v5847_v10 }
 0x2c1   :  { %v4489_v2 = vpop.eup %4488 }
 0x2c2   :  { %v1745_v32 = vmul.f32 %v4489_v2, %v4487_v11  ;;  %v5850_v11 = vld [vmem:[#allocation5 + $0x8c] ss:$16 sps:$4 sm:$0xff]   ;;  %v5853_v2 = vld [vmem:[#allocation5 + $0x80] ss:$16 sps:$4 sm:$0xff]  }
 0x2c3   :  { %7509 = vst [vmem:[#allocation17_spill] sm:$0xff] %v5850_v11  ;;  %7510 = vst [vmem:[#allocation18_spill] sm:$0xff] %v5853_v2 }
 0x2c4   :  { %v5799_v29 = vpack.c.bf16 %v1745_v32, %v1744_v0  ;;  %v5856_v0 = vld [vmem:[#allocation5 + $0x88] ss:$16 sps:$4 sm:$0xff]   ;;  %v5859_v32 = vld [vmem:[#allocation5 + $0xa4] ss:$16 sps:$4 sm:$0xff]  }
 0x2c5   :  { %7511 = vst [vmem:[#allocation19_spill] sm:$0xff] %v5856_v0  ;;  %7512 = vst [vmem:[#allocation20_spill] sm:$0xff] %v5859_v32 }
 0x2c6   :  { %1780 = vmatmul.mubr.bf16.vlgmr.msra.gmra.mrb[36].mxu0 %v5799_v29  ;;  %1823 = vmatmul.mubr.bf16.vlgmr.msra.gmra.mrb[36].mxu1 %v5799_v29 }
 0x2c7   :  { %1900 = vmatpush1.bf16.msra.mxu0 %v5803_v28  ;;  %1943 = vmatpush1.bf16.msra.mxu1 %v5806_v8 }
 0x2c8   :  { %1901 = vmatprep.subr.bf16.mxu0 %v5809_v34  ;;  %1944 = vmatprep.subr.bf16.mxu1 %v5812_v6 }
 0x2c9   :  { %1931 = vmatprep.mubr.bf16.mxu0 %v7443_v35  ;;  %1974 = vmatprep.mubr.bf16.mxu1 %v7443_v35 }
 0x2cb   :  { %1902 = vmatpush1.bf16.msra.mxu0 %v5817_v9  ;;  %1945 = vmatpush1.bf16.msra.mxu1 %v5820_v3 }
 0x2cc   :  { %1903 = vmatprep.subr.bf16.mxu0 %v5823_v27  ;;  %1946 = vmatprep.subr.bf16.mxu1 %v5826_v52 }
 0x2cf   :  { %1904 = vmatpush1.bf16.msra.mxu0 %v5829_v61  ;;  %1947 = vmatpush1.bf16.msra.mxu1 %v5832_v33 }
 0x2d0   :  { %1905 = vmatprep.subr.bf16.mxu0 %v5835_v22  ;;  %1948 = vmatprep.subr.bf16.mxu1 %v5838_v4 }
 0x2d3   :  { %1906 = vmatpush1.bf16.msra.mxu0 %v5841_v31  ;;  %1949 = vmatpush1.bf16.msra.mxu1 %v5844_v43  ;;  %v5862_v43 = vld [vmem:[#allocation5 + $0xac] ss:$16 sps:$4 sm:$0xff]  }
 0x2d4   :  { %1907 = vmatprep.subr.bf16.mxu0 %v5847_v10  ;;  %1950 = vmatprep.subr.bf16.mxu1 %v5850_v11  ;;  %7513 = vst [vmem:[#allocation21_spill] sm:$0xff] %v5862_v43  ;;  %v5865_v10 = vld [vmem:[#allocation5 + $0xa0] ss:$16 sps:$4 sm:$0xff]   ;;  %v5868_v11 = vld [vmem:[#allocation5 + $0xa8] ss:$16 sps:$4 sm:$0xff]  }
 0x2d5   :  { %7514 = vst [vmem:[#allocation22_spill] sm:$0xff] %v5865_v10  ;;  %7515 = vst [vmem:[#allocation23_spill] sm:$0xff] %v5868_v11 }
 0x2d7   :  { %1908 = vmatpush1.bf16.msra.mxu0 %v5853_v2  ;;  %1951 = vmatpush1.bf16.msra.mxu1 %v5856_v0  ;;  %v5871_v2 = vld [vmem:[#allocation5 + $0xc4] ss:$16 sps:$4 sm:$0xff]   ;;  %v5874_v0 = vld [vmem:[#allocation5 + $0xcc] ss:$16 sps:$4 sm:$0xff]  }
 0x2d8   :  { %1909 = vmatprep.subr.bf16.mxu0 %v5859_v32  ;;  %1952 = vmatprep.subr.bf16.mxu1 %v5862_v43  ;;  %7516 = vst [vmem:[#allocation24_spill] sm:$0xff] %v5871_v2  ;;  %7517 = vst [vmem:[#allocation25_spill] sm:$0xff] %v5874_v0  ;;  %v5877_v32 = vld [vmem:[#allocation5 + $0xc0] ss:$16 sps:$4 sm:$0xff]   ;;  %v5880_v43 = vld [vmem:[#allocation5 + $0xc8] ss:$16 sps:$4 sm:$0xff]  }
 0x2d9   :  { %7518 = vst [vmem:[#allocation26_spill] sm:$0xff] %v5877_v32  ;;  %7519 = vst [vmem:[#allocation27_spill] sm:$0xff] %v5880_v43 }
 0x2db   :  { %1910 = vmatpush1.bf16.msra.mxu0 %v5865_v10  ;;  %1953 = vmatpush1.bf16.msra.mxu1 %v5868_v11  ;;  %v5883_v10 = vld [vmem:[#allocation5 + $0xe4] ss:$16 sps:$4 sm:$0xff]   ;;  %v5886_v11 = vld [vmem:[#allocation5 + $0xec] ss:$16 sps:$4 sm:$0xff]  }
 0x2dc   :  { %1911 = vmatprep.subr.bf16.mxu0 %v5871_v2  ;;  %1954 = vmatprep.subr.bf16.mxu1 %v5874_v0  ;;  %v5889_v2 = vld [vmem:[#allocation5 + $0xe0] ss:$16 sps:$4 sm:$0xff]   ;;  %v5892_v0 = vld [vmem:[#allocation5 + $0xe8] ss:$16 sps:$4 sm:$0xff]  }
 0x2df   :  { %1912 = vmatpush1.bf16.msra.mxu0 %v5877_v32  ;;  %1955 = vmatpush1.bf16.msra.mxu1 %v5880_v43  ;;  %v5895_v32 = vld [vmem:[#allocation7 + $0x4] ss:$16 sps:$4 sm:$0xff]   ;;  %v5898_v43 = vld [vmem:[#allocation7 + $0xc] ss:$16 sps:$4 sm:$0xff]  }
 0x2e0   :  { %1913 = vmatprep.subr.bf16.mxu0 %v5883_v10  ;;  %1956 = vmatprep.subr.bf16.mxu1 %v5886_v11 }
 0x2e3   :  { %1914 = vmatpush1.bf16.msra.mxu0 %v5889_v2  ;;  %1957 = vmatpush1.bf16.msra.mxu1 %v5892_v0 }
 0x2e4   :  { %2042 = vmatprep.subr.bf16.mxu0 %v5895_v32  ;;  %2085 = vmatprep.subr.bf16.mxu1 %v5898_v43 }
 0x2e6   :  { %1932 = vmatmul.mubr.bf16.vlgmr.msra.gmra.mrb[8].mxu0 %v5799_v29  ;;  %1975 = vmatmul.mubr.bf16.vlgmr.msra.gmra.mrb[8].mxu1 %v5799_v29 }
 0x2e7   :  { %2043 = vmatpush1.bf16.msra.mxu0 %v5417_v12  ;;  %2086 = vmatpush1.bf16.msra.mxu1 %v5419_v13  ;;  %v7520_v12 = vld [vmem:[#allocation36_spill] sm:$0xff]  ;;  %v7521_v13 = vld [vmem:[#allocation37_spill] sm:$0xff] }
 0x2e8   :  { %2044 = vmatprep.subr.bf16.mxu0 %v5421_v14  ;;  %2087 = vmatprep.subr.bf16.mxu1 %v5423_v15  ;;  %v7522_v14 = vld [vmem:[#allocation38_spill] sm:$0xff]  ;;  %v7523_v15 = vld [vmem:[#allocation39_spill] sm:$0xff] }
 0x2eb   :  { %2045 = vmatpush1.bf16.msra.mxu0 %v5429_v16  ;;  %2088 = vmatpush1.bf16.msra.mxu1 %v5431_v17  ;;  %v7524_v16 = vld [vmem:[#allocation40_spill] sm:$0xff]  ;;  %v7525_v17 = vld [vmem:[#allocation41_spill] sm:$0xff] }
 0x2ec   :  { %2046 = vmatprep.subr.bf16.mxu0 %v5435_v18  ;;  %2089 = vmatprep.subr.bf16.mxu1 %v5437_v19  ;;  %v7526_v18 = vld [vmem:[#allocation42_spill] sm:$0xff]  ;;  %v7527_v19 = vld [vmem:[#allocation43_spill] sm:$0xff] }
 0x2ef   :  { %2047 = vmatpush1.bf16.msra.mxu0 %v5443_v20  ;;  %2090 = vmatpush1.bf16.msra.mxu1 %v5445_v21  ;;  %v7528_v20 = vld [vmem:[#allocation44_spill] sm:$0xff]  ;;  %v7529_v21 = vld [vmem:[#allocation45_spill] sm:$0xff] }
 0x2f0   :  { %2048 = vmatprep.subr.bf16.mxu0 %v7444_v36  ;;  %2091 = vmatprep.subr.bf16.mxu1 %v7445_v37  ;;  %v7530_v36 = vld [vmem:[#allocation46_spill] sm:$0xff]  ;;  %v7531_v37 = vld [vmem:[#allocation47_spill] sm:$0xff] }
 0x2f3   :  { %2049 = vmatpush1.bf16.msra.mxu0 %v7446_v38  ;;  %2092 = vmatpush1.bf16.msra.mxu1 %v7447_v39  ;;  %v7532_v38 = vld [vmem:[#allocation48_spill] sm:$0xff]  ;;  %v7533_v39 = vld [vmem:[#allocation49_spill] sm:$0xff] }
 0x2f4   :  { %2050 = vmatprep.subr.bf16.mxu0 %v7448_v40  ;;  %2093 = vmatprep.subr.bf16.mxu1 %v7449_v41  ;;  %v7534_v40 = vld [vmem:[#allocation50_spill] sm:$0xff]  ;;  %v7535_v41 = vld [vmem:[#allocation51_spill] sm:$0xff] }
 0x2f7   :  { %2051 = vmatpush1.bf16.msra.mxu0 %v7450_v42  ;;  %2094 = vmatpush1.bf16.msra.mxu1 %v7451_v44  ;;  %v7536_v42 = vld [vmem:[#allocation52_spill] sm:$0xff]  ;;  %v7537_v44 = vld [vmem:[#allocation53_spill] sm:$0xff] }
 0x2f8   :  { %2052 = vmatprep.subr.bf16.mxu0 %v7452_v45  ;;  %2095 = vmatprep.subr.bf16.mxu1 %v7453_v46  ;;  %v7538_v45 = vld [vmem:[#allocation54_spill] sm:$0xff]  ;;  %v7539_v46 = vld [vmem:[#allocation55_spill] sm:$0xff] }
 0x2fb   :  { %2053 = vmatpush1.bf16.msra.mxu0 %v7454_v47  ;;  %2096 = vmatpush1.bf16.msra.mxu1 %v7455_v48  ;;  %v7540_v47 = vld [vmem:[#allocation56_spill] sm:$0xff]  ;;  %v7541_v48 = vld [vmem:[#allocation57_spill] sm:$0xff] }
 0x2fc   :  { %2054 = vmatprep.subr.bf16.mxu0 %v7456_v49  ;;  %2097 = vmatprep.subr.bf16.mxu1 %v7457_v50  ;;  %v7542_v49 = vld [vmem:[#allocation58_spill] sm:$0xff]  ;;  %v7543_v50 = vld [vmem:[#allocation59_spill] sm:$0xff] }
 0x2ff   :  { %2055 = vmatpush1.bf16.msra.mxu0 %v7458_v51  ;;  %2098 = vmatpush1.bf16.msra.mxu1 %v7459_v53  ;;  %v7544_v51 = vld [vmem:[#allocation60_spill] sm:$0xff]  ;;  %v7545_v53 = vld [vmem:[#allocation61_spill] sm:$0xff] }
 0x300   :  { %2056 = vmatprep.subr.bf16.mxu0 %v7460_v54  ;;  %2099 = vmatprep.subr.bf16.mxu1 %v7461_v55  ;;  %v7546_v54 = vld [vmem:[#allocation10_spill] sm:$0xff]  ;;  %v7547_v55 = vld [vmem:[#allocation11_spill] sm:$0xff] }
 0x303   :  { %2057 = vmatpush1.bf16.msra.mxu0 %v7462_v56  ;;  %2100 = vmatpush1.bf16.msra.mxu1 %v7463_v57 }
 0x304   :  { %2058 = vmatprep.subr.bf16.mxu0 %v7464_v58  ;;  %2101 = vmatprep.subr.bf16.mxu1 %v7465_v59  ;;  %v7548_v58 = vld [vmem:[#allocation12_spill] sm:$0xff] }
 0x307   :  { %2059 = vmatpush1.bf16.msra.mxu0 %v7466_v60  ;;  %2102 = vmatpush1.bf16.msra.mxu1 %v7467_v62 }
 0x308   :  { %2060 = vmatprep.subr.bf16.mxu0 %v7468_v63  ;;  %2103 = vmatprep.subr.bf16.mxu1 %v7469_v1 }
 0x30b   :  { %2061 = vmatpush1.bf16.msra.mxu0 %v7520_v12  ;;  %2104 = vmatpush1.bf16.msra.mxu1 %v7521_v13 }
 0x30c   :  { %2062 = vmatprep.subr.bf16.mxu0 %v7522_v14  ;;  %2105 = vmatprep.subr.bf16.mxu1 %v7523_v15 }
 0x30f   :  { %2063 = vmatpush1.bf16.msra.mxu0 %v7524_v16  ;;  %2106 = vmatpush1.bf16.msra.mxu1 %v7525_v17 }
 0x310   :  { %2064 = vmatprep.subr.bf16.mxu0 %v7526_v18  ;;  %2107 = vmatprep.subr.bf16.mxu1 %v7527_v19 }
 0x313   :  { %2065 = vmatpush1.bf16.msra.mxu0 %v7528_v20  ;;  %2108 = vmatpush1.bf16.msra.mxu1 %v7529_v21  ;;  %v7549_v20 = vld [vmem:[#allocation14_spill] sm:$0xff] }
 0x314   :  { %2066 = vmatprep.subr.bf16.mxu0 %v7530_v36  ;;  %2109 = vmatprep.subr.bf16.mxu1 %v7531_v37  ;;  %v7550_v36 = vld [vmem:[#allocation13_spill] sm:$0xff] }
 0x317   :  { %2067 = vmatpush1.bf16.msra.mxu0 %v7532_v38  ;;  %2110 = vmatpush1.bf16.msra.mxu1 %v7533_v39 }
 0x318   :  { %2068 = vmatprep.subr.bf16.mxu0 %v7534_v40  ;;  %2111 = vmatprep.subr.bf16.mxu1 %v7535_v41 }
 0x31b   :  { %2069 = vmatpush1.bf16.msra.mxu0 %v7536_v42  ;;  %2112 = vmatpush1.bf16.msra.mxu1 %v7537_v44 }
 0x31c   :  { %2070 = vmatprep.subr.bf16.mxu0 %v7538_v45  ;;  %2113 = vmatprep.subr.bf16.mxu1 %v7539_v46 }
 0x31f   :  { %2071 = vmatpush1.bf16.msra.mxu0 %v7540_v47  ;;  %2114 = vmatpush1.bf16.msra.mxu1 %v7541_v48 }
 0x320   :  { %2072 = vmatprep.subr.bf16.mxu0 %v7542_v49  ;;  %2115 = vmatprep.subr.bf16.mxu1 %v7543_v50 }
 0x323   :  { %2073 = vmatpush1.bf16.msra.mxu0 %v7544_v51  ;;  %2116 = vmatpush1.bf16.msra.mxu1 %v7545_v53 }
 0x324   :  { %2194 = vmatprep.subr.bf16.mxu0 %v7546_v54  ;;  %2237 = vmatprep.subr.bf16.mxu1 %v7547_v55 }
 0x399   :  { %v1781_v56 = vpop.f32.mrb[36].mxu0  ;;  %v1824_v57 = vpop.f32.mrb[36].mxu1 }
 0x39a   :  { %v1833_v59 = vadd.f32 %v1781_v56, %v7548_v58  ;;  %v1783_v60 = vpop.f32.mrb[37].mxu0  ;;  %v1826_v62 = vpop.f32.mrb[37].mxu1  ;;  %v1835_v21 = vadd.f32 %v1824_v57, %v7549_v20 }
 0x39b   :  { %v1834_v63 = vadd.f32 %v1783_v60, %v5759_v25  ;;  %v1785_v1 = vpop.f32.mrb[38].mxu0  ;;  %v1828_v29 = vpop.f32.mrb[38].mxu1  ;;  %v1836_v37 = vadd.f32 %v1826_v62, %v7550_v36 }
 0x39c   :  { %v3934_v12 = vmul.f32 -1.442695, %v1833_v59  ;;  %v1837_v13 = vadd.f32 %v1785_v1, %v7548_v58  ;;  %v1787_v14 = vpop.f32.mrb[39].mxu0  ;;  %v1830_v15 = vpop.f32.mrb[39].mxu1  ;;  %v1839_v41 = vadd.f32 %v1828_v29, %v7549_v20 }
 0x39d   :  { %v3936_v16 = vmul.f32 -1.442695, %v1834_v63  ;;  %v1838_v17 = vadd.f32 %v1787_v14, %v5759_v25  ;;  %v3938_v45 = vmul.f32 -1.442695, %v1836_v37  ;;  %v1840_v46 = vadd.f32 %v1830_v15, %v7550_v36  ;;  %v7551_v15 = vld [vmem:[#allocation62_spill] sm:$0xff] }
 0x39e   :  { %4490 = vpow2.f32 %v3934_v12  ;;  %v3935_v18 = vmul.f32 -1.442695, %v1837_v13 }
 0x39f   :  { %4492 = vpow2.f32 %v3936_v16  ;;  %v3937_v19 = vmul.f32 -1.442695, %v1838_v17  ;;  %v3939_v50 = vmul.f32 -1.442695, %v1840_v46 }
 0x3a0   :  { %4494 = vpow2.f32 %v3935_v18 }
 0x3a1   :  { %4496 = vpow2.f32 %v3937_v19 }
 0x3a2   :  { %4498 = vtanh.f32 %v1835_v21  ;;  %v7552_v21 = vld [vmem:[#allocation63_spill] sm:$0xff] }
 0x3a8   :  { %v4491_v38 = vpop.eup %4490 }
 0x3a9   :  { %v4493_v39 = vpop.eup %4492  ;;  %v1847_v40 = vadd.f32 1.0, %v4491_v38 }
 0x3aa   :  { %v1859_v42 = vadd.f32 1.0, %v4493_v39  ;;  %v4495_v44 = vpop.eup %4494 }
 0x3ab   :  { %4500 = vrcp.f32 %v1847_v40  ;;  %v1848_v47 = vadd.f32 1.0, %v4495_v44  ;;  %v4497_v48 = vpop.eup %4496 }
 0x3ac   :  { %4502 = vrcp.f32 %v1859_v42  ;;  %v1860_v49 = vadd.f32 1.0, %v4497_v48  ;;  %v4499_v51 = vpop.eup %4498 }
 0x3ad   :  { %4504 = vtanh.f32 %v1839_v41 }
 0x3ae   :  { %4506 = vrcp.f32 %v1848_v47 }
 0x3af   :  { %4508 = vpow2.f32 %v3938_v45 }
 0x3b0   :  { %4510 = vrcp.f32 %v1860_v49 }
 0x3b1   :  { %4512 = vpow2.f32 %v3939_v50 }
 0x3b5   :  { %v4501_v53 = vpop.eup %4500 }
 0x3b6   :  { %v4503_v56 = vpop.eup %4502  ;;  %v1881_v57 = vmul.f32 %v4501_v53, %v4499_v51 }
 0x3b7   :  { %v4505_v59 = vpop.eup %4504  ;;  %v1879_v60 = vmul.f32 %v4503_v56, %v5777_v7 }
 0x3b8   :  { %v4507_v62 = vpop.eup %4506 }
 0x3b9   :  { %v4509_v63 = vpop.eup %4508  ;;  %v5976_v1 = vadd.f32 %v1881_v57, %v1879_v60  ;;  %v1882_v29 = vmul.f32 %v4507_v62, %v4505_v59  ;;  %v1933_v12 = vpop.f32.mrb[8].mxu0 }
 0x3ba   :  { %v1976_v13 = vpop.f32.mrb[8].mxu1  ;;  %v4511_v14 = vpop.eup %4510  ;;  %v4058_v16 = vadd.f32 %v1933_v12, %v7551_v15  ;;  %v1873_v40 = vadd.f32 1.0, %v4509_v63 }
 0x3bb   :  { %v1935_v17 = vpop.f32.mrb[9].mxu0  ;;  %v1978_v18 = vpop.f32.mrb[9].mxu1  ;;  %v1880_v19 = vmul.f32 %v4511_v14, %v5783_v23  ;;  %v4090_v53 = vadd.f32 %v1976_v13, %v7506_v26 }
 0x3bc   :  { %v4059_v37 = vadd.f32 %v1935_v17, %v7552_v21  ;;  %v1937_v38 = vpop.f32.mrb[10].mxu0  ;;  %v1980_v39 = vpop.f32.mrb[10].mxu1  ;;  %v3940_v7 = vmul.f32 -1.442695, %v4058_v16  ;;  %v4091_v51 = vadd.f32 %v1978_v18, %v5631_v24 }
 0x3bd   :  { %v4060_v41 = vadd.f32 %v1937_v38, %v7551_v15  ;;  %v1939_v42 = vpop.f32.mrb[11].mxu0  ;;  %v1982_v44 = vpop.f32.mrb[11].mxu1  ;;  %v5982_v46 = vadd.f32 %v1882_v29, %v1880_v19  ;;  %v4092_v59 = vadd.f32 %v1980_v39, %v7506_v26 }
 0x3be   :  { %v4513_v45 = vpop.eup %4512  ;;  %v3942_v47 = vmul.f32 -1.442695, %v4059_v37  ;;  %v4061_v48 = vadd.f32 %v1939_v42, %v7552_v21  ;;  %4514 = vpow2.f32 %v3940_v7  ;;  %v3944_v56 = vmul.f32 -1.442695, %v4091_v51 }
 0x3bf   :  { %v3941_v49 = vmul.f32 -1.442695, %v4060_v41  ;;  %v1874_v50 = vadd.f32 1.0, %v4513_v45  ;;  %v4093_v57 = vadd.f32 %v1982_v44, %v5631_v24 }
 0x3c0   :  { %4516 = vpow2.f32 %v3942_v47  ;;  %v3943_v23 = vmul.f32 -1.442695, %v4061_v48 }
 0x3c1   :  { %4518 = vrcp.f32 %v1873_v40  ;;  %v3945_v29 = vmul.f32 -1.442695, %v4093_v57 }
 0x3c2   :  { %4520 = vpow2.f32 %v3941_v49 }
 0x3c3   :  { %4522 = vtanh.f32 %v5976_v1 }
 0x3c4   :  { %4524 = vpow2.f32 %v3943_v23 }
 0x3c5   :  { %4526 = vrcp.f32 %v1874_v50 }
 0x3c6   :  { %4528 = vtanh.f32 %v5982_v46 }
 0x3c7   :  { %4530 = vtanh.f32 %v4090_v53 }
 0x3c8   :  { %v4515_v60 = vpop.eup %4514  ;;  %4532 = vpow2.f32 %v3944_v56 }
 0x3c9   :  { %v1999_v63 = vadd.f32 1.0, %v4515_v60  ;;  %4534 = vtanh.f32 %v4092_v59 }
 0x3ca   :  { %v4517_v62 = vpop.eup %4516 }
 0x3cb   :  { %v4519_v12 = vpop.eup %4518  ;;  %v2011_v14 = vadd.f32 1.0, %v4517_v62  ;;  %4536 = vrcp.f32 %v1999_v63 }
 0x3cc   :  { %v4521_v16 = vpop.eup %4520 }
 0x3cd   :  { %v4523_v17 = vpop.eup %4522  ;;  %4538 = vrcp.f32 %v2011_v14  ;;  %v2000_v13 = vadd.f32 1.0, %v4521_v16 }
 0x3ce   :  { %v4525_v18 = vpop.eup %4524  ;;  %4540 = vpow2.f32 %v3945_v29  ;;  %v1887_v39 = vmul.f32 %v4523_v17, %v4519_v12 }
 0x3cf   :  { %v4527_v19 = vpop.eup %4526  ;;  %4542 = vrcp.f32 %v2000_v13  ;;  %v2012_v37 = vadd.f32 1.0, %v4525_v18  ;;  %v7554_v13 = vld [vmem:[#allocation16_spill] sm:$0xff]  ;;  %v7555_v18 = vld [vmem:[#allocation17_spill] sm:$0xff] }
 0x3d0   :  { %v4529_v38 = vpop.eup %4528 }
 0x3d1   :  { %4544 = vrcp.f32 %v2012_v37  ;;  %v1888_v40 = vmul.f32 %v4529_v38, %v4527_v19  ;;  %v4531_v7 = vpop.eup %4530  ;;  %v7556_v19 = vld [vmem:[#allocation18_spill] sm:$0xff]  ;;  %v7557_v37 = vld [vmem:[#allocation19_spill] sm:$0xff]  ;;  %v7558_v38 = vld [vmem:[#allocation20_spill] sm:$0xff] }
 0x3d2   :  { %v4533_v42 = vpop.eup %4532 }
 0x3d3   :  { %v1889_v41 = vpack.c.bf16 %v1888_v40, %v1887_v39  ;;  %v4535_v44 = vpop.eup %4534  ;;  %v2025_v51 = vadd.f32 1.0, %v4533_v42  ;;  %v7559_v39 = vld [vmem:[#allocation21_spill] sm:$0xff]  ;;  %v7560_v40 = vld [vmem:[#allocation22_spill] sm:$0xff] }
 0x3d4   :  { %v7563_v42 = vld [vmem:[#allocation25_spill] sm:$0xff] }
 0x3d5   :  { %2074 = vmatprep.mubr.bf16.mxu0 %v1889_v41  ;;  %2117 = vmatprep.mubr.bf16.mxu1 %v1889_v41  ;;  %v4537_v45 = vpop.eup %4536  ;;  %4546 = vrcp.f32 %v2025_v51  ;;  %v7562_v41 = vld [vmem:[#allocation24_spill] sm:$0xff]  ;;  %v6048_v51 = vld [vmem:[#allocation7 + $0x28] ss:$16 sps:$4 sm:$0xff]  }
 0x3d6   :  { %v2033_v48 = vmul.f32 %v4537_v45, %v4531_v7  ;;  %v7561_v7 = vld [vmem:[#allocation23_spill] sm:$0xff]  ;;  %7570 = vst [vmem:[#allocation32_spill] sm:$0xff] %v6048_v51 }
 0x3d7   :  { %v4539_v47 = vpop.eup %4538  ;;  %v7565_v45 = vld [vmem:[#allocation27_spill] sm:$0xff] }
 0x3d8   :  { %v4541_v49 = vpop.eup %4540  ;;  %v2031_v23 = vmul.f32 %v4539_v47, %v5792_v5  ;;  %v6033_v47 = vld [vmem:[#allocation7] ss:$16 sps:$4 sm:$0xff]  }
 0x3d9   :  { %v4543_v50 = vpop.eup %4542  ;;  %v2026_v59 = vadd.f32 1.0, %v4541_v49  ;;  %v6039_v49 = vld [vmem:[#allocation7 + $0x24] ss:$16 sps:$4 sm:$0xff]  }
 0x3da   :  { %v5992_v53 = vadd.f32 %v2033_v48, %v2031_v23  ;;  %v2034_v56 = vmul.f32 %v4543_v50, %v4535_v44  ;;  %v7564_v44 = vld [vmem:[#allocation26_spill] sm:$0xff]  ;;  %v6036_v48 = vld [vmem:[#allocation7 + $0x8] ss:$16 sps:$4 sm:$0xff]   ;;  %7567 = vst [vmem:[#allocation29_spill] sm:$0xff] %v6039_v49  ;;  %v6042_v23 = vld [vmem:[#allocation7 + $0x2c] ss:$16 sps:$4 sm:$0xff]  }
 0x3db   :  { %v4545_v57 = vpop.eup %4544  ;;  %7566 = vst [vmem:[#allocation28_spill] sm:$0xff] %v6036_v48  ;;  %7568 = vst [vmem:[#allocation30_spill] sm:$0xff] %v6042_v23  ;;  %v6045_v50 = vld [vmem:[#allocation7 + $0x20] ss:$16 sps:$4 sm:$0xff]  }
 0x3dc   :  { %v2032_v60 = vmul.f32 %v4545_v57, %v5796_v30  ;;  %4548 = vtanh.f32 %v5992_v53  ;;  %v7553_v30 = vld [vmem:[#allocation15_spill] sm:$0xff]  ;;  %7569 = vst [vmem:[#allocation31_spill] sm:$0xff] %v6045_v50 }
 0x3dd   :  { %4550 = vrcp.f32 %v2026_v59  ;;  %v6054_v57 = vld [vmem:[#allocation7 + $0x4c] ss:$16 sps:$4 sm:$0xff]   ;;  %v6057_v59 = vld [vmem:[#allocation7 + $0x40] ss:$16 sps:$4 sm:$0xff]  }
 0x3de   :  { %v5996_v62 = vadd.f32 %v2034_v56, %v2032_v60  ;;  %v6051_v56 = vld [vmem:[#allocation7 + $0x44] ss:$16 sps:$4 sm:$0xff]   ;;  %7572 = vst [vmem:[#allocation34_spill] sm:$0xff] %v6054_v57  ;;  %7573 = vst [vmem:[#allocation35_spill] sm:$0xff] %v6057_v59  ;;  %v6060_v60 = vld [vmem:[#allocation7 + $0x48] ss:$16 sps:$4 sm:$0xff]  }
 0x3df   :  { %v4547_v63 = vpop.eup %4546  ;;  %7571 = vst [vmem:[#allocation33_spill] sm:$0xff] %v6051_v56  ;;  %7574 = vst [vmem:[#allocation64_spill] sm:$0xff] %v6060_v60 }
 0x3e0   :  { %4552 = vtanh.f32 %v5996_v62 }
 0x3e6   :  { %v4549_v29 = vpop.eup %4548 }
 0x3e7   :  { %v4551_v5 = vpop.eup %4550  ;;  %v2039_v14 = vmul.f32 %v4549_v29, %v4547_v63  ;;  %v6063_v63 = vld [vmem:[#allocation7 + $0x64] ss:$16 sps:$4 sm:$0xff]   ;;  %v6066_v29 = vld [vmem:[#allocation7 + $0x6c] ss:$16 sps:$4 sm:$0xff]  }
 0x3e8   :  { %7575 = vst [vmem:[#allocation36_spill] sm:$0xff] %v6063_v63  ;;  %7576 = vst [vmem:[#allocation37_spill] sm:$0xff] %v6066_v29 }
 0x3ea   :  { %v4553_v12 = vpop.eup %4552 }
 0x3eb   :  { %v2040_v16 = vmul.f32 %v4553_v12, %v4551_v5  ;;  %v6069_v5 = vld [vmem:[#allocation7 + $0x60] ss:$16 sps:$4 sm:$0xff]   ;;  %v6072_v12 = vld [vmem:[#allocation7 + $0x68] ss:$16 sps:$4 sm:$0xff]  }
 0x3ec   :  { %7577 = vst [vmem:[#allocation38_spill] sm:$0xff] %v6069_v5  ;;  %7578 = vst [vmem:[#allocation39_spill] sm:$0xff] %v6072_v12 }
 0x3ed   :  { %v2041_v17 = vpack.c.bf16 %v2040_v16, %v2039_v14  ;;  %v6075_v14 = vld [vmem:[#allocation7 + $0x84] ss:$16 sps:$4 sm:$0xff]   ;;  %v6078_v16 = vld [vmem:[#allocation7 + $0x8c] ss:$16 sps:$4 sm:$0xff]  }
 0x3ee   :  { %7579 = vst [vmem:[#allocation40_spill] sm:$0xff] %v6075_v14  ;;  %7580 = vst [vmem:[#allocation41_spill] sm:$0xff] %v6078_v16 }
 0x3ef   :  { %2075 = vmatmul.mubr.bf16.vlgmr.msra.gmra.mrb[40].mxu0 %v2041_v17  ;;  %2118 = vmatmul.mubr.bf16.vlgmr.msra.gmra.mrb[40].mxu1 %v2041_v17 }
 0x3f0   :  { %2195 = vmatpush1.bf16.msra.mxu0 %v5803_v28  ;;  %2238 = vmatpush1.bf16.msra.mxu1 %v5806_v8 }
 0x3f1   :  { %2196 = vmatprep.subr.bf16.mxu0 %v5809_v34  ;;  %2239 = vmatprep.subr.bf16.mxu1 %v5812_v6 }
 0x3f2   :  { %2226 = vmatprep.mubr.bf16.mxu0 %v7443_v35  ;;  %2269 = vmatprep.mubr.bf16.mxu1 %v7443_v35 }
 0x3f4   :  { %2197 = vmatpush1.bf16.msra.mxu0 %v5817_v9  ;;  %2240 = vmatpush1.bf16.msra.mxu1 %v5820_v3 }
 0x3f5   :  { %2198 = vmatprep.subr.bf16.mxu0 %v5823_v27  ;;  %2241 = vmatprep.subr.bf16.mxu1 %v5826_v52 }
 0x3f8   :  { %2199 = vmatpush1.bf16.msra.mxu0 %v5829_v61  ;;  %2242 = vmatpush1.bf16.msra.mxu1 %v5832_v33 }
 0x3f9   :  { %2200 = vmatprep.subr.bf16.mxu0 %v5835_v22  ;;  %2243 = vmatprep.subr.bf16.mxu1 %v5838_v4 }
 0x3fc   :  { %2201 = vmatpush1.bf16.msra.mxu0 %v5841_v31  ;;  %2244 = vmatpush1.bf16.msra.mxu1 %v7553_v30 }
 0x3fd   :  { %2202 = vmatprep.subr.bf16.mxu0 %v7554_v13  ;;  %2245 = vmatprep.subr.bf16.mxu1 %v7555_v18 }
 0x400   :  { %2203 = vmatpush1.bf16.msra.mxu0 %v7556_v19  ;;  %2246 = vmatpush1.bf16.msra.mxu1 %v7557_v37 }
 0x401   :  { %2204 = vmatprep.subr.bf16.mxu0 %v7558_v38  ;;  %2247 = vmatprep.subr.bf16.mxu1 %v7559_v39 }
 0x404   :  { %2205 = vmatpush1.bf16.msra.mxu0 %v7560_v40  ;;  %2248 = vmatpush1.bf16.msra.mxu1 %v7561_v7 }
 0x405   :  { %2206 = vmatprep.subr.bf16.mxu0 %v7562_v41  ;;  %2249 = vmatprep.subr.bf16.mxu1 %v7563_v42 }
 0x408   :  { %2207 = vmatpush1.bf16.msra.mxu0 %v7564_v44  ;;  %2250 = vmatpush1.bf16.msra.mxu1 %v7565_v45 }
 0x409   :  { %2208 = vmatprep.subr.bf16.mxu0 %v5883_v10  ;;  %2251 = vmatprep.subr.bf16.mxu1 %v5886_v11 }
 0x40c   :  { %2209 = vmatpush1.bf16.msra.mxu0 %v5889_v2  ;;  %2252 = vmatpush1.bf16.msra.mxu1 %v5892_v0 }
 0x40d   :  { %2337 = vmatprep.subr.bf16.mxu0 %v5895_v32  ;;  %2380 = vmatprep.subr.bf16.mxu1 %v5898_v43 }
 0x40f   :  { %2227 = vmatmul.mubr.bf16.vlgmr.msra.gmra.mrb[12].mxu0 %v2041_v17  ;;  %2270 = vmatmul.mubr.bf16.vlgmr.msra.gmra.mrb[12].mxu1 %v2041_v17  ;;  %v6081_v17 = vld [vmem:[#allocation7 + $0x80] ss:$16 sps:$4 sm:$0xff]  }
 0x410   :  { %2338 = vmatpush1.bf16.msra.mxu0 %v6033_v47  ;;  %2381 = vmatpush1.bf16.msra.mxu1 %v6036_v48  ;;  %7581 = vst [vmem:[#allocation42_spill] sm:$0xff] %v6081_v17 }
 0x411   :  { %2339 = vmatprep.subr.bf16.mxu0 %v6039_v49  ;;  %2382 = vmatprep.subr.bf16.mxu1 %v6042_v23 }
 0x414   :  { %2340 = vmatpush1.bf16.msra.mxu0 %v6045_v50  ;;  %2383 = vmatpush1.bf16.msra.mxu1 %v6048_v51 }
 0x415   :  { %2341 = vmatprep.subr.bf16.mxu0 %v6051_v56  ;;  %2384 = vmatprep.subr.bf16.mxu1 %v6054_v57 }
 0x418   :  { %2342 = vmatpush1.bf16.msra.mxu0 %v6057_v59  ;;  %2385 = vmatpush1.bf16.msra.mxu1 %v6060_v60 }
 0x419   :  { %2343 = vmatprep.subr.bf16.mxu0 %v6063_v63  ;;  %2386 = vmatprep.subr.bf16.mxu1 %v6066_v29  ;;  %v6084_v29 = vld [vmem:[#allocation7 + $0x88] ss:$16 sps:$4 sm:$0xff]  }
 0x41a   :  { %7582 = vst [vmem:[#allocation43_spill] sm:$0xff] %v6084_v29 }
 0x41c   :  { %2344 = vmatpush1.bf16.msra.mxu0 %v6069_v5  ;;  %2387 = vmatpush1.bf16.msra.mxu1 %v6072_v12  ;;  %v6087_v5 = vld [vmem:[#allocation7 + $0xa4] ss:$16 sps:$4 sm:$0xff]   ;;  %v6090_v12 = vld [vmem:[#allocation7 + $0xac] ss:$16 sps:$4 sm:$0xff]  }
 0x41d   :  { %2345 = vmatprep.subr.bf16.mxu0 %v6075_v14  ;;  %2388 = vmatprep.subr.bf16.mxu1 %v6078_v16  ;;  %7583 = vst [vmem:[#allocation44_spill] sm:$0xff] %v6087_v5  ;;  %7584 = vst [vmem:[#allocation45_spill] sm:$0xff] %v6090_v12  ;;  %v6093_v14 = vld [vmem:[#allocation7 + $0xa0] ss:$16 sps:$4 sm:$0xff]   ;;  %v6096_v16 = vld [vmem:[#allocation7 + $0xa8] ss:$16 sps:$4 sm:$0xff]  }
 0x41e   :  { %7585 = vst [vmem:[#allocation46_spill] sm:$0xff] %v6093_v14  ;;  %7586 = vst [vmem:[#allocation47_spill] sm:$0xff] %v6096_v16 }
 0x420   :  { %2346 = vmatpush1.bf16.msra.mxu0 %v6081_v17  ;;  %2389 = vmatpush1.bf16.msra.mxu1 %v6084_v29  ;;  %v6099_v17 = vld [vmem:[#allocation7 + $0xc4] ss:$16 sps:$4 sm:$0xff]   ;;  %v6102_v29 = vld [vmem:[#allocation7 + $0xcc] ss:$16 sps:$4 sm:$0xff]  }
 0x421   :  { %2347 = vmatprep.subr.bf16.mxu0 %v6087_v5  ;;  %2390 = vmatprep.subr.bf16.mxu1 %v6090_v12  ;;  %7587 = vst [vmem:[#allocation48_spill] sm:$0xff] %v6099_v17  ;;  %7588 = vst [vmem:[#allocation49_spill] sm:$0xff] %v6102_v29  ;;  %v6105_v5 = vld [vmem:[#allocation7 + $0xc0] ss:$16 sps:$4 sm:$0xff]   ;;  %v6108_v12 = vld [vmem:[#allocation7 + $0xc8] ss:$16 sps:$4 sm:$0xff]  }
 0x422   :  { %7589 = vst [vmem:[#allocation50_spill] sm:$0xff] %v6105_v5  ;;  %7590 = vst [vmem:[#allocation51_spill] sm:$0xff] %v6108_v12 }
 0x424   :  { %2348 = vmatpush1.bf16.msra.mxu0 %v6093_v14  ;;  %2391 = vmatpush1.bf16.msra.mxu1 %v6096_v16  ;;  %v6111_v14 = vld [vmem:[#allocation7 + $0xe4] ss:$16 sps:$4 sm:$0xff]   ;;  %v6114_v16 = vld [vmem:[#allocation7 + $0xec] ss:$16 sps:$4 sm:$0xff]  }
 0x425   :  { %2349 = vmatprep.subr.bf16.mxu0 %v6099_v17  ;;  %2392 = vmatprep.subr.bf16.mxu1 %v6102_v29  ;;  %7591 = vst [vmem:[#allocation52_spill] sm:$0xff] %v6111_v14  ;;  %7592 = vst [vmem:[#allocation53_spill] sm:$0xff] %v6114_v16  ;;  %v6117_v17 = vld [vmem:[#allocation7 + $0xe0] ss:$16 sps:$4 sm:$0xff]   ;;  %v6120_v29 = vld [vmem:[#allocation7 + $0xe8] ss:$16 sps:$4 sm:$0xff]  }
 0x426   :  { %7593 = vst [vmem:[#allocation54_spill] sm:$0xff] %v6117_v17  ;;  %7594 = vst [vmem:[#allocation55_spill] sm:$0xff] %v6120_v29 }
 0x428   :  { %2350 = vmatpush1.bf16.msra.mxu0 %v6105_v5  ;;  %2393 = vmatpush1.bf16.msra.mxu1 %v6108_v12  ;;  %v6123_v5 = vld [vmem:[#allocation7 + $0x104] ss:$16 sps:$4 sm:$0xff]   ;;  %v6126_v12 = vld [vmem:[#allocation7 + $0x10c] ss:$16 sps:$4 sm:$0xff]  }
 0x429   :  { %2351 = vmatprep.subr.bf16.mxu0 %v6111_v14  ;;  %2394 = vmatprep.subr.bf16.mxu1 %v6114_v16  ;;  %7595 = vst [vmem:[#allocation56_spill] sm:$0xff] %v6123_v5  ;;  %7596 = vst [vmem:[#allocation57_spill] sm:$0xff] %v6126_v12  ;;  %v6129_v14 = vld [vmem:[#allocation7 + $0x100] ss:$16 sps:$4 sm:$0xff]   ;;  %v6132_v16 = vld [vmem:[#allocation7 + $0x108] ss:$16 sps:$4 sm:$0xff]  }
 0x42a   :  { %7597 = vst [vmem:[#allocation58_spill] sm:$0xff] %v6129_v14  ;;  %7598 = vst [vmem:[#allocation59_spill] sm:$0xff] %v6132_v16 }
 0x42c   :  { %2352 = vmatpush1.bf16.msra.mxu0 %v6117_v17  ;;  %2395 = vmatpush1.bf16.msra.mxu1 %v6120_v29  ;;  %v6135_v17 = vld [vmem:[#allocation7 + $0x124] ss:$16 sps:$4 sm:$0xff]   ;;  %v6138_v29 = vld [vmem:[#allocation7 + $0x12c] ss:$16 sps:$4 sm:$0xff]  }
 0x42d   :  { %2353 = vmatprep.subr.bf16.mxu0 %v6123_v5  ;;  %2396 = vmatprep.subr.bf16.mxu1 %v6126_v12  ;;  %7599 = vst [vmem:[#allocation60_spill] sm:$0xff] %v6135_v17  ;;  %7600 = vst [vmem:[#allocation61_spill] sm:$0xff] %v6138_v29  ;;  %v6141_v5 = vld [vmem:[#allocation7 + $0x120] ss:$16 sps:$4 sm:$0xff]   ;;  %v6144_v12 = vld [vmem:[#allocation7 + $0x128] ss:$16 sps:$4 sm:$0xff]  }
 0x42e   :  { %7601 = vst [vmem:[#allocation10_spill] sm:$0xff] %v6141_v5  ;;  %7602 = vst [vmem:[#allocation11_spill] sm:$0xff] %v6144_v12 }
 0x430   :  { %2354 = vmatpush1.bf16.msra.mxu0 %v6129_v14  ;;  %2397 = vmatpush1.bf16.msra.mxu1 %v6132_v16  ;;  %v6147_v14 = vld [vmem:[#allocation7 + $0x144] ss:$16 sps:$4 sm:$0xff]   ;;  %v6150_v16 = vld [vmem:[#allocation7 + $0x14c] ss:$16 sps:$4 sm:$0xff]  }
 0x431   :  { %2355 = vmatprep.subr.bf16.mxu0 %v6135_v17  ;;  %2398 = vmatprep.subr.bf16.mxu1 %v6138_v29  ;;  %7603 = vst [vmem:[#allocation62_spill] sm:$0xff] %v6147_v14  ;;  %7604 = vst [vmem:[#allocation63_spill] sm:$0xff] %v6150_v16  ;;  %v6153_v17 = vld [vmem:[#allocation7 + $0x140] ss:$16 sps:$4 sm:$0xff]   ;;  %v6156_v29 = vld [vmem:[#allocation7 + $0x148] ss:$16 sps:$4 sm:$0xff]  }
 0x432   :  { %7605 = vst [vmem:[#allocation15_spill] sm:$0xff] %v6153_v17  ;;  %7606 = vst [vmem:[#allocation16_spill] sm:$0xff] %v6156_v29 }
 0x434   :  { %2356 = vmatpush1.bf16.msra.mxu0 %v6141_v5  ;;  %2399 = vmatpush1.bf16.msra.mxu1 %v6144_v12  ;;  %v6159_v5 = vld [vmem:[#allocation7 + $0x164] ss:$16 sps:$4 sm:$0xff]   ;;  %v6162_v12 = vld [vmem:[#allocation7 + $0x16c] ss:$16 sps:$4 sm:$0xff]  }
 0x435   :  { %2357 = vmatprep.subr.bf16.mxu0 %v6147_v14  ;;  %2400 = vmatprep.subr.bf16.mxu1 %v6150_v16  ;;  %7607 = vst [vmem:[#allocation17_spill] sm:$0xff] %v6159_v5  ;;  %7608 = vst [vmem:[#allocation18_spill] sm:$0xff] %v6162_v12  ;;  %v6165_v14 = vld [vmem:[#allocation7 + $0x160] ss:$16 sps:$4 sm:$0xff]   ;;  %v6168_v16 = vld [vmem:[#allocation7 + $0x168] ss:$16 sps:$4 sm:$0xff]  }
 0x436   :  { %7609 = vst [vmem:[#allocation19_spill] sm:$0xff] %v6165_v14  ;;  %7610 = vst [vmem:[#allocation20_spill] sm:$0xff] %v6168_v16 }
 0x438   :  { %2358 = vmatpush1.bf16.msra.mxu0 %v6153_v17  ;;  %2401 = vmatpush1.bf16.msra.mxu1 %v6156_v29  ;;  %v6171_v17 = vld [vmem:[#allocation7 + $0x184] ss:$16 sps:$4 sm:$0xff]   ;;  %v6174_v29 = vld [vmem:[#allocation7 + $0x18c] ss:$16 sps:$4 sm:$0xff]  }
 0x439   :  { %2359 = vmatprep.subr.bf16.mxu0 %v6159_v5  ;;  %2402 = vmatprep.subr.bf16.mxu1 %v6162_v12  ;;  %7611 = vst [vmem:[#allocation21_spill] sm:$0xff] %v6171_v17  ;;  %7612 = vst [vmem:[#allocation22_spill] sm:$0xff] %v6174_v29  ;;  %v6177_v5 = vld [vmem:[#allocation7 + $0x180] ss:$16 sps:$4 sm:$0xff]   ;;  %v6180_v12 = vld [vmem:[#allocation7 + $0x188] ss:$16 sps:$4 sm:$0xff]  }
 0x43a   :  { %7613 = vst [vmem:[#allocation23_spill] sm:$0xff] %v6177_v5  ;;  %7614 = vst [vmem:[#allocation24_spill] sm:$0xff] %v6180_v12 }
 0x43c   :  { %2360 = vmatpush1.bf16.msra.mxu0 %v6165_v14  ;;  %2403 = vmatpush1.bf16.msra.mxu1 %v6168_v16  ;;  %v6183_v14 = vld [vmem:[#allocation7 + $0x1a4] ss:$16 sps:$4 sm:$0xff]   ;;  %v6186_v16 = vld [vmem:[#allocation7 + $0x1ac] ss:$16 sps:$4 sm:$0xff]  }
 0x43d   :  { %2361 = vmatprep.subr.bf16.mxu0 %v6171_v17  ;;  %2404 = vmatprep.subr.bf16.mxu1 %v6174_v29  ;;  %7615 = vst [vmem:[#allocation25_spill] sm:$0xff] %v6183_v14  ;;  %7616 = vst [vmem:[#allocation26_spill] sm:$0xff] %v6186_v16  ;;  %v6189_v17 = vld [vmem:[#allocation7 + $0x1a0] ss:$16 sps:$4 sm:$0xff]   ;;  %v6192_v29 = vld [vmem:[#allocation7 + $0x1a8] ss:$16 sps:$4 sm:$0xff]  }
 0x43e   :  { %7617 = vst [vmem:[#allocation27_spill] sm:$0xff] %v6189_v17  ;;  %7618 = vst [vmem:[#allocation65_spill] sm:$0xff] %v6192_v29 }
 0x440   :  { %2362 = vmatpush1.bf16.msra.mxu0 %v6177_v5  ;;  %2405 = vmatpush1.bf16.msra.mxu1 %v6180_v12  ;;  %v6195_v5 = vld [vmem:[#allocation7 + $0x1c4] ss:$16 sps:$4 sm:$0xff]   ;;  %v6198_v12 = vld [vmem:[#allocation7 + $0x1cc] ss:$16 sps:$4 sm:$0xff]  }
 0x441   :  { %2363 = vmatprep.subr.bf16.mxu0 %v6183_v14  ;;  %2406 = vmatprep.subr.bf16.mxu1 %v6186_v16  ;;  %7619 = vst [vmem:[#allocation66_spill] sm:$0xff] %v6195_v5  ;;  %7620 = vst [vmem:[#allocation67_spill] sm:$0xff] %v6198_v12  ;;  %v6201_v14 = vld [vmem:[#allocation7 + $0x1c0] ss:$16 sps:$4 sm:$0xff]   ;;  %v6204_v16 = vld [vmem:[#allocation7 + $0x1c8] ss:$16 sps:$4 sm:$0xff]  }
 0x442   :  { %7621 = vst [vmem:[#allocation68_spill] sm:$0xff] %v6201_v14  ;;  %7622 = vst [vmem:[#allocation69_spill] sm:$0xff] %v6204_v16 }
 0x444   :  { %2364 = vmatpush1.bf16.msra.mxu0 %v6189_v17  ;;  %2407 = vmatpush1.bf16.msra.mxu1 %v6192_v29  ;;  %v6207_v17 = vld [vmem:[#allocation7 + $0x1e4] ss:$16 sps:$4 sm:$0xff]   ;;  %v6210_v29 = vld [vmem:[#allocation7 + $0x1ec] ss:$16 sps:$4 sm:$0xff]  }
 0x445   :  { %2365 = vmatprep.subr.bf16.mxu0 %v6195_v5  ;;  %2408 = vmatprep.subr.bf16.mxu1 %v6198_v12  ;;  %7623 = vst [vmem:[#allocation70_spill] sm:$0xff] %v6207_v17  ;;  %7624 = vst [vmem:[#allocation71_spill] sm:$0xff] %v6210_v29  ;;  %v6213_v5 = vld [vmem:[#allocation7 + $0x1e0] ss:$16 sps:$4 sm:$0xff]   ;;  %v6216_v12 = vld [vmem:[#allocation7 + $0x1e8] ss:$16 sps:$4 sm:$0xff]  }
 0x446   :  { %7625 = vst [vmem:[#allocation72_spill] sm:$0xff] %v6213_v5  ;;  %7626 = vst [vmem:[#allocation73_spill] sm:$0xff] %v6216_v12 }
 0x448   :  { %2366 = vmatpush1.bf16.msra.mxu0 %v6201_v14  ;;  %2409 = vmatpush1.bf16.msra.mxu1 %v6204_v16 }
 0x449   :  { %2367 = vmatprep.subr.bf16.mxu0 %v6207_v17  ;;  %2410 = vmatprep.subr.bf16.mxu1 %v6210_v29 }
 0x44c   :  { %2368 = vmatpush1.bf16.msra.mxu0 %v6213_v5  ;;  %2411 = vmatpush1.bf16.msra.mxu1 %v6216_v12 }
 0x44d   :  { %2489 = vmatprep.subr.bf16.mxu0 %v7546_v54  ;;  %2532 = vmatprep.subr.bf16.mxu1 %v7547_v55 }
 0x4c2   :  { %v2076_v16 = vpop.f32.mrb[40].mxu0  ;;  %v2119_v14 = vpop.f32.mrb[40].mxu1 }
 0x4c3   :  { %v2128_v17 = vadd.f32 %v2076_v16, %v7548_v58  ;;  %v2078_v63 = vpop.f32.mrb[41].mxu0  ;;  %v2121_v60 = vpop.f32.mrb[41].mxu1  ;;  %v2130_v16 = vadd.f32 %v2119_v14, %v7549_v20 }
 0x4c4   :  { %v2129_v29 = vadd.f32 %v2078_v63, %v5759_v25  ;;  %v2080_v59 = vpop.f32.mrb[42].mxu0  ;;  %v2123_v57 = vpop.f32.mrb[42].mxu1  ;;  %v2131_v63 = vadd.f32 %v2121_v60, %v7550_v36 }
 0x4c5   :  { %v3946_v56 = vmul.f32 -1.442695, %v2128_v17  ;;  %v2132_v5 = vadd.f32 %v2080_v59, %v7548_v58  ;;  %v2082_v51 = vpop.f32.mrb[43].mxu0  ;;  %v2125_v50 = vpop.f32.mrb[43].mxu1  ;;  %v2134_v59 = vadd.f32 %v2123_v57, %v7549_v20 }
 0x4c6   :  { %v3948_v12 = vmul.f32 -1.442695, %v2129_v29  ;;  %v2133_v54 = vadd.f32 %v2082_v51, %v5759_v25  ;;  %v3950_v51 = vmul.f32 -1.442695, %v2131_v63 }
 0x4c7   :  { %4554 = vpow2.f32 %v3946_v56  ;;  %v3947_v55 = vmul.f32 -1.442695, %v2132_v5  ;;  %v2135_v56 = vadd.f32 %v2125_v50, %v7550_v36 }
 0x4c8   :  { %4556 = vpow2.f32 %v3948_v12  ;;  %v3949_v23 = vmul.f32 -1.442695, %v2133_v54 }
 0x4c9   :  { %4558 = vpow2.f32 %v3947_v55  ;;  %v3951_v60 = vmul.f32 -1.442695, %v2135_v56 }
 0x4ca   :  { %4560 = vpow2.f32 %v3949_v23 }
 0x4cb   :  { %4562 = vtanh.f32 %v2130_v16 }
 0x4d1   :  { %v4555_v49 = vpop.eup %4554 }
 0x4d2   :  { %v4557_v48 = vpop.eup %4556  ;;  %v2142_v17 = vadd.f32 1.0, %v4555_v49 }
 0x4d3   :  { %v2154_v58 = vadd.f32 1.0, %v4557_v48  ;;  %v4559_v29 = vpop.eup %4558 }
 0x4d4   :  { %4564 = vrcp.f32 %v2142_v17  ;;  %v2143_v5 = vadd.f32 1.0, %v4559_v29  ;;  %v4561_v12 = vpop.eup %4560 }
 0x4d5   :  { %4566 = vrcp.f32 %v2154_v58  ;;  %v2155_v23 = vadd.f32 1.0, %v4561_v12  ;;  %v4563_v49 = vpop.eup %4562 }
 0x4d6   :  { %4568 = vtanh.f32 %v2134_v59 }
 0x4d7   :  { %4570 = vrcp.f32 %v2143_v5 }
 0x4d8   :  { %4572 = vpow2.f32 %v3950_v51 }
 0x4d9   :  { %4574 = vrcp.f32 %v2155_v23 }
 0x4da   :  { %4576 = vpow2.f32 %v3951_v60 }
 0x4de   :  { %v4565_v14 = vpop.eup %4564 }
 0x4df   :  { %v4567_v57 = vpop.eup %4566  ;;  %v2176_v54 = vmul.f32 %v4565_v14, %v4563_v49 }
 0x4e0   :  { %v4569_v48 = vpop.eup %4568  ;;  %v2174_v55 = vmul.f32 %v4567_v57, %v5976_v1 }
 0x4e1   :  { %v4571_v16 = vpop.eup %4570 }
 0x4e2   :  { %v4573_v63 = vpop.eup %4572  ;;  %v6230_v50 = vadd.f32 %v2176_v54, %v2174_v55  ;;  %v2177_v58 = vmul.f32 %v4571_v16, %v4569_v48  ;;  %v2228_v17 = vpop.f32.mrb[12].mxu0 }
 0x4e3   :  { %v2271_v59 = vpop.f32.mrb[12].mxu1  ;;  %v4575_v29 = vpop.eup %4574  ;;  %v4062_v51 = vadd.f32 %v2228_v17, %v7551_v15  ;;  %v2168_v14 = vadd.f32 1.0, %v4573_v63 }
 0x4e4   :  { %v2230_v56 = vpop.f32.mrb[13].mxu0  ;;  %v2273_v5 = vpop.f32.mrb[13].mxu1  ;;  %v2175_v12 = vmul.f32 %v4575_v29, %v5982_v46  ;;  %v4094_v63 = vadd.f32 %v2271_v59, %v7506_v26 }
 0x4e5   :  { %v4063_v23 = vadd.f32 %v2230_v56, %v7552_v21  ;;  %v2232_v60 = vpop.f32.mrb[14].mxu0  ;;  %v2275_v49 = vpop.f32.mrb[14].mxu1  ;;  %v3952_v1 = vmul.f32 -1.442695, %v4062_v51  ;;  %v4095_v56 = vadd.f32 %v2273_v5, %v5631_v24 }
 0x4e6   :  { %v4064_v57 = vadd.f32 %v2232_v60, %v7551_v15  ;;  %v2234_v54 = vpop.f32.mrb[15].mxu0  ;;  %v2277_v55 = vpop.f32.mrb[15].mxu1  ;;  %v6236_v16 = vadd.f32 %v2177_v58, %v2175_v12  ;;  %v4096_v12 = vadd.f32 %v2275_v49, %v7506_v26 }
 0x4e7   :  { %v4577_v48 = vpop.eup %4576  ;;  %v3954_v36 = vmul.f32 -1.442695, %v4063_v23  ;;  %v4065_v17 = vadd.f32 %v2234_v54, %v7552_v21  ;;  %4578 = vpow2.f32 %v3952_v1  ;;  %v3956_v58 = vmul.f32 -1.442695, %v4095_v56 }
 0x4e8   :  { %v3953_v20 = vmul.f32 -1.442695, %v4064_v57  ;;  %v2169_v29 = vadd.f32 1.0, %v4577_v48  ;;  %v4097_v51 = vadd.f32 %v2277_v55, %v5631_v24 }
 0x4e9   :  { %4580 = vpow2.f32 %v3954_v36  ;;  %v3955_v46 = vmul.f32 -1.442695, %v4065_v17 }
 0x4ea   :  { %4582 = vrcp.f32 %v2168_v14  ;;  %v3957_v5 = vmul.f32 -1.442695, %v4097_v51 }
 0x4eb   :  { %4584 = vpow2.f32 %v3953_v20 }
 0x4ec   :  { %4586 = vtanh.f32 %v6230_v50 }
 0x4ed   :  { %4588 = vpow2.f32 %v3955_v46 }
 0x4ee   :  { %4590 = vrcp.f32 %v2169_v29 }
 0x4ef   :  { %4592 = vtanh.f32 %v6236_v16 }
 0x4f0   :  { %4594 = vtanh.f32 %v4094_v63 }
 0x4f1   :  { %v4579_v36 = vpop.eup %4578  ;;  %4596 = vpow2.f32 %v3956_v58 }
 0x4f2   :  { %v2294_v60 = vadd.f32 1.0, %v4579_v36  ;;  %4598 = vtanh.f32 %v4096_v12 }
 0x4f3   :  { %v4581_v23 = vpop.eup %4580 }
 0x4f4   :  { %v4583_v20 = vpop.eup %4582  ;;  %v2306_v14 = vadd.f32 1.0, %v4581_v23  ;;  %4600 = vrcp.f32 %v2294_v60 }
 0x4f5   :  { %v4585_v1 = vpop.eup %4584 }
 0x4f6   :  { %v4587_v57 = vpop.eup %4586  ;;  %4602 = vrcp.f32 %v2306_v14  ;;  %v2295_v59 = vadd.f32 1.0, %v4585_v1 }
 0x4f7   :  { %v4589_v54 = vpop.eup %4588  ;;  %4604 = vpow2.f32 %v3957_v5  ;;  %v2182_v17 = vmul.f32 %v4587_v57, %v4583_v20 }
 0x4f8   :  { %v4591_v55 = vpop.eup %4590  ;;  %4606 = vrcp.f32 %v2295_v59  ;;  %v2307_v48 = vadd.f32 1.0, %v4589_v54 }
 0x4f9   :  { %v4593_v49 = vpop.eup %4592 }
 0x4fa   :  { %4608 = vrcp.f32 %v2307_v48  ;;  %v2183_v46 = vmul.f32 %v4593_v49, %v4591_v55  ;;  %v4595_v29 = vpop.eup %4594 }
 0x4fb   :  { %v4597_v63 = vpop.eup %4596 }
 0x4fc   :  { %v2184_v56 = vpack.c.bf16 %v2183_v46, %v2182_v17  ;;  %v4599_v58 = vpop.eup %4598  ;;  %v2320_v14 = vadd.f32 1.0, %v4597_v63  ;;  %v7660_v63 = vld [vmem:[#allocation60_spill] sm:$0xff] }
 0x4fe   :  { %2369 = vmatprep.mubr.bf16.mxu0 %v2184_v56  ;;  %2412 = vmatprep.mubr.bf16.mxu1 %v2184_v56  ;;  %v4601_v51 = vpop.eup %4600  ;;  %4610 = vrcp.f32 %v2320_v14  ;;  %v7668_v14 = vld [vmem:[#allocation17_spill] sm:$0xff] }
 0x4ff   :  { %v2328_v36 = vmul.f32 %v4601_v51, %v4595_v29  ;;  %v7662_v51 = vld [vmem:[#allocation10_spill] sm:$0xff] }
 0x500   :  { %v4603_v12 = vpop.eup %4602 }
 0x501   :  { %v4605_v23 = vpop.eup %4604  ;;  %v2326_v60 = vmul.f32 %v4603_v12, %v5992_v53  ;;  %v7663_v12 = vld [vmem:[#allocation11_spill] sm:$0xff] }
 0x502   :  { %v4607_v5 = vpop.eup %4606  ;;  %v2321_v20 = vadd.f32 1.0, %v4605_v23  ;;  %v7665_v23 = vld [vmem:[#allocation63_spill] sm:$0xff] }
 0x503   :  { %v6246_v1 = vadd.f32 %v2328_v36, %v2326_v60  ;;  %v2329_v59 = vmul.f32 %v4607_v5, %v4599_v58  ;;  %v7661_v58 = vld [vmem:[#allocation61_spill] sm:$0xff]  ;;  %v7664_v36 = vld [vmem:[#allocation62_spill] sm:$0xff]  ;;  %v7666_v60 = vld [vmem:[#allocation15_spill] sm:$0xff] }
 0x504   :  { %v4609_v54 = vpop.eup %4608  ;;  %v7667_v5 = vld [vmem:[#allocation16_spill] sm:$0xff] }
 0x505   :  { %v2327_v57 = vmul.f32 %v4609_v54, %v5996_v62  ;;  %4612 = vtanh.f32 %v6246_v1  ;;  %v7646_v62 = vld [vmem:[#allocation46_spill] sm:$0xff]  ;;  %v7670_v54 = vld [vmem:[#allocation19_spill] sm:$0xff] }
 0x506   :  { %4614 = vrcp.f32 %v2321_v20  ;;  %v7671_v20 = vld [vmem:[#allocation20_spill] sm:$0xff] }
 0x507   :  { %v6250_v55 = vadd.f32 %v2329_v59, %v2327_v57  ;;  %v7669_v59 = vld [vmem:[#allocation18_spill] sm:$0xff]  ;;  %v7672_v57 = vld [vmem:[#allocation21_spill] sm:$0xff] }
 0x508   :  { %v4611_v48 = vpop.eup %4610 }
 0x509   :  { %4616 = vtanh.f32 %v6250_v55 }
 0x50f   :  { %v4613_v49 = vpop.eup %4612 }
 0x510   :  { %v4615_v53 = vpop.eup %4614  ;;  %v2334_v46 = vmul.f32 %v4613_v49, %v4611_v48  ;;  %v7673_v48 = vld [vmem:[#allocation22_spill] sm:$0xff]  ;;  %v7674_v49 = vld [vmem:[#allocation23_spill] sm:$0xff] }
 0x513   :  { %v4617_v17 = vpop.eup %4616 }
 0x514   :  { %v2335_v29 = vmul.f32 %v4617_v17, %v4615_v53  ;;  %v7675_v53 = vld [vmem:[#allocation24_spill] sm:$0xff]  ;;  %v7676_v17 = vld [vmem:[#allocation25_spill] sm:$0xff] }
 0x516   :  { %v2336_v56 = vpack.c.bf16 %v2335_v29, %v2334_v46  ;;  %v7677_v46 = vld [vmem:[#allocation26_spill] sm:$0xff]  ;;  %v7678_v29 = vld [vmem:[#allocation27_spill] sm:$0xff] }
 0x518   :  { %2370 = vmatmul.mubr.bf16.vlgmr.msra.gmra.mrb[44].mxu0 %v2336_v56  ;;  %2413 = vmatmul.mubr.bf16.vlgmr.msra.gmra.mrb[44].mxu1 %v2336_v56 }
 0x519   :  { %2490 = vmatpush1.bf16.msra.mxu0 %v5803_v28  ;;  %2533 = vmatpush1.bf16.msra.mxu1 %v5806_v8  ;;  %v7627_v28 = vld [vmem:[#allocation28_spill] sm:$0xff]  ;;  %v7628_v8 = vld [vmem:[#allocation29_spill] sm:$0xff] }
 0x51a   :  { %2491 = vmatprep.subr.bf16.mxu0 %v5809_v34  ;;  %2534 = vmatprep.subr.bf16.mxu1 %v5812_v6  ;;  %v7629_v34 = vld [vmem:[#allocation30_spill] sm:$0xff]  ;;  %v7630_v6 = vld [vmem:[#allocation31_spill] sm:$0xff] }
 0x51b   :  { %2521 = vmatprep.mubr.bf16.mxu0 %v7443_v35  ;;  %2564 = vmatprep.mubr.bf16.mxu1 %v7443_v35 }
 0x51d   :  { %2492 = vmatpush1.bf16.msra.mxu0 %v5817_v9  ;;  %2535 = vmatpush1.bf16.msra.mxu1 %v5820_v3  ;;  %v7631_v9 = vld [vmem:[#allocation32_spill] sm:$0xff]  ;;  %v7632_v3 = vld [vmem:[#allocation33_spill] sm:$0xff] }
 0x51e   :  { %2493 = vmatprep.subr.bf16.mxu0 %v5823_v27  ;;  %2536 = vmatprep.subr.bf16.mxu1 %v5826_v52  ;;  %v7633_v27 = vld [vmem:[#allocation34_spill] sm:$0xff]  ;;  %v7634_v52 = vld [vmem:[#allocation35_spill] sm:$0xff] }
 0x521   :  { %2494 = vmatpush1.bf16.msra.mxu0 %v5829_v61  ;;  %2537 = vmatpush1.bf16.msra.mxu1 %v5832_v33  ;;  %v7635_v61 = vld [vmem:[#allocation64_spill] sm:$0xff] }
 0x522   :  { %2495 = vmatprep.subr.bf16.mxu0 %v5835_v22  ;;  %2538 = vmatprep.subr.bf16.mxu1 %v5838_v4  ;;  %v7636_v33 = vld [vmem:[#allocation36_spill] sm:$0xff]  ;;  %v7637_v22 = vld [vmem:[#allocation37_spill] sm:$0xff]  ;;  %v7638_v4 = vld [vmem:[#allocation38_spill] sm:$0xff] }
 0x525   :  { %2496 = vmatpush1.bf16.msra.mxu0 %v5841_v31  ;;  %2539 = vmatpush1.bf16.msra.mxu1 %v7553_v30  ;;  %v7639_v31 = vld [vmem:[#allocation39_spill] sm:$0xff] }
 0x526   :  { %2497 = vmatprep.subr.bf16.mxu0 %v7554_v13  ;;  %2540 = vmatprep.subr.bf16.mxu1 %v7555_v18  ;;  %v7647_v30 = vld [vmem:[#allocation47_spill] sm:$0xff]  ;;  %v7648_v13 = vld [vmem:[#allocation48_spill] sm:$0xff]  ;;  %v7649_v18 = vld [vmem:[#allocation49_spill] sm:$0xff] }
 0x529   :  { %2498 = vmatpush1.bf16.msra.mxu0 %v7556_v19  ;;  %2541 = vmatpush1.bf16.msra.mxu1 %v7557_v37  ;;  %v7650_v19 = vld [vmem:[#allocation50_spill] sm:$0xff]  ;;  %v7651_v37 = vld [vmem:[#allocation51_spill] sm:$0xff] }
 0x52a   :  { %2499 = vmatprep.subr.bf16.mxu0 %v7558_v38  ;;  %2542 = vmatprep.subr.bf16.mxu1 %v7559_v39  ;;  %v7652_v38 = vld [vmem:[#allocation52_spill] sm:$0xff]  ;;  %v7653_v39 = vld [vmem:[#allocation53_spill] sm:$0xff] }
 0x52d   :  { %2500 = vmatpush1.bf16.msra.mxu0 %v7560_v40  ;;  %2543 = vmatpush1.bf16.msra.mxu1 %v7561_v7  ;;  %v7654_v40 = vld [vmem:[#allocation54_spill] sm:$0xff]  ;;  %v7655_v7 = vld [vmem:[#allocation55_spill] sm:$0xff] }
 0x52e   :  { %2501 = vmatprep.subr.bf16.mxu0 %v7562_v41  ;;  %2544 = vmatprep.subr.bf16.mxu1 %v7563_v42  ;;  %v7656_v41 = vld [vmem:[#allocation56_spill] sm:$0xff]  ;;  %v7657_v42 = vld [vmem:[#allocation57_spill] sm:$0xff] }
 0x531   :  { %2502 = vmatpush1.bf16.msra.mxu0 %v7564_v44  ;;  %2545 = vmatpush1.bf16.msra.mxu1 %v7565_v45  ;;  %v7658_v44 = vld [vmem:[#allocation58_spill] sm:$0xff]  ;;  %v7659_v45 = vld [vmem:[#allocation59_spill] sm:$0xff] }
 0x532   :  { %2503 = vmatprep.subr.bf16.mxu0 %v5883_v10  ;;  %2546 = vmatprep.subr.bf16.mxu1 %v5886_v11  ;;  %v7641_v10 = vld [vmem:[#allocation41_spill] sm:$0xff]  ;;  %v7642_v11 = vld [vmem:[#allocation42_spill] sm:$0xff] }
 0x535   :  { %2504 = vmatpush1.bf16.msra.mxu0 %v5889_v2  ;;  %2547 = vmatpush1.bf16.msra.mxu1 %v5892_v0  ;;  %v7643_v2 = vld [vmem:[#allocation43_spill] sm:$0xff]  ;;  %v7644_v0 = vld [vmem:[#allocation44_spill] sm:$0xff] }
 0x536   :  { %2632 = vmatprep.subr.bf16.mxu0 %v5895_v32  ;;  %2675 = vmatprep.subr.bf16.mxu1 %v5898_v43  ;;  %v7640_v43 = vld [vmem:[#allocation40_spill] sm:$0xff]  ;;  %v7645_v32 = vld [vmem:[#allocation45_spill] sm:$0xff] }
 0x538   :  { %2522 = vmatmul.mubr.bf16.vlgmr.msra.gmra.mrb[16].mxu0 %v2336_v56  ;;  %2565 = vmatmul.mubr.bf16.vlgmr.msra.gmra.mrb[16].mxu1 %v2336_v56  ;;  %v7679_v56 = vld [vmem:[#allocation65_spill] sm:$0xff] }
 0x539   :  { %2633 = vmatpush1.bf16.msra.mxu0 %v6033_v47  ;;  %2676 = vmatpush1.bf16.msra.mxu1 %v7627_v28 }
 0x53a   :  { %2634 = vmatprep.subr.bf16.mxu0 %v7628_v8  ;;  %2677 = vmatprep.subr.bf16.mxu1 %v7629_v34 }
 0x53d   :  { %2635 = vmatpush1.bf16.msra.mxu0 %v7630_v6  ;;  %2678 = vmatpush1.bf16.msra.mxu1 %v7631_v9 }
 0x53e   :  { %2636 = vmatprep.subr.bf16.mxu0 %v7632_v3  ;;  %2679 = vmatprep.subr.bf16.mxu1 %v7633_v27 }
 0x541   :  { %2637 = vmatpush1.bf16.msra.mxu0 %v7634_v52  ;;  %2680 = vmatpush1.bf16.msra.mxu1 %v7635_v61 }
 0x542   :  { %2638 = vmatprep.subr.bf16.mxu0 %v7636_v33  ;;  %2681 = vmatprep.subr.bf16.mxu1 %v7637_v22 }
 0x545   :  { %2639 = vmatpush1.bf16.msra.mxu0 %v7638_v4  ;;  %2682 = vmatpush1.bf16.msra.mxu1 %v7639_v31 }
 0x546   :  { %2640 = vmatprep.subr.bf16.mxu0 %v7640_v43  ;;  %2683 = vmatprep.subr.bf16.mxu1 %v7641_v10 }
 0x549   :  { %2641 = vmatpush1.bf16.msra.mxu0 %v7642_v11  ;;  %2684 = vmatpush1.bf16.msra.mxu1 %v7643_v2 }
 0x54a   :  { %2642 = vmatprep.subr.bf16.mxu0 %v7644_v0  ;;  %2685 = vmatprep.subr.bf16.mxu1 %v7645_v32 }
 0x54d   :  { %2643 = vmatpush1.bf16.msra.mxu0 %v7646_v62  ;;  %2686 = vmatpush1.bf16.msra.mxu1 %v7647_v30 }
 0x54e   :  { %2644 = vmatprep.subr.bf16.mxu0 %v7648_v13  ;;  %2687 = vmatprep.subr.bf16.mxu1 %v7649_v18 }
 0x551   :  { %2645 = vmatpush1.bf16.msra.mxu0 %v7650_v19  ;;  %2688 = vmatpush1.bf16.msra.mxu1 %v7651_v37 }
 0x552   :  { %2646 = vmatprep.subr.bf16.mxu0 %v7652_v38  ;;  %2689 = vmatprep.subr.bf16.mxu1 %v7653_v39 }
 0x555   :  { %2647 = vmatpush1.bf16.msra.mxu0 %v7654_v40  ;;  %2690 = vmatpush1.bf16.msra.mxu1 %v7655_v7 }
 0x556   :  { %2648 = vmatprep.subr.bf16.mxu0 %v7656_v41  ;;  %2691 = vmatprep.subr.bf16.mxu1 %v7657_v42 }
 0x559   :  { %2649 = vmatpush1.bf16.msra.mxu0 %v7658_v44  ;;  %2692 = vmatpush1.bf16.msra.mxu1 %v7659_v45 }
 0x55a   :  { %2650 = vmatprep.subr.bf16.mxu0 %v7660_v63  ;;  %2693 = vmatprep.subr.bf16.mxu1 %v7661_v58  ;;  %v7692_v58 = vld [vmem:[#allocation13_spill] sm:$0xff] }
 0x55d   :  { %2651 = vmatpush1.bf16.msra.mxu0 %v7662_v51  ;;  %2694 = vmatpush1.bf16.msra.mxu1 %v7663_v12 }
 0x55e   :  { %2652 = vmatprep.subr.bf16.mxu0 %v7664_v36  ;;  %2695 = vmatprep.subr.bf16.mxu1 %v7665_v23 }
 0x561   :  { %2653 = vmatpush1.bf16.msra.mxu0 %v7666_v60  ;;  %2696 = vmatpush1.bf16.msra.mxu1 %v7667_v5 }
 0x562   :  { %2654 = vmatprep.subr.bf16.mxu0 %v7668_v14  ;;  %2697 = vmatprep.subr.bf16.mxu1 %v7669_v59  ;;  %v7680_v59 = vld [vmem:[#allocation66_spill] sm:$0xff] }
 0x565   :  { %2655 = vmatpush1.bf16.msra.mxu0 %v7670_v54  ;;  %2698 = vmatpush1.bf16.msra.mxu1 %v7671_v20  ;;  %v7681_v54 = vld [vmem:[#allocation67_spill] sm:$0xff]  ;;  %v7682_v20 = vld [vmem:[#allocation68_spill] sm:$0xff] }
 0x566   :  { %2656 = vmatprep.subr.bf16.mxu0 %v7672_v57  ;;  %2699 = vmatprep.subr.bf16.mxu1 %v7673_v48  ;;  %v7683_v57 = vld [vmem:[#allocation69_spill] sm:$0xff]  ;;  %v7684_v48 = vld [vmem:[#allocation70_spill] sm:$0xff] }
 0x569   :  { %2657 = vmatpush1.bf16.msra.mxu0 %v7674_v49  ;;  %2700 = vmatpush1.bf16.msra.mxu1 %v7675_v53  ;;  %v7685_v49 = vld [vmem:[#allocation71_spill] sm:$0xff]  ;;  %v7686_v53 = vld [vmem:[#allocation72_spill] sm:$0xff] }
 0x56a   :  { %2658 = vmatprep.subr.bf16.mxu0 %v7676_v17  ;;  %2701 = vmatprep.subr.bf16.mxu1 %v7677_v46  ;;  %v7687_v17 = vld [vmem:[#allocation73_spill] sm:$0xff]  ;;  %v6349_v46 = vld [vmem:[#allocation5 + $0x4] ss:$16 sps:$4 sm:$0xff]  }
 0x56b   :  { %7688 = vst [vmem:[#allocation28_spill] sm:$0xff] %v6349_v46 }
 0x56d   :  { %2659 = vmatpush1.bf16.msra.mxu0 %v7678_v29  ;;  %2702 = vmatpush1.bf16.msra.mxu1 %v7679_v56  ;;  %v6352_v56 = vld [vmem:[#allocation5 + $0xc] ss:$16 sps:$4 sm:$0xff]  }
 0x56e   :  { %2660 = vmatprep.subr.bf16.mxu0 %v7680_v59  ;;  %2703 = vmatprep.subr.bf16.mxu1 %v7681_v54  ;;  %7689 = vst [vmem:[#allocation29_spill] sm:$0xff] %v6352_v56  ;;  %v7690_v59 = vld [vmem:[#allocation12_spill] sm:$0xff] }
 0x571   :  { %2661 = vmatpush1.bf16.msra.mxu0 %v7682_v20  ;;  %2704 = vmatpush1.bf16.msra.mxu1 %v7683_v57 }
 0x572   :  { %2662 = vmatprep.subr.bf16.mxu0 %v7684_v48  ;;  %2705 = vmatprep.subr.bf16.mxu1 %v7685_v49 }
 0x575   :  { %2663 = vmatpush1.bf16.msra.mxu0 %v7686_v53  ;;  %2706 = vmatpush1.bf16.msra.mxu1 %v7687_v17 }
 0x576   :  { %2784 = vmatprep.subr.bf16.mxu0 %v6349_v46  ;;  %2827 = vmatprep.subr.bf16.mxu1 %v6352_v56 }
 0x5eb   :  { %v2371_v54 = vpop.f32.mrb[44].mxu0  ;;  %v2414_v20 = vpop.f32.mrb[44].mxu1 }
 0x5ec   :  { %v2423_v57 = vadd.f32 %v2371_v54, %v7690_v59  ;;  %v2373_v29 = vpop.f32.mrb[45].mxu0  ;;  %v2416_v48 = vpop.f32.mrb[45].mxu1  ;;  %v7691_v54 = vld [vmem:[#allocation14_spill] sm:$0xff] }
 0x5ed   :  { %v2424_v49 = vadd.f32 %v2373_v29, %v5759_v25  ;;  %v2375_v14 = vpop.f32.mrb[46].mxu0  ;;  %v2418_v53 = vpop.f32.mrb[46].mxu1  ;;  %v2425_v51 = vadd.f32 %v2414_v20, %v7691_v54  ;;  %v2426_v29 = vadd.f32 %v2416_v48, %v7692_v58 }
 0x5ee   :  { %v3958_v5 = vmul.f32 -1.442695, %v2423_v57  ;;  %v2427_v17 = vadd.f32 %v2375_v14, %v7690_v59  ;;  %v2377_v60 = vpop.f32.mrb[47].mxu0  ;;  %v2420_v23 = vpop.f32.mrb[47].mxu1  ;;  %v2429_v14 = vadd.f32 %v2418_v53, %v7691_v54 }
 0x5ef   :  { %v3960_v46 = vmul.f32 -1.442695, %v2424_v49  ;;  %v2428_v36 = vadd.f32 %v2377_v60, %v5759_v25  ;;  %v3962_v60 = vmul.f32 -1.442695, %v2426_v29 }
 0x5f0   :  { %4618 = vpow2.f32 %v3958_v5  ;;  %v3959_v56 = vmul.f32 -1.442695, %v2427_v17  ;;  %v2430_v5 = vadd.f32 %v2420_v23, %v7692_v58 }
 0x5f1   :  { %4620 = vpow2.f32 %v3960_v46  ;;  %v3961_v12 = vmul.f32 -1.442695, %v2428_v36 }
 0x5f2   :  { %4622 = vpow2.f32 %v3959_v56  ;;  %v3963_v20 = vmul.f32 -1.442695, %v2430_v5 }
 0x5f3   :  { %4624 = vpow2.f32 %v3961_v12 }
 0x5f4   :  { %4626 = vtanh.f32 %v2425_v51 }
 0x5fa   :  { %v4619_v63 = vpop.eup %4618 }
 0x5fb   :  { %v4621_v45 = vpop.eup %4620  ;;  %v2437_v57 = vadd.f32 1.0, %v4619_v63 }
 0x5fc   :  { %v2449_v59 = vadd.f32 1.0, %v4621_v45  ;;  %v4623_v49 = vpop.eup %4622 }
 0x5fd   :  { %4628 = vrcp.f32 %v2437_v57  ;;  %v2438_v36 = vadd.f32 1.0, %v4623_v49  ;;  %v4625_v17 = vpop.eup %4624 }
 0x5fe   :  { %4630 = vrcp.f32 %v2449_v59  ;;  %v2450_v12 = vadd.f32 1.0, %v4625_v17  ;;  %v4627_v63 = vpop.eup %4626 }
 0x5ff   :  { %4632 = vtanh.f32 %v2429_v14 }
 0x600   :  { %4634 = vrcp.f32 %v2438_v36 }
 0x601   :  { %4636 = vpow2.f32 %v3962_v60 }
 0x602   :  { %4638 = vrcp.f32 %v2450_v12 }
 0x603   :  { %4640 = vpow2.f32 %v3963_v20 }
 0x607   :  { %v4629_v48 = vpop.eup %4628 }
 0x608   :  { %v4631_v53 = vpop.eup %4630  ;;  %v2471_v51 = vmul.f32 %v4629_v48, %v4627_v63 }
 0x609   :  { %v4633_v45 = vpop.eup %4632  ;;  %v2469_v46 = vmul.f32 %v4631_v53, %v6230_v50 }
 0x60a   :  { %v4635_v56 = vpop.eup %4634 }
 0x60b   :  { %v4637_v29 = vpop.eup %4636  ;;  %v6364_v23 = vadd.f32 %v2471_v51, %v2469_v46  ;;  %v2472_v59 = vmul.f32 %v4635_v56, %v4633_v45  ;;  %v2523_v57 = vpop.f32.mrb[16].mxu0 }
 0x60c   :  { %v2566_v14 = vpop.f32.mrb[16].mxu1  ;;  %v4639_v49 = vpop.eup %4638  ;;  %v4066_v60 = vadd.f32 %v2523_v57, %v7551_v15  ;;  %v2463_v48 = vadd.f32 1.0, %v4637_v29 }
 0x60d   :  { %v2525_v5 = vpop.f32.mrb[17].mxu0  ;;  %v2568_v36 = vpop.f32.mrb[17].mxu1  ;;  %v2470_v17 = vmul.f32 %v4639_v49, %v6236_v16  ;;  %v4098_v29 = vadd.f32 %v2566_v14, %v7506_v26 }
 0x60e   :  { %v4067_v12 = vadd.f32 %v2525_v5, %v7552_v21  ;;  %v2527_v20 = vpop.f32.mrb[18].mxu0  ;;  %v2570_v63 = vpop.f32.mrb[18].mxu1  ;;  %v3964_v50 = vmul.f32 -1.442695, %v4066_v60  ;;  %v4099_v5 = vadd.f32 %v2568_v36, %v5631_v24 }
 0x60f   :  { %v4068_v53 = vadd.f32 %v2527_v20, %v7551_v15  ;;  %v2529_v51 = vpop.f32.mrb[19].mxu0  ;;  %v2572_v46 = vpop.f32.mrb[19].mxu1  ;;  %v6370_v56 = vadd.f32 %v2472_v59, %v2470_v17  ;;  %v4100_v17 = vadd.f32 %v2570_v63, %v7506_v26 }
 0x610   :  { %v4641_v45 = vpop.eup %4640  ;;  %v3966_v58 = vmul.f32 -1.442695, %v4067_v12  ;;  %v4069_v57 = vadd.f32 %v2529_v51, %v7552_v21  ;;  %4642 = vpow2.f32 %v3964_v50  ;;  %v3968_v59 = vmul.f32 -1.442695, %v4099_v5 }
 0x611   :  { %v3965_v54 = vmul.f32 -1.442695, %v4068_v53  ;;  %v2464_v49 = vadd.f32 1.0, %v4641_v45  ;;  %v4101_v60 = vadd.f32 %v2572_v46, %v5631_v24 }
 0x612   :  { %4644 = vpow2.f32 %v3966_v58  ;;  %v3967_v16 = vmul.f32 -1.442695, %v4069_v57 }
 0x613   :  { %4646 = vrcp.f32 %v2463_v48  ;;  %v3969_v36 = vmul.f32 -1.442695, %v4101_v60 }
 0x614   :  { %4648 = vpow2.f32 %v3965_v54 }
 0x615   :  { %4650 = vtanh.f32 %v6364_v23 }
 0x616   :  { %4652 = vpow2.f32 %v3967_v16 }
 0x617   :  { %4654 = vrcp.f32 %v2464_v49 }
 0x618   :  { %4656 = vtanh.f32 %v6370_v56 }
 0x619   :  { %4658 = vtanh.f32 %v4098_v29 }
 0x61a   :  { %v4643_v58 = vpop.eup %4642  ;;  %4660 = vpow2.f32 %v3968_v59 }
 0x61b   :  { %v2589_v20 = vadd.f32 1.0, %v4643_v58  ;;  %4662 = vtanh.f32 %v4100_v17 }
 0x61c   :  { %v4645_v12 = vpop.eup %4644 }
 0x61d   :  { %v4647_v54 = vpop.eup %4646  ;;  %v2601_v48 = vadd.f32 1.0, %v4645_v12  ;;  %4664 = vrcp.f32 %v2589_v20 }
 0x61e   :  { %v4649_v50 = vpop.eup %4648 }
 0x61f   :  { %v4651_v53 = vpop.eup %4650  ;;  %4666 = vrcp.f32 %v2601_v48  ;;  %v2590_v14 = vadd.f32 1.0, %v4649_v50 }
 0x620   :  { %v4653_v51 = vpop.eup %4652  ;;  %4668 = vpow2.f32 %v3969_v36  ;;  %v2477_v57 = vmul.f32 %v4651_v53, %v4647_v54 }
 0x621   :  { %v4655_v46 = vpop.eup %4654  ;;  %4670 = vrcp.f32 %v2590_v14  ;;  %v2602_v45 = vadd.f32 1.0, %v4653_v51 }
 0x622   :  { %v4657_v63 = vpop.eup %4656 }
 0x623   :  { %4672 = vrcp.f32 %v2602_v45  ;;  %v2478_v16 = vmul.f32 %v4657_v63, %v4655_v46  ;;  %v4659_v49 = vpop.eup %4658 }
 0x624   :  { %v4661_v29 = vpop.eup %4660 }
 0x625   :  { %v2479_v5 = vpack.c.bf16 %v2478_v16, %v2477_v57  ;;  %v4663_v59 = vpop.eup %4662  ;;  %v2615_v48 = vadd.f32 1.0, %v4661_v29  ;;  %v6394_v29 = vld [vmem:[#allocation5 + $0x8] ss:$16 sps:$4 sm:$0xff]  }
 0x627   :  { %2664 = vmatprep.mubr.bf16.mxu0 %v2479_v5  ;;  %2707 = vmatprep.mubr.bf16.mxu1 %v2479_v5  ;;  %v4665_v60 = vpop.eup %4664  ;;  %4674 = vrcp.f32 %v2615_v48  ;;  %v6420_v48 = vld [vmem:[#allocation5 + $0x48] ss:$16 sps:$4 sm:$0xff]  }
 0x628   :  { %v2623_v58 = vmul.f32 %v4665_v60, %v4659_v49  ;;  %v6400_v60 = vld [vmem:[#allocation5 + $0x2c] ss:$16 sps:$4 sm:$0xff]  }
 0x629   :  { %v4667_v17 = vpop.eup %4666 }
 0x62a   :  { %v4669_v12 = vpop.eup %4668  ;;  %v2621_v20 = vmul.f32 %v4667_v17, %v6246_v1  ;;  %v6405_v17 = vld [vmem:[#allocation5 + $0x20] ss:$16 sps:$4 sm:$0xff]  }
 0x62b   :  { %v4671_v36 = vpop.eup %4670  ;;  %v2616_v54 = vadd.f32 1.0, %v4669_v12  ;;  %v6411_v12 = vld [vmem:[#allocation5 + $0x44] ss:$16 sps:$4 sm:$0xff]  }
 0x62c   :  { %v6380_v50 = vadd.f32 %v2623_v58, %v2621_v20  ;;  %v2624_v14 = vmul.f32 %v4671_v36, %v4663_v59  ;;  %v6397_v59 = vld [vmem:[#allocation5 + $0x24] ss:$16 sps:$4 sm:$0xff]   ;;  %v6408_v58 = vld [vmem:[#allocation5 + $0x28] ss:$16 sps:$4 sm:$0xff]   ;;  %v6414_v20 = vld [vmem:[#allocation5 + $0x4c] ss:$16 sps:$4 sm:$0xff]  }
 0x62d   :  { %v4673_v51 = vpop.eup %4672  ;;  %v6417_v36 = vld [vmem:[#allocation5 + $0x40] ss:$16 sps:$4 sm:$0xff]  }
 0x62e   :  { %v2622_v53 = vmul.f32 %v4673_v51, %v6250_v55  ;;  %4676 = vtanh.f32 %v6380_v50  ;;  %v6391_v55 = vld [vmem:[#allocation5] ss:$16 sps:$4 sm:$0xff]   ;;  %v6426_v51 = vld [vmem:[#allocation5 + $0x6c] ss:$16 sps:$4 sm:$0xff]  }
 0x62f   :  { %4678 = vrcp.f32 %v2616_v54  ;;  %v6429_v54 = vld [vmem:[#allocation5 + $0x60] ss:$16 sps:$4 sm:$0xff]  }
 0x630   :  { %v6384_v46 = vadd.f32 %v2624_v14, %v2622_v53  ;;  %v6423_v14 = vld [vmem:[#allocation5 + $0x64] ss:$16 sps:$4 sm:$0xff]   ;;  %v6432_v53 = vld [vmem:[#allocation5 + $0x68] ss:$16 sps:$4 sm:$0xff]  }
 0x631   :  { %v4675_v45 = vpop.eup %4674 }
 0x632   :  { %4680 = vtanh.f32 %v6384_v46 }
 0x638   :  { %v4677_v63 = vpop.eup %4676 }
 0x639   :  { %v4679_v1 = vpop.eup %4678  ;;  %v2629_v16 = vmul.f32 %v4677_v63, %v4675_v45  ;;  %v6435_v45 = vld [vmem:[#allocation5 + $0x84] ss:$16 sps:$4 sm:$0xff]   ;;  %v6438_v63 = vld [vmem:[#allocation5 + $0x8c] ss:$16 sps:$4 sm:$0xff]  }
 0x63a   :  { %7693 = vst [vmem:[#allocation30_spill] sm:$0xff] %v6435_v45  ;;  %7694 = vst [vmem:[#allocation31_spill] sm:$0xff] %v6438_v63 }
 0x63c   :  { %v4681_v57 = vpop.eup %4680 }
 0x63d   :  { %v2630_v49 = vmul.f32 %v4681_v57, %v4679_v1  ;;  %v6441_v1 = vld [vmem:[#allocation5 + $0x80] ss:$16 sps:$4 sm:$0xff]   ;;  %v6444_v57 = vld [vmem:[#allocation5 + $0x88] ss:$16 sps:$4 sm:$0xff]  }
 0x63e   :  { %7695 = vst [vmem:[#allocation32_spill] sm:$0xff] %v6441_v1  ;;  %7696 = vst [vmem:[#allocation33_spill] sm:$0xff] %v6444_v57 }
 0x63f   :  { %v6387_v5 = vpack.c.bf16 %v2630_v49, %v2629_v16  ;;  %v6447_v16 = vld [vmem:[#allocation5 + $0xa4] ss:$16 sps:$4 sm:$0xff]   ;;  %v6450_v49 = vld [vmem:[#allocation5 + $0xac] ss:$16 sps:$4 sm:$0xff]  }
 0x640   :  { %7697 = vst [vmem:[#allocation34_spill] sm:$0xff] %v6447_v16  ;;  %7698 = vst [vmem:[#allocation35_spill] sm:$0xff] %v6450_v49 }
 0x641   :  { %2665 = vmatmul.mubr.bf16.vlgmr.msra.gmra.mrb[48].mxu0 %v6387_v5  ;;  %2708 = vmatmul.mubr.bf16.vlgmr.msra.gmra.mrb[48].mxu1 %v6387_v5 }
 0x642   :  { %2785 = vmatpush1.bf16.msra.mxu0 %v6391_v55  ;;  %2828 = vmatpush1.bf16.msra.mxu1 %v6394_v29 }
 0x643   :  { %2786 = vmatprep.subr.bf16.mxu0 %v6397_v59  ;;  %2829 = vmatprep.subr.bf16.mxu1 %v6400_v60 }
 0x644   :  { %2816 = vmatprep.mubr.bf16.mxu0 %v7443_v35  ;;  %2859 = vmatprep.mubr.bf16.mxu1 %v7443_v35 }
 0x646   :  { %2787 = vmatpush1.bf16.msra.mxu0 %v6405_v17  ;;  %2830 = vmatpush1.bf16.msra.mxu1 %v6408_v58 }
 0x647   :  { %2788 = vmatprep.subr.bf16.mxu0 %v6411_v12  ;;  %2831 = vmatprep.subr.bf16.mxu1 %v6414_v20 }
 0x64a   :  { %2789 = vmatpush1.bf16.msra.mxu0 %v6417_v36  ;;  %2832 = vmatpush1.bf16.msra.mxu1 %v6420_v48 }
 0x64b   :  { %2790 = vmatprep.subr.bf16.mxu0 %v6423_v14  ;;  %2833 = vmatprep.subr.bf16.mxu1 %v6426_v51 }
 0x64e   :  { %2791 = vmatpush1.bf16.msra.mxu0 %v6429_v54  ;;  %2834 = vmatpush1.bf16.msra.mxu1 %v6432_v53 }
 0x64f   :  { %2792 = vmatprep.subr.bf16.mxu0 %v6435_v45  ;;  %2835 = vmatprep.subr.bf16.mxu1 %v6438_v63  ;;  %v6453_v45 = vld [vmem:[#allocation5 + $0xa0] ss:$16 sps:$4 sm:$0xff]   ;;  %v6456_v63 = vld [vmem:[#allocation5 + $0xa8] ss:$16 sps:$4 sm:$0xff]  }
 0x650   :  { %7699 = vst [vmem:[#allocation64_spill] sm:$0xff] %v6453_v45  ;;  %7700 = vst [vmem:[#allocation36_spill] sm:$0xff] %v6456_v63 }
 0x652   :  { %2793 = vmatpush1.bf16.msra.mxu0 %v6441_v1  ;;  %2836 = vmatpush1.bf16.msra.mxu1 %v6444_v57  ;;  %v6459_v1 = vld [vmem:[#allocation5 + $0xc4] ss:$16 sps:$4 sm:$0xff]   ;;  %v6462_v57 = vld [vmem:[#allocation5 + $0xcc] ss:$16 sps:$4 sm:$0xff]  }
 0x653   :  { %2794 = vmatprep.subr.bf16.mxu0 %v6447_v16  ;;  %2837 = vmatprep.subr.bf16.mxu1 %v6450_v49  ;;  %7701 = vst [vmem:[#allocation37_spill] sm:$0xff] %v6459_v1  ;;  %7702 = vst [vmem:[#allocation38_spill] sm:$0xff] %v6462_v57  ;;  %v6465_v16 = vld [vmem:[#allocation5 + $0xc0] ss:$16 sps:$4 sm:$0xff]   ;;  %v6468_v49 = vld [vmem:[#allocation5 + $0xc8] ss:$16 sps:$4 sm:$0xff]  }
 0x654   :  { %7703 = vst [vmem:[#allocation39_spill] sm:$0xff] %v6465_v16  ;;  %7704 = vst [vmem:[#allocation40_spill] sm:$0xff] %v6468_v49 }
 0x656   :  { %2795 = vmatpush1.bf16.msra.mxu0 %v6453_v45  ;;  %2838 = vmatpush1.bf16.msra.mxu1 %v6456_v63  ;;  %v6471_v45 = vld [vmem:[#allocation5 + $0xe4] ss:$16 sps:$4 sm:$0xff]   ;;  %v6474_v63 = vld [vmem:[#allocation5 + $0xec] ss:$16 sps:$4 sm:$0xff]  }
 0x657   :  { %2796 = vmatprep.subr.bf16.mxu0 %v6459_v1  ;;  %2839 = vmatprep.subr.bf16.mxu1 %v6462_v57  ;;  %v6477_v1 = vld [vmem:[#allocation5 + $0xe0] ss:$16 sps:$4 sm:$0xff]   ;;  %v6480_v57 = vld [vmem:[#allocation5 + $0xe8] ss:$16 sps:$4 sm:$0xff]  }
 0x65a   :  { %2797 = vmatpush1.bf16.msra.mxu0 %v6465_v16  ;;  %2840 = vmatpush1.bf16.msra.mxu1 %v6468_v49  ;;  %v6483_v16 = vld [vmem:[#allocation7 + $0x4] ss:$16 sps:$4 sm:$0xff]   ;;  %v6486_v49 = vld [vmem:[#allocation7 + $0xc] ss:$16 sps:$4 sm:$0xff]  }
 0x65b   :  { %2798 = vmatprep.subr.bf16.mxu0 %v6471_v45  ;;  %2841 = vmatprep.subr.bf16.mxu1 %v6474_v63 }
 0x65e   :  { %2799 = vmatpush1.bf16.msra.mxu0 %v6477_v1  ;;  %2842 = vmatpush1.bf16.msra.mxu1 %v6480_v57 }
 0x65f   :  { %2927 = vmatprep.subr.bf16.mxu0 %v6483_v16  ;;  %2970 = vmatprep.subr.bf16.mxu1 %v6486_v49 }
 0x661   :  { %2817 = vmatmul.mubr.bf16.vlgmr.msra.gmra.mrb[20].mxu0 %v6387_v5  ;;  %2860 = vmatmul.mubr.bf16.vlgmr.msra.gmra.mrb[20].mxu1 %v6387_v5  ;;  %v7736_v5 = vld [vmem:[#allocation12_spill] sm:$0xff] }
 0x662   :  { %2928 = vmatpush1.bf16.msra.mxu0 %v6033_v47  ;;  %2971 = vmatpush1.bf16.msra.mxu1 %v7627_v28  ;;  %v7705_v47 = vld [vmem:[#allocation59_spill] sm:$0xff]  ;;  %v7706_v28 = vld [vmem:[#allocation60_spill] sm:$0xff] }
 0x663   :  { %2929 = vmatprep.subr.bf16.mxu0 %v7628_v8  ;;  %2972 = vmatprep.subr.bf16.mxu1 %v7629_v34  ;;  %v7707_v8 = vld [vmem:[#allocation61_spill] sm:$0xff]  ;;  %v7708_v34 = vld [vmem:[#allocation10_spill] sm:$0xff] }
 0x666   :  { %2930 = vmatpush1.bf16.msra.mxu0 %v7630_v6  ;;  %2973 = vmatpush1.bf16.msra.mxu1 %v7631_v9  ;;  %v7709_v6 = vld [vmem:[#allocation11_spill] sm:$0xff]  ;;  %v7710_v9 = vld [vmem:[#allocation62_spill] sm:$0xff] }
 0x667   :  { %2931 = vmatprep.subr.bf16.mxu0 %v7632_v3  ;;  %2974 = vmatprep.subr.bf16.mxu1 %v7633_v27  ;;  %v7711_v3 = vld [vmem:[#allocation63_spill] sm:$0xff] }
 0x668   :  { %v7712_v27 = vld [vmem:[#allocation15_spill] sm:$0xff] }
 0x66a   :  { %2932 = vmatpush1.bf16.msra.mxu0 %v7634_v52  ;;  %2975 = vmatpush1.bf16.msra.mxu1 %v7635_v61  ;;  %v7713_v52 = vld [vmem:[#allocation16_spill] sm:$0xff]  ;;  %v7714_v61 = vld [vmem:[#allocation17_spill] sm:$0xff] }
 0x66b   :  { %2933 = vmatprep.subr.bf16.mxu0 %v7636_v33  ;;  %2976 = vmatprep.subr.bf16.mxu1 %v7637_v22  ;;  %v7715_v33 = vld [vmem:[#allocation18_spill] sm:$0xff]  ;;  %v7716_v22 = vld [vmem:[#allocation19_spill] sm:$0xff] }
 0x66e   :  { %2934 = vmatpush1.bf16.msra.mxu0 %v7638_v4  ;;  %2977 = vmatpush1.bf16.msra.mxu1 %v7639_v31  ;;  %v7717_v4 = vld [vmem:[#allocation20_spill] sm:$0xff]  ;;  %v7718_v31 = vld [vmem:[#allocation21_spill] sm:$0xff] }
 0x66f   :  { %2935 = vmatprep.subr.bf16.mxu0 %v7640_v43  ;;  %2978 = vmatprep.subr.bf16.mxu1 %v7641_v10  ;;  %v7719_v43 = vld [vmem:[#allocation22_spill] sm:$0xff]  ;;  %v7720_v10 = vld [vmem:[#allocation23_spill] sm:$0xff] }
 0x672   :  { %2936 = vmatpush1.bf16.msra.mxu0 %v7642_v11  ;;  %2979 = vmatpush1.bf16.msra.mxu1 %v7643_v2  ;;  %v7721_v11 = vld [vmem:[#allocation24_spill] sm:$0xff]  ;;  %v7722_v2 = vld [vmem:[#allocation25_spill] sm:$0xff] }
 0x673   :  { %2937 = vmatprep.subr.bf16.mxu0 %v7644_v0  ;;  %2980 = vmatprep.subr.bf16.mxu1 %v7645_v32  ;;  %v7723_v0 = vld [vmem:[#allocation26_spill] sm:$0xff]  ;;  %v7724_v32 = vld [vmem:[#allocation27_spill] sm:$0xff] }
 0x676   :  { %2938 = vmatpush1.bf16.msra.mxu0 %v7646_v62  ;;  %2981 = vmatpush1.bf16.msra.mxu1 %v7647_v30  ;;  %v7725_v62 = vld [vmem:[#allocation65_spill] sm:$0xff]  ;;  %v7726_v30 = vld [vmem:[#allocation66_spill] sm:$0xff] }
 0x677   :  { %2939 = vmatprep.subr.bf16.mxu0 %v7648_v13  ;;  %2982 = vmatprep.subr.bf16.mxu1 %v7649_v18  ;;  %v7727_v13 = vld [vmem:[#allocation67_spill] sm:$0xff]  ;;  %v7728_v18 = vld [vmem:[#allocation68_spill] sm:$0xff] }
 0x67a   :  { %2940 = vmatpush1.bf16.msra.mxu0 %v7650_v19  ;;  %2983 = vmatpush1.bf16.msra.mxu1 %v7651_v37  ;;  %v7729_v19 = vld [vmem:[#allocation69_spill] sm:$0xff]  ;;  %v7730_v37 = vld [vmem:[#allocation70_spill] sm:$0xff] }
 0x67b   :  { %2941 = vmatprep.subr.bf16.mxu0 %v7652_v38  ;;  %2984 = vmatprep.subr.bf16.mxu1 %v7653_v39  ;;  %v7731_v38 = vld [vmem:[#allocation71_spill] sm:$0xff]  ;;  %v7732_v39 = vld [vmem:[#allocation72_spill] sm:$0xff] }
 0x67e   :  { %2942 = vmatpush1.bf16.msra.mxu0 %v7654_v40  ;;  %2985 = vmatpush1.bf16.msra.mxu1 %v7655_v7  ;;  %v7733_v40 = vld [vmem:[#allocation73_spill] sm:$0xff]  ;;  %v7734_v7 = vld [vmem:[#allocation28_spill] sm:$0xff] }
 0x67f   :  { %2943 = vmatprep.subr.bf16.mxu0 %v7656_v41  ;;  %2986 = vmatprep.subr.bf16.mxu1 %v7657_v42  ;;  %v7735_v41 = vld [vmem:[#allocation29_spill] sm:$0xff] }
 0x682   :  { %2944 = vmatpush1.bf16.msra.mxu0 %v7658_v44  ;;  %2987 = vmatpush1.bf16.msra.mxu1 %v7705_v47 }
 0x683   :  { %2945 = vmatprep.subr.bf16.mxu0 %v7706_v28  ;;  %2988 = vmatprep.subr.bf16.mxu1 %v7707_v8 }
 0x686   :  { %2946 = vmatpush1.bf16.msra.mxu0 %v7708_v34  ;;  %2989 = vmatpush1.bf16.msra.mxu1 %v7709_v6 }
 0x687   :  { %2947 = vmatprep.subr.bf16.mxu0 %v7710_v9  ;;  %2990 = vmatprep.subr.bf16.mxu1 %v7711_v3 }
 0x68a   :  { %2948 = vmatpush1.bf16.msra.mxu0 %v7712_v27  ;;  %2991 = vmatpush1.bf16.msra.mxu1 %v7713_v52 }
 0x68b   :  { %2949 = vmatprep.subr.bf16.mxu0 %v7714_v61  ;;  %2992 = vmatprep.subr.bf16.mxu1 %v7715_v33 }
 0x68e   :  { %2950 = vmatpush1.bf16.msra.mxu0 %v7716_v22  ;;  %2993 = vmatpush1.bf16.msra.mxu1 %v7717_v4 }
 0x68f   :  { %2951 = vmatprep.subr.bf16.mxu0 %v7718_v31  ;;  %2994 = vmatprep.subr.bf16.mxu1 %v7719_v43  ;;  %v7737_v43 = vld [vmem:[#allocation14_spill] sm:$0xff] }
 0x692   :  { %2952 = vmatpush1.bf16.msra.mxu0 %v7720_v10  ;;  %2995 = vmatpush1.bf16.msra.mxu1 %v7721_v11  ;;  %v7738_v11 = vld [vmem:[#allocation13_spill] sm:$0xff] }
 0x693   :  { %2953 = vmatprep.subr.bf16.mxu0 %v7722_v2  ;;  %2996 = vmatprep.subr.bf16.mxu1 %v7723_v0 }
 0x696   :  { %2954 = vmatpush1.bf16.msra.mxu0 %v7724_v32  ;;  %2997 = vmatpush1.bf16.msra.mxu1 %v7725_v62 }
 0x697   :  { %2955 = vmatprep.subr.bf16.mxu0 %v7726_v30  ;;  %2998 = vmatprep.subr.bf16.mxu1 %v7727_v13 }
 0x69a   :  { %2956 = vmatpush1.bf16.msra.mxu0 %v7728_v18  ;;  %2999 = vmatpush1.bf16.msra.mxu1 %v7729_v19 }
 0x69b   :  { %2957 = vmatprep.subr.bf16.mxu0 %v7730_v37  ;;  %3000 = vmatprep.subr.bf16.mxu1 %v7731_v38 }
 0x69e   :  { %2958 = vmatpush1.bf16.msra.mxu0 %v7732_v39  ;;  %3001 = vmatpush1.bf16.msra.mxu1 %v7733_v40 }
 0x69f   :  { %3079 = vmatprep.subr.bf16.mxu0 %v7734_v7  ;;  %3122 = vmatprep.subr.bf16.mxu1 %v7735_v41 }
 0x714   :  { %v2666_v42 = vpop.f32.mrb[48].mxu0  ;;  %v2709_v44 = vpop.f32.mrb[48].mxu1 }
 0x715   :  { %v2718_v47 = vadd.f32 %v2666_v42, %v7736_v5  ;;  %v2668_v28 = vpop.f32.mrb[49].mxu0  ;;  %v2711_v8 = vpop.f32.mrb[49].mxu1  ;;  %v2720_v10 = vadd.f32 %v2709_v44, %v7737_v43 }
 0x716   :  { %v2719_v34 = vadd.f32 %v2668_v28, %v5759_v25  ;;  %v2670_v6 = vpop.f32.mrb[50].mxu0  ;;  %v2713_v9 = vpop.f32.mrb[50].mxu1  ;;  %v2721_v2 = vadd.f32 %v2711_v8, %v7738_v11 }
 0x717   :  { %v3970_v3 = vmul.f32 -1.442695, %v2718_v47  ;;  %v2722_v27 = vadd.f32 %v2670_v6, %v7736_v5  ;;  %v2672_v52 = vpop.f32.mrb[51].mxu0  ;;  %v2715_v61 = vpop.f32.mrb[51].mxu1  ;;  %v2724_v30 = vadd.f32 %v2713_v9, %v7737_v43 }
 0x718   :  { %v3972_v33 = vmul.f32 -1.442695, %v2719_v34  ;;  %v2723_v22 = vadd.f32 %v2672_v52, %v5759_v25  ;;  %v3974_v19 = vmul.f32 -1.442695, %v2721_v2  ;;  %v2725_v37 = vadd.f32 %v2715_v61, %v7738_v11 }
 0x719   :  { %4682 = vpow2.f32 %v3970_v3  ;;  %v3971_v4 = vmul.f32 -1.442695, %v2722_v27 }
 0x71a   :  { %4684 = vpow2.f32 %v3972_v33  ;;  %v3973_v31 = vmul.f32 -1.442695, %v2723_v22  ;;  %v3975_v42 = vmul.f32 -1.442695, %v2725_v37 }
 0x71b   :  { %4686 = vpow2.f32 %v3971_v4 }
 0x71c   :  { %4688 = vpow2.f32 %v3973_v31 }
 0x71d   :  { %4690 = vtanh.f32 %v2720_v10 }
 0x723   :  { %v4683_v0 = vpop.eup %4682 }
 0x724   :  { %v4685_v32 = vpop.eup %4684  ;;  %v2732_v62 = vadd.f32 1.0, %v4683_v0 }
 0x725   :  { %v2744_v13 = vadd.f32 1.0, %v4685_v32  ;;  %v4687_v18 = vpop.eup %4686 }
 0x726   :  { %4692 = vrcp.f32 %v2732_v62  ;;  %v2733_v38 = vadd.f32 1.0, %v4687_v18  ;;  %v4689_v39 = vpop.eup %4688 }
 0x727   :  { %4694 = vrcp.f32 %v2744_v13  ;;  %v2745_v40 = vadd.f32 1.0, %v4689_v39  ;;  %v4691_v44 = vpop.eup %4690 }
 0x728   :  { %4696 = vtanh.f32 %v2724_v30 }
 0x729   :  { %4698 = vrcp.f32 %v2733_v38 }
 0x72a   :  { %4700 = vpow2.f32 %v3974_v19 }
 0x72b   :  { %4702 = vrcp.f32 %v2745_v40 }
 0x72c   :  { %4704 = vpow2.f32 %v3975_v42 }
 0x730   :  { %v4693_v47 = vpop.eup %4692 }
 0x731   :  { %v4695_v28 = vpop.eup %4694  ;;  %v2766_v8 = vmul.f32 %v4693_v47, %v4691_v44 }
 0x732   :  { %v4697_v34 = vpop.eup %4696  ;;  %v2764_v6 = vmul.f32 %v4695_v28, %v6364_v23 }
 0x733   :  { %v4699_v9 = vpop.eup %4698 }
 0x734   :  { %v4701_v3 = vpop.eup %4700  ;;  %v6564_v27 = vadd.f32 %v2766_v8, %v2764_v6  ;;  %v2767_v52 = vmul.f32 %v4699_v9, %v4697_v34  ;;  %v2818_v61 = vpop.f32.mrb[20].mxu0 }
 0x735   :  { %v2861_v33 = vpop.f32.mrb[20].mxu1  ;;  %v4703_v22 = vpop.eup %4702  ;;  %v4070_v4 = vadd.f32 %v2818_v61, %v7551_v15  ;;  %v2758_v30 = vadd.f32 1.0, %v4701_v3 }
 0x736   :  { %v2820_v31 = vpop.f32.mrb[21].mxu0  ;;  %v2863_v10 = vpop.f32.mrb[21].mxu1  ;;  %v2765_v2 = vmul.f32 %v4703_v22, %v6370_v56  ;;  %v4102_v28 = vadd.f32 %v2861_v33, %v7506_v26 }
 0x737   :  { %v4071_v0 = vadd.f32 %v2820_v31, %v7552_v21  ;;  %v2822_v32 = vpop.f32.mrb[22].mxu0  ;;  %v2865_v62 = vpop.f32.mrb[22].mxu1  ;;  %v3976_v23 = vmul.f32 -1.442695, %v4070_v4  ;;  %v4103_v47 = vadd.f32 %v2863_v10, %v5631_v24 }
 0x738   :  { %v4072_v13 = vadd.f32 %v2822_v32, %v7551_v15  ;;  %v2824_v18 = vpop.f32.mrb[23].mxu0  ;;  %v2867_v19 = vpop.f32.mrb[23].mxu1  ;;  %v6570_v38 = vadd.f32 %v2767_v52, %v2765_v2  ;;  %v4104_v6 = vadd.f32 %v2865_v62, %v7506_v26 }
 0x739   :  { %v4705_v37 = vpop.eup %4704  ;;  %v3978_v39 = vmul.f32 -1.442695, %v4071_v0  ;;  %v4073_v40 = vadd.f32 %v2824_v18, %v7552_v21  ;;  %4706 = vpow2.f32 %v3976_v23  ;;  %v3980_v8 = vmul.f32 -1.442695, %v4103_v47 }
 0x73a   :  { %v3977_v42 = vmul.f32 -1.442695, %v4072_v13  ;;  %v2759_v44 = vadd.f32 1.0, %v4705_v37  ;;  %v4105_v34 = vadd.f32 %v2867_v19, %v5631_v24 }
 0x73b   :  { %4708 = vpow2.f32 %v3978_v39  ;;  %v3979_v56 = vmul.f32 -1.442695, %v4073_v40 }
 0x73c   :  { %4710 = vrcp.f32 %v2758_v30  ;;  %v3981_v61 = vmul.f32 -1.442695, %v4105_v34 }
 0x73d   :  { %4712 = vpow2.f32 %v3977_v42 }
 0x73e   :  { %4714 = vtanh.f32 %v6564_v27 }
 0x73f   :  { %4716 = vpow2.f32 %v3979_v56 }
 0x740   :  { %4718 = vrcp.f32 %v2759_v44 }
 0x741   :  { %4720 = vtanh.f32 %v6570_v38 }
 0x742   :  { %4722 = vtanh.f32 %v4102_v28 }
 0x743   :  { %v4707_v9 = vpop.eup %4706  ;;  %4724 = vpow2.f32 %v3980_v8 }
 0x744   :  { %v2884_v52 = vadd.f32 1.0, %v4707_v9  ;;  %4726 = vtanh.f32 %v4104_v6 }
 0x745   :  { %v4709_v3 = vpop.eup %4708 }
 0x746   :  { %v4711_v22 = vpop.eup %4710  ;;  %v2896_v4 = vadd.f32 1.0, %v4709_v3  ;;  %4728 = vrcp.f32 %v2884_v52 }
 0x747   :  { %v4713_v31 = vpop.eup %4712 }
 0x748   :  { %v4715_v10 = vpop.eup %4714  ;;  %4730 = vrcp.f32 %v2896_v4  ;;  %v2885_v33 = vadd.f32 1.0, %v4713_v31 }
 0x749   :  { %v4717_v2 = vpop.eup %4716  ;;  %4732 = vpow2.f32 %v3981_v61  ;;  %v2772_v30 = vmul.f32 %v4715_v10, %v4711_v22 }
 0x74a   :  { %v4719_v0 = vpop.eup %4718  ;;  %4734 = vrcp.f32 %v2885_v33  ;;  %v2897_v32 = vadd.f32 1.0, %v4717_v2  ;;  %v7740_v2 = vld [vmem:[#allocation31_spill] sm:$0xff] }
 0x74b   :  { %v4721_v62 = vpop.eup %4720 }
 0x74c   :  { %4736 = vrcp.f32 %v2897_v32  ;;  %v2773_v23 = vmul.f32 %v4721_v62, %v4719_v0  ;;  %v4723_v13 = vpop.eup %4722  ;;  %v7741_v0 = vld [vmem:[#allocation32_spill] sm:$0xff]  ;;  %v7742_v32 = vld [vmem:[#allocation33_spill] sm:$0xff]  ;;  %v7743_v62 = vld [vmem:[#allocation34_spill] sm:$0xff] }
 0x74d   :  { %v4725_v19 = vpop.eup %4724 }
 0x74e   :  { %v2774_v18 = vpack.c.bf16 %v2773_v23, %v2772_v30  ;;  %v4727_v37 = vpop.eup %4726  ;;  %v2910_v28 = vadd.f32 1.0, %v4725_v19  ;;  %v7744_v30 = vld [vmem:[#allocation35_spill] sm:$0xff]  ;;  %v7745_v23 = vld [vmem:[#allocation64_spill] sm:$0xff]  ;;  %v7748_v19 = vld [vmem:[#allocation38_spill] sm:$0xff] }
 0x750   :  { %2959 = vmatprep.mubr.bf16.mxu0 %v2774_v18  ;;  %3002 = vmatprep.mubr.bf16.mxu1 %v2774_v18  ;;  %v4729_v39 = vpop.eup %4728  ;;  %4738 = vrcp.f32 %v2910_v28  ;;  %v7747_v18 = vld [vmem:[#allocation37_spill] sm:$0xff] }
 0x751   :  { %v2918_v42 = vmul.f32 %v4729_v39, %v4723_v13  ;;  %v7746_v13 = vld [vmem:[#allocation36_spill] sm:$0xff]  ;;  %v6636_v28 = vld [vmem:[#allocation7 + $0x28] ss:$16 sps:$4 sm:$0xff]  }
 0x752   :  { %v4731_v40 = vpop.eup %4730  ;;  %v7750_v39 = vld [vmem:[#allocation40_spill] sm:$0xff]  ;;  %7755 = vst [vmem:[#allocation45_spill] sm:$0xff] %v6636_v28 }
 0x753   :  { %v4733_v56 = vpop.eup %4732  ;;  %v2916_v44 = vmul.f32 %v4731_v40, %v6380_v50  ;;  %v6621_v40 = vld [vmem:[#allocation7] ss:$16 sps:$4 sm:$0xff]  }
 0x754   :  { %v4735_v47 = vpop.eup %4734  ;;  %v2911_v9 = vadd.f32 1.0, %v4733_v56  ;;  %v6627_v56 = vld [vmem:[#allocation7 + $0x24] ss:$16 sps:$4 sm:$0xff]  }
 0x755   :  { %v6580_v8 = vadd.f32 %v2918_v42, %v2916_v44  ;;  %v2919_v34 = vmul.f32 %v4735_v47, %v4727_v37  ;;  %v7749_v37 = vld [vmem:[#allocation39_spill] sm:$0xff]  ;;  %7752 = vst [vmem:[#allocation42_spill] sm:$0xff] %v6627_v56  ;;  %v6633_v47 = vld [vmem:[#allocation7 + $0x20] ss:$16 sps:$4 sm:$0xff]  }
 0x756   :  { %v4737_v6 = vpop.eup %4736  ;;  %v6624_v42 = vld [vmem:[#allocation7 + $0x8] ss:$16 sps:$4 sm:$0xff]   ;;  %v6630_v44 = vld [vmem:[#allocation7 + $0x2c] ss:$16 sps:$4 sm:$0xff]   ;;  %7754 = vst [vmem:[#allocation44_spill] sm:$0xff] %v6633_v47 }
 0x757   :  { %v2917_v3 = vmul.f32 %v4737_v6, %v6384_v46  ;;  %4740 = vtanh.f32 %v6580_v8  ;;  %v7739_v46 = vld [vmem:[#allocation30_spill] sm:$0xff]  ;;  %7751 = vst [vmem:[#allocation41_spill] sm:$0xff] %v6624_v42  ;;  %7753 = vst [vmem:[#allocation43_spill] sm:$0xff] %v6630_v44  ;;  %v6642_v6 = vld [vmem:[#allocation7 + $0x4c] ss:$16 sps:$4 sm:$0xff]  }
 0x758   :  { %4742 = vrcp.f32 %v2911_v9  ;;  %7757 = vst [vmem:[#allocation47_spill] sm:$0xff] %v6642_v6  ;;  %v6645_v9 = vld [vmem:[#allocation7 + $0x40] ss:$16 sps:$4 sm:$0xff]  }
 0x759   :  { %v6584_v52 = vadd.f32 %v2919_v34, %v2917_v3  ;;  %v6639_v34 = vld [vmem:[#allocation7 + $0x44] ss:$16 sps:$4 sm:$0xff]   ;;  %7758 = vst [vmem:[#allocation48_spill] sm:$0xff] %v6645_v9  ;;  %v6648_v3 = vld [vmem:[#allocation7 + $0x48] ss:$16 sps:$4 sm:$0xff]  }
 0x75a   :  { %v4739_v61 = vpop.eup %4738  ;;  %7756 = vst [vmem:[#allocation46_spill] sm:$0xff] %v6639_v34  ;;  %7759 = vst [vmem:[#allocation49_spill] sm:$0xff] %v6648_v3 }
 0x75b   :  { %4744 = vtanh.f32 %v6584_v52 }
 0x761   :  { %v4741_v22 = vpop.eup %4740 }
 0x762   :  { %v4743_v50 = vpop.eup %4742  ;;  %v2924_v31 = vmul.f32 %v4741_v22, %v4739_v61  ;;  %v6651_v61 = vld [vmem:[#allocation7 + $0x64] ss:$16 sps:$4 sm:$0xff]   ;;  %v6654_v22 = vld [vmem:[#allocation7 + $0x6c] ss:$16 sps:$4 sm:$0xff]  }
 0x763   :  { %7760 = vst [vmem:[#allocation50_spill] sm:$0xff] %v6651_v61  ;;  %7761 = vst [vmem:[#allocation51_spill] sm:$0xff] %v6654_v22 }
 0x765   :  { %v4745_v4 = vpop.eup %4744 }
 0x766   :  { %v2925_v10 = vmul.f32 %v4745_v4, %v4743_v50  ;;  %v6657_v50 = vld [vmem:[#allocation7 + $0x60] ss:$16 sps:$4 sm:$0xff]   ;;  %v6660_v4 = vld [vmem:[#allocation7 + $0x68] ss:$16 sps:$4 sm:$0xff]  }
 0x767   :  { %7762 = vst [vmem:[#allocation52_spill] sm:$0xff] %v6657_v50  ;;  %7763 = vst [vmem:[#allocation53_spill] sm:$0xff] %v6660_v4 }
 0x768   :  { %v2926_v33 = vpack.c.bf16 %v2925_v10, %v2924_v31  ;;  %v6663_v31 = vld [vmem:[#allocation7 + $0x84] ss:$16 sps:$4 sm:$0xff]   ;;  %v6666_v10 = vld [vmem:[#allocation7 + $0x8c] ss:$16 sps:$4 sm:$0xff]  }
 0x769   :  { %7764 = vst [vmem:[#allocation54_spill] sm:$0xff] %v6663_v31  ;;  %7765 = vst [vmem:[#allocation55_spill] sm:$0xff] %v6666_v10 }
 0x76a   :  { %2960 = vmatmul.mubr.bf16.vlgmr.msra.gmra.mrb[52].mxu0 %v2926_v33  ;;  %3003 = vmatmul.mubr.bf16.vlgmr.msra.gmra.mrb[52].mxu1 %v2926_v33 }
 0x76b   :  { %3080 = vmatpush1.bf16.msra.mxu0 %v6391_v55  ;;  %3123 = vmatpush1.bf16.msra.mxu1 %v6394_v29 }
 0x76c   :  { %3081 = vmatprep.subr.bf16.mxu0 %v6397_v59  ;;  %3124 = vmatprep.subr.bf16.mxu1 %v6400_v60 }
 0x76d   :  { %3111 = vmatprep.mubr.bf16.mxu0 %v7443_v35  ;;  %3154 = vmatprep.mubr.bf16.mxu1 %v7443_v35 }
 0x76f   :  { %3082 = vmatpush1.bf16.msra.mxu0 %v6405_v17  ;;  %3125 = vmatpush1.bf16.msra.mxu1 %v6408_v58 }
 0x770   :  { %3083 = vmatprep.subr.bf16.mxu0 %v6411_v12  ;;  %3126 = vmatprep.subr.bf16.mxu1 %v6414_v20 }
 0x773   :  { %3084 = vmatpush1.bf16.msra.mxu0 %v6417_v36  ;;  %3127 = vmatpush1.bf16.msra.mxu1 %v6420_v48 }
 0x774   :  { %3085 = vmatprep.subr.bf16.mxu0 %v6423_v14  ;;  %3128 = vmatprep.subr.bf16.mxu1 %v6426_v51 }
 0x777   :  { %3086 = vmatpush1.bf16.msra.mxu0 %v6429_v54  ;;  %3129 = vmatpush1.bf16.msra.mxu1 %v6432_v53 }
 0x778   :  { %3087 = vmatprep.subr.bf16.mxu0 %v7739_v46  ;;  %3130 = vmatprep.subr.bf16.mxu1 %v7740_v2 }
 0x77b   :  { %3088 = vmatpush1.bf16.msra.mxu0 %v7741_v0  ;;  %3131 = vmatpush1.bf16.msra.mxu1 %v7742_v32 }
 0x77c   :  { %3089 = vmatprep.subr.bf16.mxu0 %v7743_v62  ;;  %3132 = vmatprep.subr.bf16.mxu1 %v7744_v30 }
 0x77f   :  { %3090 = vmatpush1.bf16.msra.mxu0 %v7745_v23  ;;  %3133 = vmatpush1.bf16.msra.mxu1 %v7746_v13 }
 0x780   :  { %3091 = vmatprep.subr.bf16.mxu0 %v7747_v18  ;;  %3134 = vmatprep.subr.bf16.mxu1 %v7748_v19 }
 0x783   :  { %3092 = vmatpush1.bf16.msra.mxu0 %v7749_v37  ;;  %3135 = vmatpush1.bf16.msra.mxu1 %v7750_v39 }
 0x784   :  { %3093 = vmatprep.subr.bf16.mxu0 %v6471_v45  ;;  %3136 = vmatprep.subr.bf16.mxu1 %v6474_v63 }
 0x787   :  { %3094 = vmatpush1.bf16.msra.mxu0 %v6477_v1  ;;  %3137 = vmatpush1.bf16.msra.mxu1 %v6480_v57 }
 0x788   :  { %3222 = vmatprep.subr.bf16.mxu0 %v6483_v16  ;;  %3265 = vmatprep.subr.bf16.mxu1 %v6486_v49 }
 0x78a   :  { %3112 = vmatmul.mubr.bf16.vlgmr.msra.gmra.mrb[24].mxu0 %v2926_v33  ;;  %3155 = vmatmul.mubr.bf16.vlgmr.msra.gmra.mrb[24].mxu1 %v2926_v33  ;;  %v6669_v33 = vld [vmem:[#allocation7 + $0x80] ss:$16 sps:$4 sm:$0xff]  }
 0x78b   :  { %3223 = vmatpush1.bf16.msra.mxu0 %v6621_v40  ;;  %3266 = vmatpush1.bf16.msra.mxu1 %v6624_v42  ;;  %7766 = vst [vmem:[#allocation56_spill] sm:$0xff] %v6669_v33 }
 0x78c   :  { %3224 = vmatprep.subr.bf16.mxu0 %v6627_v56  ;;  %3267 = vmatprep.subr.bf16.mxu1 %v6630_v44 }
 0x78f   :  { %3225 = vmatpush1.bf16.msra.mxu0 %v6633_v47  ;;  %3268 = vmatpush1.bf16.msra.mxu1 %v6636_v28 }
 0x790   :  { %3226 = vmatprep.subr.bf16.mxu0 %v6639_v34  ;;  %3269 = vmatprep.subr.bf16.mxu1 %v6642_v6 }
 0x793   :  { %3227 = vmatpush1.bf16.msra.mxu0 %v6645_v9  ;;  %3270 = vmatpush1.bf16.msra.mxu1 %v6648_v3 }
 0x794   :  { %3228 = vmatprep.subr.bf16.mxu0 %v6651_v61  ;;  %3271 = vmatprep.subr.bf16.mxu1 %v6654_v22  ;;  %v6672_v22 = vld [vmem:[#allocation7 + $0x88] ss:$16 sps:$4 sm:$0xff]  }
 0x795   :  { %7767 = vst [vmem:[#allocation57_spill] sm:$0xff] %v6672_v22 }
 0x797   :  { %3229 = vmatpush1.bf16.msra.mxu0 %v6657_v50  ;;  %3272 = vmatpush1.bf16.msra.mxu1 %v6660_v4  ;;  %v6675_v50 = vld [vmem:[#allocation7 + $0xa4] ss:$16 sps:$4 sm:$0xff]   ;;  %v6678_v4 = vld [vmem:[#allocation7 + $0xac] ss:$16 sps:$4 sm:$0xff]  }
 0x798   :  { %3230 = vmatprep.subr.bf16.mxu0 %v6663_v31  ;;  %3273 = vmatprep.subr.bf16.mxu1 %v6666_v10  ;;  %7768 = vst [vmem:[#allocation58_spill] sm:$0xff] %v6675_v50  ;;  %7769 = vst [vmem:[#allocation59_spill] sm:$0xff] %v6678_v4  ;;  %v6681_v31 = vld [vmem:[#allocation7 + $0xa0] ss:$16 sps:$4 sm:$0xff]   ;;  %v6684_v10 = vld [vmem:[#allocation7 + $0xa8] ss:$16 sps:$4 sm:$0xff]  }
 0x799   :  { %7770 = vst [vmem:[#allocation60_spill] sm:$0xff] %v6681_v31  ;;  %7771 = vst [vmem:[#allocation61_spill] sm:$0xff] %v6684_v10 }
 0x79b   :  { %3231 = vmatpush1.bf16.msra.mxu0 %v6669_v33  ;;  %3274 = vmatpush1.bf16.msra.mxu1 %v6672_v22  ;;  %v6687_v33 = vld [vmem:[#allocation7 + $0xc4] ss:$16 sps:$4 sm:$0xff]   ;;  %v6690_v22 = vld [vmem:[#allocation7 + $0xcc] ss:$16 sps:$4 sm:$0xff]  }
 0x79c   :  { %3232 = vmatprep.subr.bf16.mxu0 %v6675_v50  ;;  %3275 = vmatprep.subr.bf16.mxu1 %v6678_v4  ;;  %7772 = vst [vmem:[#allocation10_spill] sm:$0xff] %v6687_v33  ;;  %7773 = vst [vmem:[#allocation11_spill] sm:$0xff] %v6690_v22  ;;  %v6693_v50 = vld [vmem:[#allocation7 + $0xc0] ss:$16 sps:$4 sm:$0xff]   ;;  %v6696_v4 = vld [vmem:[#allocation7 + $0xc8] ss:$16 sps:$4 sm:$0xff]  }
 0x79d   :  { %7774 = vst [vmem:[#allocation62_spill] sm:$0xff] %v6693_v50  ;;  %7775 = vst [vmem:[#allocation63_spill] sm:$0xff] %v6696_v4 }
 0x79f   :  { %3233 = vmatpush1.bf16.msra.mxu0 %v6681_v31  ;;  %3276 = vmatpush1.bf16.msra.mxu1 %v6684_v10  ;;  %v6699_v31 = vld [vmem:[#allocation7 + $0xe4] ss:$16 sps:$4 sm:$0xff]   ;;  %v6702_v10 = vld [vmem:[#allocation7 + $0xec] ss:$16 sps:$4 sm:$0xff]  }
 0x7a0   :  { %3234 = vmatprep.subr.bf16.mxu0 %v6687_v33  ;;  %3277 = vmatprep.subr.bf16.mxu1 %v6690_v22  ;;  %7776 = vst [vmem:[#allocation15_spill] sm:$0xff] %v6699_v31  ;;  %7777 = vst [vmem:[#allocation16_spill] sm:$0xff] %v6702_v10  ;;  %v6705_v33 = vld [vmem:[#allocation7 + $0xe0] ss:$16 sps:$4 sm:$0xff]   ;;  %v6708_v22 = vld [vmem:[#allocation7 + $0xe8] ss:$16 sps:$4 sm:$0xff]  }
 0x7a1   :  { %7778 = vst [vmem:[#allocation17_spill] sm:$0xff] %v6705_v33  ;;  %7779 = vst [vmem:[#allocation18_spill] sm:$0xff] %v6708_v22 }
 0x7a3   :  { %3235 = vmatpush1.bf16.msra.mxu0 %v6693_v50  ;;  %3278 = vmatpush1.bf16.msra.mxu1 %v6696_v4  ;;  %v6711_v50 = vld [vmem:[#allocation7 + $0x104] ss:$16 sps:$4 sm:$0xff]   ;;  %v6714_v4 = vld [vmem:[#allocation7 + $0x10c] ss:$16 sps:$4 sm:$0xff]  }
 0x7a4   :  { %3236 = vmatprep.subr.bf16.mxu0 %v6699_v31  ;;  %3279 = vmatprep.subr.bf16.mxu1 %v6702_v10  ;;  %7780 = vst [vmem:[#allocation19_spill] sm:$0xff] %v6711_v50  ;;  %7781 = vst [vmem:[#allocation20_spill] sm:$0xff] %v6714_v4  ;;  %v6717_v31 = vld [vmem:[#allocation7 + $0x100] ss:$16 sps:$4 sm:$0xff]   ;;  %v6720_v10 = vld [vmem:[#allocation7 + $0x108] ss:$16 sps:$4 sm:$0xff]  }
 0x7a5   :  { %7782 = vst [vmem:[#allocation21_spill] sm:$0xff] %v6717_v31  ;;  %7783 = vst [vmem:[#allocation22_spill] sm:$0xff] %v6720_v10 }
 0x7a7   :  { %3237 = vmatpush1.bf16.msra.mxu0 %v6705_v33  ;;  %3280 = vmatpush1.bf16.msra.mxu1 %v6708_v22  ;;  %v6723_v33 = vld [vmem:[#allocation7 + $0x124] ss:$16 sps:$4 sm:$0xff]   ;;  %v6726_v22 = vld [vmem:[#allocation7 + $0x12c] ss:$16 sps:$4 sm:$0xff]  }
 0x7a8   :  { %3238 = vmatprep.subr.bf16.mxu0 %v6711_v50  ;;  %3281 = vmatprep.subr.bf16.mxu1 %v6714_v4  ;;  %7784 = vst [vmem:[#allocation23_spill] sm:$0xff] %v6723_v33  ;;  %7785 = vst [vmem:[#allocation24_spill] sm:$0xff] %v6726_v22  ;;  %v6729_v50 = vld [vmem:[#allocation7 + $0x120] ss:$16 sps:$4 sm:$0xff]   ;;  %v6732_v4 = vld [vmem:[#allocation7 + $0x128] ss:$16 sps:$4 sm:$0xff]  }
 0x7a9   :  { %7786 = vst [vmem:[#allocation25_spill] sm:$0xff] %v6729_v50  ;;  %7787 = vst [vmem:[#allocation26_spill] sm:$0xff] %v6732_v4 }
 0x7ab   :  { %3239 = vmatpush1.bf16.msra.mxu0 %v6717_v31  ;;  %3282 = vmatpush1.bf16.msra.mxu1 %v6720_v10  ;;  %v6735_v31 = vld [vmem:[#allocation7 + $0x144] ss:$16 sps:$4 sm:$0xff]   ;;  %v6738_v10 = vld [vmem:[#allocation7 + $0x14c] ss:$16 sps:$4 sm:$0xff]  }
 0x7ac   :  { %3240 = vmatprep.subr.bf16.mxu0 %v6723_v33  ;;  %3283 = vmatprep.subr.bf16.mxu1 %v6726_v22  ;;  %7788 = vst [vmem:[#allocation27_spill] sm:$0xff] %v6735_v31  ;;  %7789 = vst [vmem:[#allocation65_spill] sm:$0xff] %v6738_v10  ;;  %v6741_v33 = vld [vmem:[#allocation7 + $0x140] ss:$16 sps:$4 sm:$0xff]   ;;  %v6744_v22 = vld [vmem:[#allocation7 + $0x148] ss:$16 sps:$4 sm:$0xff]  }
 0x7ad   :  { %7790 = vst [vmem:[#allocation66_spill] sm:$0xff] %v6741_v33  ;;  %7791 = vst [vmem:[#allocation67_spill] sm:$0xff] %v6744_v22 }
 0x7af   :  { %3241 = vmatpush1.bf16.msra.mxu0 %v6729_v50  ;;  %3284 = vmatpush1.bf16.msra.mxu1 %v6732_v4  ;;  %v6747_v50 = vld [vmem:[#allocation7 + $0x164] ss:$16 sps:$4 sm:$0xff]   ;;  %v6750_v4 = vld [vmem:[#allocation7 + $0x16c] ss:$16 sps:$4 sm:$0xff]  }
 0x7b0   :  { %3242 = vmatprep.subr.bf16.mxu0 %v6735_v31  ;;  %3285 = vmatprep.subr.bf16.mxu1 %v6738_v10  ;;  %7792 = vst [vmem:[#allocation68_spill] sm:$0xff] %v6747_v50  ;;  %7793 = vst [vmem:[#allocation69_spill] sm:$0xff] %v6750_v4  ;;  %v6753_v31 = vld [vmem:[#allocation7 + $0x160] ss:$16 sps:$4 sm:$0xff]   ;;  %v6756_v10 = vld [vmem:[#allocation7 + $0x168] ss:$16 sps:$4 sm:$0xff]  }
 0x7b1   :  { %7794 = vst [vmem:[#allocation70_spill] sm:$0xff] %v6753_v31  ;;  %7795 = vst [vmem:[#allocation71_spill] sm:$0xff] %v6756_v10 }
 0x7b3   :  { %3243 = vmatpush1.bf16.msra.mxu0 %v6741_v33  ;;  %3286 = vmatpush1.bf16.msra.mxu1 %v6744_v22  ;;  %v6759_v33 = vld [vmem:[#allocation7 + $0x184] ss:$16 sps:$4 sm:$0xff]   ;;  %v6762_v22 = vld [vmem:[#allocation7 + $0x18c] ss:$16 sps:$4 sm:$0xff]  }
 0x7b4   :  { %3244 = vmatprep.subr.bf16.mxu0 %v6747_v50  ;;  %3287 = vmatprep.subr.bf16.mxu1 %v6750_v4  ;;  %7796 = vst [vmem:[#allocation72_spill] sm:$0xff] %v6759_v33  ;;  %7797 = vst [vmem:[#allocation73_spill] sm:$0xff] %v6762_v22  ;;  %v6765_v50 = vld [vmem:[#allocation7 + $0x180] ss:$16 sps:$4 sm:$0xff]   ;;  %v6768_v4 = vld [vmem:[#allocation7 + $0x188] ss:$16 sps:$4 sm:$0xff]  }
 0x7b5   :  { %7798 = vst [vmem:[#allocation28_spill] sm:$0xff] %v6765_v50  ;;  %7799 = vst [vmem:[#allocation29_spill] sm:$0xff] %v6768_v4 }
 0x7b7   :  { %3245 = vmatpush1.bf16.msra.mxu0 %v6753_v31  ;;  %3288 = vmatpush1.bf16.msra.mxu1 %v6756_v10  ;;  %v6771_v31 = vld [vmem:[#allocation7 + $0x1a4] ss:$16 sps:$4 sm:$0xff]   ;;  %v6774_v10 = vld [vmem:[#allocation7 + $0x1ac] ss:$16 sps:$4 sm:$0xff]  }
 0x7b8   :  { %3246 = vmatprep.subr.bf16.mxu0 %v6759_v33  ;;  %3289 = vmatprep.subr.bf16.mxu1 %v6762_v22  ;;  %7800 = vst [vmem:[#allocation30_spill] sm:$0xff] %v6771_v31  ;;  %7801 = vst [vmem:[#allocation31_spill] sm:$0xff] %v6774_v10  ;;  %v6777_v33 = vld [vmem:[#allocation7 + $0x1a0] ss:$16 sps:$4 sm:$0xff]   ;;  %v6780_v22 = vld [vmem:[#allocation7 + $0x1a8] ss:$16 sps:$4 sm:$0xff]  }
 0x7b9   :  { %7802 = vst [vmem:[#allocation32_spill] sm:$0xff] %v6777_v33  ;;  %7803 = vst [vmem:[#allocation33_spill] sm:$0xff] %v6780_v22 }
 0x7bb   :  { %3247 = vmatpush1.bf16.msra.mxu0 %v6765_v50  ;;  %3290 = vmatpush1.bf16.msra.mxu1 %v6768_v4  ;;  %v6783_v50 = vld [vmem:[#allocation7 + $0x1c4] ss:$16 sps:$4 sm:$0xff]   ;;  %v6786_v4 = vld [vmem:[#allocation7 + $0x1cc] ss:$16 sps:$4 sm:$0xff]  }
 0x7bc   :  { %3248 = vmatprep.subr.bf16.mxu0 %v6771_v31  ;;  %3291 = vmatprep.subr.bf16.mxu1 %v6774_v10  ;;  %7804 = vst [vmem:[#allocation34_spill] sm:$0xff] %v6783_v50  ;;  %7805 = vst [vmem:[#allocation35_spill] sm:$0xff] %v6786_v4  ;;  %v6789_v31 = vld [vmem:[#allocation7 + $0x1c0] ss:$16 sps:$4 sm:$0xff]   ;;  %v6792_v10 = vld [vmem:[#allocation7 + $0x1c8] ss:$16 sps:$4 sm:$0xff]  }
 0x7bd   :  { %7806 = vst [vmem:[#allocation64_spill] sm:$0xff] %v6789_v31  ;;  %7807 = vst [vmem:[#allocation36_spill] sm:$0xff] %v6792_v10 }
 0x7bf   :  { %3249 = vmatpush1.bf16.msra.mxu0 %v6777_v33  ;;  %3292 = vmatpush1.bf16.msra.mxu1 %v6780_v22  ;;  %v6795_v33 = vld [vmem:[#allocation7 + $0x1e4] ss:$16 sps:$4 sm:$0xff]   ;;  %v6798_v22 = vld [vmem:[#allocation7 + $0x1ec] ss:$16 sps:$4 sm:$0xff]  }
 0x7c0   :  { %3250 = vmatprep.subr.bf16.mxu0 %v6783_v50  ;;  %3293 = vmatprep.subr.bf16.mxu1 %v6786_v4  ;;  %7808 = vst [vmem:[#allocation37_spill] sm:$0xff] %v6795_v33  ;;  %7809 = vst [vmem:[#allocation38_spill] sm:$0xff] %v6798_v22  ;;  %v6801_v50 = vld [vmem:[#allocation7 + $0x1e0] ss:$16 sps:$4 sm:$0xff]   ;;  %v6804_v4 = vld [vmem:[#allocation7 + $0x1e8] ss:$16 sps:$4 sm:$0xff]  }
 0x7c1   :  { %7810 = vst [vmem:[#allocation39_spill] sm:$0xff] %v6801_v50  ;;  %7811 = vst [vmem:[#allocation40_spill] sm:$0xff] %v6804_v4 }
 0x7c3   :  { %3251 = vmatpush1.bf16.msra.mxu0 %v6789_v31  ;;  %3294 = vmatpush1.bf16.msra.mxu1 %v6792_v10 }
 0x7c4   :  { %3252 = vmatprep.subr.bf16.mxu0 %v6795_v33  ;;  %3295 = vmatprep.subr.bf16.mxu1 %v6798_v22 }
 0x7c7   :  { %3253 = vmatpush1.bf16.msra.mxu0 %v6801_v50  ;;  %3296 = vmatpush1.bf16.msra.mxu1 %v6804_v4 }
 0x7c8   :  { %3374 = vmatprep.subr.bf16.mxu0 %v7734_v7  ;;  %3417 = vmatprep.subr.bf16.mxu1 %v7735_v41 }
 0x83d   :  { %v2961_v10 = vpop.f32.mrb[52].mxu0  ;;  %v3004_v31 = vpop.f32.mrb[52].mxu1 }
 0x83e   :  { %v3013_v33 = vadd.f32 %v2961_v10, %v7736_v5  ;;  %v2963_v61 = vpop.f32.mrb[53].mxu0  ;;  %v3006_v3 = vpop.f32.mrb[53].mxu1  ;;  %v3015_v10 = vadd.f32 %v3004_v31, %v7737_v43 }
 0x83f   :  { %v3014_v22 = vadd.f32 %v2963_v61, %v5759_v25  ;;  %v2965_v9 = vpop.f32.mrb[54].mxu0  ;;  %v3008_v6 = vpop.f32.mrb[54].mxu1  ;;  %v3016_v61 = vadd.f32 %v3006_v3, %v7738_v11 }
 0x840   :  { %v3982_v34 = vmul.f32 -1.442695, %v3013_v33  ;;  %v3017_v50 = vadd.f32 %v2965_v9, %v7736_v5  ;;  %v2967_v28 = vpop.f32.mrb[55].mxu0  ;;  %v3010_v47 = vpop.f32.mrb[55].mxu1  ;;  %v3019_v9 = vadd.f32 %v3008_v6, %v7737_v43 }
 0x841   :  { %v3984_v4 = vmul.f32 -1.442695, %v3014_v22  ;;  %v3018_v7 = vadd.f32 %v2967_v28, %v5759_v25  ;;  %v3986_v28 = vmul.f32 -1.442695, %v3016_v61 }
 0x842   :  { %4746 = vpow2.f32 %v3982_v34  ;;  %v3983_v41 = vmul.f32 -1.442695, %v3017_v50  ;;  %v3020_v34 = vadd.f32 %v3010_v47, %v7738_v11 }
 0x843   :  { %4748 = vpow2.f32 %v3984_v4  ;;  %v3985_v44 = vmul.f32 -1.442695, %v3018_v7 }
 0x844   :  { %4750 = vpow2.f32 %v3983_v41  ;;  %v3987_v3 = vmul.f32 -1.442695, %v3020_v34 }
 0x845   :  { %4752 = vpow2.f32 %v3985_v44 }
 0x846   :  { %4754 = vtanh.f32 %v3015_v10 }
 0x84c   :  { %v4747_v56 = vpop.eup %4746 }
 0x84d   :  { %v4749_v42 = vpop.eup %4748  ;;  %v3027_v33 = vadd.f32 1.0, %v4747_v56 }
 0x84e   :  { %v3039_v5 = vadd.f32 1.0, %v4749_v42  ;;  %v4751_v22 = vpop.eup %4750 }
 0x84f   :  { %4756 = vrcp.f32 %v3027_v33  ;;  %v3028_v50 = vadd.f32 1.0, %v4751_v22  ;;  %v4753_v4 = vpop.eup %4752 }
 0x850   :  { %4758 = vrcp.f32 %v3039_v5  ;;  %v3040_v44 = vadd.f32 1.0, %v4753_v4  ;;  %v4755_v56 = vpop.eup %4754 }
 0x851   :  { %4760 = vtanh.f32 %v3019_v9 }
 0x852   :  { %4762 = vrcp.f32 %v3028_v50 }
 0x853   :  { %4764 = vpow2.f32 %v3986_v28 }
 0x854   :  { %4766 = vrcp.f32 %v3040_v44 }
 0x855   :  { %4768 = vpow2.f32 %v3987_v3 }
 0x859   :  { %v4757_v31 = vpop.eup %4756 }
 0x85a   :  { %v4759_v6 = vpop.eup %4758  ;;  %v3061_v7 = vmul.f32 %v4757_v31, %v4755_v56 }
 0x85b   :  { %v4761_v42 = vpop.eup %4760  ;;  %v3059_v41 = vmul.f32 %v4759_v6, %v6564_v27 }
 0x85c   :  { %v4763_v10 = vpop.eup %4762 }
 0x85d   :  { %v4765_v61 = vpop.eup %4764  ;;  %v6818_v47 = vadd.f32 %v3061_v7, %v3059_v41  ;;  %v3062_v5 = vmul.f32 %v4763_v10, %v4761_v42  ;;  %v3113_v33 = vpop.f32.mrb[24].mxu0 }
 0x85e   :  { %v3156_v9 = vpop.f32.mrb[24].mxu1  ;;  %v4767_v22 = vpop.eup %4766  ;;  %v4074_v28 = vadd.f32 %v3113_v33, %v7551_v15  ;;  %v3053_v31 = vadd.f32 1.0, %v4765_v61 }
 0x85f   :  { %v3115_v34 = vpop.f32.mrb[25].mxu0  ;;  %v3158_v50 = vpop.f32.mrb[25].mxu1  ;;  %v3060_v4 = vmul.f32 %v4767_v22, %v6570_v38  ;;  %v4106_v61 = vadd.f32 %v3156_v9, %v7506_v26 }
 0x860   :  { %v4075_v44 = vadd.f32 %v3115_v34, %v7552_v21  ;;  %v3117_v3 = vpop.f32.mrb[26].mxu0  ;;  %v3160_v56 = vpop.f32.mrb[26].mxu1  ;;  %v3988_v27 = vmul.f32 -1.442695, %v4074_v28  ;;  %v4107_v34 = vadd.f32 %v3158_v50, %v5631_v24 }
 0x861   :  { %v4076_v6 = vadd.f32 %v3117_v3, %v7551_v15  ;;  %v3119_v7 = vpop.f32.mrb[27].mxu0  ;;  %v3162_v41 = vpop.f32.mrb[27].mxu1  ;;  %v6824_v10 = vadd.f32 %v3062_v5, %v3060_v4  ;;  %v4108_v4 = vadd.f32 %v3160_v56, %v7506_v26 }
 0x862   :  { %v4769_v42 = vpop.eup %4768  ;;  %v3990_v11 = vmul.f32 -1.442695, %v4075_v44  ;;  %v4077_v33 = vadd.f32 %v3119_v7, %v7552_v21  ;;  %4770 = vpow2.f32 %v3988_v27  ;;  %v3992_v5 = vmul.f32 -1.442695, %v4107_v34 }
 0x863   :  { %v3989_v43 = vmul.f32 -1.442695, %v4076_v6  ;;  %v3054_v22 = vadd.f32 1.0, %v4769_v42  ;;  %v4109_v28 = vadd.f32 %v3162_v41, %v5631_v24 }
 0x864   :  { %4772 = vpow2.f32 %v3990_v11  ;;  %v3991_v38 = vmul.f32 -1.442695, %v4077_v33 }
 0x865   :  { %4774 = vrcp.f32 %v3053_v31  ;;  %v3993_v50 = vmul.f32 -1.442695, %v4109_v28 }
 0x866   :  { %4776 = vpow2.f32 %v3989_v43 }
 0x867   :  { %4778 = vtanh.f32 %v6818_v47 }
 0x868   :  { %4780 = vpow2.f32 %v3991_v38 }
 0x869   :  { %4782 = vrcp.f32 %v3054_v22 }
 0x86a   :  { %4784 = vtanh.f32 %v6824_v10 }
 0x86b   :  { %4786 = vtanh.f32 %v4106_v61 }
 0x86c   :  { %v4771_v11 = vpop.eup %4770  ;;  %4788 = vpow2.f32 %v3992_v5 }
 0x86d   :  { %v3179_v3 = vadd.f32 1.0, %v4771_v11  ;;  %4790 = vtanh.f32 %v4108_v4 }
 0x86e   :  { %v4773_v44 = vpop.eup %4772 }
 0x86f   :  { %v4775_v43 = vpop.eup %4774  ;;  %v3191_v31 = vadd.f32 1.0, %v4773_v44  ;;  %4792 = vrcp.f32 %v3179_v3 }
 0x870   :  { %v4777_v27 = vpop.eup %4776 }
 0x871   :  { %v4779_v6 = vpop.eup %4778  ;;  %4794 = vrcp.f32 %v3191_v31  ;;  %v3180_v9 = vadd.f32 1.0, %v4777_v27 }
 0x872   :  { %v4781_v7 = vpop.eup %4780  ;;  %4796 = vpow2.f32 %v3993_v50  ;;  %v3067_v33 = vmul.f32 %v4779_v6, %v4775_v43 }
 0x873   :  { %v4783_v41 = vpop.eup %4782  ;;  %4798 = vrcp.f32 %v3180_v9  ;;  %v3192_v42 = vadd.f32 1.0, %v4781_v7 }
 0x874   :  { %v4785_v56 = vpop.eup %4784 }
 0x875   :  { %4800 = vrcp.f32 %v3192_v42  ;;  %v3068_v38 = vmul.f32 %v4785_v56, %v4783_v41  ;;  %v4787_v22 = vpop.eup %4786 }
 0x876   :  { %v4789_v61 = vpop.eup %4788 }
 0x877   :  { %v3069_v34 = vpack.c.bf16 %v3068_v38, %v3067_v33  ;;  %v4791_v5 = vpop.eup %4790  ;;  %v3205_v31 = vadd.f32 1.0, %v4789_v61  ;;  %v7847_v61 = vld [vmem:[#allocation25_spill] sm:$0xff] }
 0x879   :  { %3254 = vmatprep.mubr.bf16.mxu0 %v3069_v34  ;;  %3297 = vmatprep.mubr.bf16.mxu1 %v3069_v34  ;;  %v4793_v28 = vpop.eup %4792  ;;  %4802 = vrcp.f32 %v3205_v31  ;;  %v7855_v31 = vld [vmem:[#allocation70_spill] sm:$0xff] }
 0x87a   :  { %v3213_v11 = vmul.f32 %v4793_v28, %v4787_v22  ;;  %v7849_v28 = vld [vmem:[#allocation27_spill] sm:$0xff] }
 0x87b   :  { %v4795_v4 = vpop.eup %4794 }
 0x87c   :  { %v4797_v44 = vpop.eup %4796  ;;  %v3211_v3 = vmul.f32 %v4795_v4, %v6580_v8  ;;  %v7850_v4 = vld [vmem:[#allocation65_spill] sm:$0xff] }
 0x87d   :  { %v4799_v50 = vpop.eup %4798  ;;  %v3206_v43 = vadd.f32 1.0, %v4797_v44  ;;  %v7852_v44 = vld [vmem:[#allocation67_spill] sm:$0xff] }
 0x87e   :  { %v6834_v27 = vadd.f32 %v3213_v11, %v3211_v3  ;;  %v3214_v9 = vmul.f32 %v4799_v50, %v4791_v5  ;;  %v7848_v5 = vld [vmem:[#allocation26_spill] sm:$0xff]  ;;  %v7853_v3 = vld [vmem:[#allocation68_spill] sm:$0xff]  ;;  %v7854_v50 = vld [vmem:[#allocation69_spill] sm:$0xff] }
 0x87f   :  { %v4801_v7 = vpop.eup %4800  ;;  %v7851_v11 = vld [vmem:[#allocation66_spill] sm:$0xff] }
 0x880   :  { %v3212_v6 = vmul.f32 %v4801_v7, %v6584_v52  ;;  %4804 = vtanh.f32 %v6834_v27  ;;  %v7833_v52 = vld [vmem:[#allocation10_spill] sm:$0xff]  ;;  %v7857_v7 = vld [vmem:[#allocation72_spill] sm:$0xff] }
 0x881   :  { %4806 = vrcp.f32 %v3206_v43  ;;  %v7858_v43 = vld [vmem:[#allocation73_spill] sm:$0xff] }
 0x882   :  { %v6838_v41 = vadd.f32 %v3214_v9, %v3212_v6  ;;  %v7856_v9 = vld [vmem:[#allocation71_spill] sm:$0xff]  ;;  %v7859_v6 = vld [vmem:[#allocation28_spill] sm:$0xff] }
 0x883   :  { %v4803_v42 = vpop.eup %4802 }
 0x884   :  { %4808 = vtanh.f32 %v6838_v41 }
 0x88a   :  { %v4805_v56 = vpop.eup %4804 }
 0x88b   :  { %v4807_v8 = vpop.eup %4806  ;;  %v3219_v38 = vmul.f32 %v4805_v56, %v4803_v42  ;;  %v7860_v42 = vld [vmem:[#allocation29_spill] sm:$0xff]  ;;  %v7861_v56 = vld [vmem:[#allocation30_spill] sm:$0xff] }
 0x88e   :  { %v4809_v33 = vpop.eup %4808 }
 0x88f   :  { %v3220_v22 = vmul.f32 %v4809_v33, %v4807_v8  ;;  %v7862_v8 = vld [vmem:[#allocation31_spill] sm:$0xff]  ;;  %v7863_v33 = vld [vmem:[#allocation32_spill] sm:$0xff] }
 0x891   :  { %v3221_v34 = vpack.c.bf16 %v3220_v22, %v3219_v38  ;;  %v7864_v38 = vld [vmem:[#allocation33_spill] sm:$0xff]  ;;  %v7865_v22 = vld [vmem:[#allocation34_spill] sm:$0xff] }
 0x893   :  { %3255 = vmatmul.mubr.bf16.vlgmr.msra.gmra.mrb[56].mxu0 %v3221_v34  ;;  %3298 = vmatmul.mubr.bf16.vlgmr.msra.gmra.mrb[56].mxu1 %v3221_v34 }
 0x894   :  { %3375 = vmatpush1.bf16.msra.mxu0 %v6391_v55  ;;  %3418 = vmatpush1.bf16.msra.mxu1 %v6394_v29  ;;  %v7813_v55 = vld [vmem:[#allocation42_spill] sm:$0xff]  ;;  %v7814_v29 = vld [vmem:[#allocation43_spill] sm:$0xff] }
 0x895   :  { %3376 = vmatprep.subr.bf16.mxu0 %v6397_v59  ;;  %3419 = vmatprep.subr.bf16.mxu1 %v6400_v60  ;;  %v7815_v59 = vld [vmem:[#allocation44_spill] sm:$0xff]  ;;  %v7816_v60 = vld [vmem:[#allocation45_spill] sm:$0xff] }
 0x896   :  { %3406 = vmatprep.mubr.bf16.mxu0 %v7443_v35  ;;  %3449 = vmatprep.mubr.bf16.mxu1 %v7443_v35  ;;  %v7812_v35 = vld [vmem:[#allocation41_spill] sm:$0xff] }
 0x898   :  { %3377 = vmatpush1.bf16.msra.mxu0 %v6405_v17  ;;  %3420 = vmatpush1.bf16.msra.mxu1 %v6408_v58  ;;  %v7817_v17 = vld [vmem:[#allocation46_spill] sm:$0xff]  ;;  %v7818_v58 = vld [vmem:[#allocation47_spill] sm:$0xff] }
 0x899   :  { %3378 = vmatprep.subr.bf16.mxu0 %v6411_v12  ;;  %3421 = vmatprep.subr.bf16.mxu1 %v6414_v20  ;;  %v7819_v12 = vld [vmem:[#allocation48_spill] sm:$0xff]  ;;  %v7820_v20 = vld [vmem:[#allocation49_spill] sm:$0xff] }
 0x89c   :  { %3379 = vmatpush1.bf16.msra.mxu0 %v6417_v36  ;;  %3422 = vmatpush1.bf16.msra.mxu1 %v6420_v48  ;;  %v7821_v36 = vld [vmem:[#allocation50_spill] sm:$0xff]  ;;  %v7822_v48 = vld [vmem:[#allocation51_spill] sm:$0xff] }
 0x89d   :  { %3380 = vmatprep.subr.bf16.mxu0 %v6423_v14  ;;  %3423 = vmatprep.subr.bf16.mxu1 %v6426_v51  ;;  %v7823_v14 = vld [vmem:[#allocation52_spill] sm:$0xff]  ;;  %v7824_v51 = vld [vmem:[#allocation53_spill] sm:$0xff] }
 0x8a0   :  { %3381 = vmatpush1.bf16.msra.mxu0 %v6429_v54  ;;  %3424 = vmatpush1.bf16.msra.mxu1 %v6432_v53  ;;  %v7825_v54 = vld [vmem:[#allocation54_spill] sm:$0xff]  ;;  %v7826_v53 = vld [vmem:[#allocation55_spill] sm:$0xff] }
 0x8a1   :  { %3382 = vmatprep.subr.bf16.mxu0 %v7739_v46  ;;  %3425 = vmatprep.subr.bf16.mxu1 %v7740_v2  ;;  %v7834_v46 = vld [vmem:[#allocation11_spill] sm:$0xff]  ;;  %v7835_v2 = vld [vmem:[#allocation62_spill] sm:$0xff] }
 0x8a4   :  { %3383 = vmatpush1.bf16.msra.mxu0 %v7741_v0  ;;  %3426 = vmatpush1.bf16.msra.mxu1 %v7742_v32  ;;  %v7836_v0 = vld [vmem:[#allocation63_spill] sm:$0xff] }
 0x8a5   :  { %3384 = vmatprep.subr.bf16.mxu0 %v7743_v62  ;;  %3427 = vmatprep.subr.bf16.mxu1 %v7744_v30  ;;  %v7837_v32 = vld [vmem:[#allocation15_spill] sm:$0xff]  ;;  %v7838_v62 = vld [vmem:[#allocation16_spill] sm:$0xff]  ;;  %v7839_v30 = vld [vmem:[#allocation17_spill] sm:$0xff] }
 0x8a8   :  { %3385 = vmatpush1.bf16.msra.mxu0 %v7745_v23  ;;  %3428 = vmatpush1.bf16.msra.mxu1 %v7746_v13  ;;  %v7840_v23 = vld [vmem:[#allocation18_spill] sm:$0xff]  ;;  %v7841_v13 = vld [vmem:[#allocation19_spill] sm:$0xff] }
 0x8a9   :  { %3386 = vmatprep.subr.bf16.mxu0 %v7747_v18  ;;  %3429 = vmatprep.subr.bf16.mxu1 %v7748_v19  ;;  %v7842_v18 = vld [vmem:[#allocation20_spill] sm:$0xff]  ;;  %v7843_v19 = vld [vmem:[#allocation21_spill] sm:$0xff] }
 0x8ac   :  { %3387 = vmatpush1.bf16.msra.mxu0 %v7749_v37  ;;  %3430 = vmatpush1.bf16.msra.mxu1 %v7750_v39  ;;  %v7844_v37 = vld [vmem:[#allocation22_spill] sm:$0xff]  ;;  %v7845_v39 = vld [vmem:[#allocation23_spill] sm:$0xff] }
 0x8ad   :  { %3388 = vmatprep.subr.bf16.mxu0 %v6471_v45  ;;  %3431 = vmatprep.subr.bf16.mxu1 %v6474_v63  ;;  %v7827_v45 = vld [vmem:[#allocation56_spill] sm:$0xff]  ;;  %v7828_v63 = vld [vmem:[#allocation57_spill] sm:$0xff] }
 0x8b0   :  { %3389 = vmatpush1.bf16.msra.mxu0 %v6477_v1  ;;  %3432 = vmatpush1.bf16.msra.mxu1 %v6480_v57  ;;  %v7829_v1 = vld [vmem:[#allocation58_spill] sm:$0xff]  ;;  %v7830_v57 = vld [vmem:[#allocation59_spill] sm:$0xff] }
 0x8b1   :  { %3517 = vmatprep.subr.bf16.mxu0 %v6483_v16  ;;  %3560 = vmatprep.subr.bf16.mxu1 %v6486_v49  ;;  %v7831_v16 = vld [vmem:[#allocation60_spill] sm:$0xff]  ;;  %v7832_v49 = vld [vmem:[#allocation61_spill] sm:$0xff] }
 0x8b3   :  { %3407 = vmatmul.mubr.bf16.vlgmr.msra.gmra.mrb[28].mxu0 %v3221_v34  ;;  %3450 = vmatmul.mubr.bf16.vlgmr.msra.gmra.mrb[28].mxu1 %v3221_v34  ;;  %v7866_v34 = vld [vmem:[#allocation35_spill] sm:$0xff] }
 0x8b4   :  { %3518 = vmatpush1.bf16.msra.mxu0 %v6621_v40  ;;  %3561 = vmatpush1.bf16.msra.mxu1 %v7812_v35  ;;  %v7846_v40 = vld [vmem:[#allocation24_spill] sm:$0xff] }
 0x8b5   :  { %3519 = vmatprep.subr.bf16.mxu0 %v7813_v55  ;;  %3562 = vmatprep.subr.bf16.mxu1 %v7814_v29  ;;  %v7867_v35 = vld [vmem:[#allocation64_spill] sm:$0xff]  ;;  %v7869_v29 = vld [vmem:[#allocation37_spill] sm:$0xff] }
 0x8b6   :  { %v7868_v55 = vld [vmem:[#allocation36_spill] sm:$0xff] }
 0x8b8   :  { %3520 = vmatpush1.bf16.msra.mxu0 %v7815_v59  ;;  %3563 = vmatpush1.bf16.msra.mxu1 %v7816_v60  ;;  %v7870_v59 = vld [vmem:[#allocation38_spill] sm:$0xff]  ;;  %v7871_v60 = vld [vmem:[#allocation39_spill] sm:$0xff] }
 0x8b9   :  { %3521 = vmatprep.subr.bf16.mxu0 %v7817_v17  ;;  %3564 = vmatprep.subr.bf16.mxu1 %v7818_v58  ;;  %v7872_v17 = vld [vmem:[#allocation40_spill] sm:$0xff] }
 0x8bc   :  { %3522 = vmatpush1.bf16.msra.mxu0 %v7819_v12  ;;  %3565 = vmatpush1.bf16.msra.mxu1 %v7820_v20  ;;  %v7873_v20 = vld [vmem:[#allocation12_spill] sm:$0xff] }
 0x8bd   :  { %3523 = vmatprep.subr.bf16.mxu0 %v7821_v36  ;;  %3566 = vmatprep.subr.bf16.mxu1 %v7822_v48 }
 0x8c0   :  { %3524 = vmatpush1.bf16.msra.mxu0 %v7823_v14  ;;  %3567 = vmatpush1.bf16.msra.mxu1 %v7824_v51 }
 0x8c1   :  { %3525 = vmatprep.subr.bf16.mxu0 %v7825_v54  ;;  %3568 = vmatprep.subr.bf16.mxu1 %v7826_v53 }
 0x8c4   :  { %3526 = vmatpush1.bf16.msra.mxu0 %v7827_v45  ;;  %3569 = vmatpush1.bf16.msra.mxu1 %v7828_v63 }
 0x8c5   :  { %3527 = vmatprep.subr.bf16.mxu0 %v7829_v1  ;;  %3570 = vmatprep.subr.bf16.mxu1 %v7830_v57 }
 0x8c8   :  { %3528 = vmatpush1.bf16.msra.mxu0 %v7831_v16  ;;  %3571 = vmatpush1.bf16.msra.mxu1 %v7832_v49 }
 0x8c9   :  { %3529 = vmatprep.subr.bf16.mxu0 %v7833_v52  ;;  %3572 = vmatprep.subr.bf16.mxu1 %v7834_v46 }
 0x8cc   :  { %3530 = vmatpush1.bf16.msra.mxu0 %v7835_v2  ;;  %3573 = vmatpush1.bf16.msra.mxu1 %v7836_v0  ;;  %v7874_v2 = vld [vmem:[#allocation14_spill] sm:$0xff] }
 0x8cd   :  { %3531 = vmatprep.subr.bf16.mxu0 %v7837_v32  ;;  %3574 = vmatprep.subr.bf16.mxu1 %v7838_v62  ;;  %v7875_v32 = vld [vmem:[#allocation13_spill] sm:$0xff] }
 0x8d0   :  { %3532 = vmatpush1.bf16.msra.mxu0 %v7839_v30  ;;  %3575 = vmatpush1.bf16.msra.mxu1 %v7840_v23 }
 0x8d1   :  { %3533 = vmatprep.subr.bf16.mxu0 %v7841_v13  ;;  %3576 = vmatprep.subr.bf16.mxu1 %v7842_v18 }
 0x8d4   :  { %3534 = vmatpush1.bf16.msra.mxu0 %v7843_v19  ;;  %3577 = vmatpush1.bf16.msra.mxu1 %v7844_v37 }
 0x8d5   :  { %3535 = vmatprep.subr.bf16.mxu0 %v7845_v39  ;;  %3578 = vmatprep.subr.bf16.mxu1 %v7846_v40 }
 0x8d8   :  { %3536 = vmatpush1.bf16.msra.mxu0 %v7847_v61  ;;  %3579 = vmatpush1.bf16.msra.mxu1 %v7848_v5 }
 0x8d9   :  { %3537 = vmatprep.subr.bf16.mxu0 %v7849_v28  ;;  %3580 = vmatprep.subr.bf16.mxu1 %v7850_v4 }
 0x8dc   :  { %3538 = vmatpush1.bf16.msra.mxu0 %v7851_v11  ;;  %3581 = vmatpush1.bf16.msra.mxu1 %v7852_v44 }
 0x8dd   :  { %3539 = vmatprep.subr.bf16.mxu0 %v7853_v3  ;;  %3582 = vmatprep.subr.bf16.mxu1 %v7854_v50 }
 0x8e0   :  { %3540 = vmatpush1.bf16.msra.mxu0 %v7855_v31  ;;  %3583 = vmatpush1.bf16.msra.mxu1 %v7856_v9 }
 0x8e1   :  { %3541 = vmatprep.subr.bf16.mxu0 %v7857_v7  ;;  %3584 = vmatprep.subr.bf16.mxu1 %v7858_v43 }
 0x8e4   :  { %3542 = vmatpush1.bf16.msra.mxu0 %v7859_v6  ;;  %3585 = vmatpush1.bf16.msra.mxu1 %v7860_v42 }
 0x8e5   :  { %3543 = vmatprep.subr.bf16.mxu0 %v7861_v56  ;;  %3586 = vmatprep.subr.bf16.mxu1 %v7862_v8 }
 0x8e8   :  { %3544 = vmatpush1.bf16.msra.mxu0 %v7863_v33  ;;  %3587 = vmatpush1.bf16.msra.mxu1 %v7864_v38 }
 0x8e9   :  { %3545 = vmatprep.subr.bf16.mxu0 %v7865_v22  ;;  %3588 = vmatprep.subr.bf16.mxu1 %v7866_v34 }
 0x8ec   :  { %3546 = vmatpush1.bf16.msra.mxu0 %v7867_v35  ;;  %3589 = vmatpush1.bf16.msra.mxu1 %v7868_v55 }
 0x8ed   :  { %3547 = vmatprep.subr.bf16.mxu0 %v7869_v29  ;;  %3590 = vmatprep.subr.bf16.mxu1 %v7870_v59 }
 0x8f0   :  { %3548 = vmatpush1.bf16.msra.mxu0 %v7871_v60  ;;  %3591 = vmatpush1.bf16.msra.mxu1 %v7872_v17 }
 0x966   :  { %v3256_v58 = vpop.f32.mrb[56].mxu0  ;;  %v3299_v12 = vpop.f32.mrb[56].mxu1 }
 0x967   :  { %v3308_v36 = vadd.f32 %v3256_v58, %v7873_v20  ;;  %v3258_v48 = vpop.f32.mrb[57].mxu0  ;;  %v3301_v14 = vpop.f32.mrb[57].mxu1  ;;  %v3310_v0 = vadd.f32 %v3299_v12, %v7874_v2 }
 0x968   :  { %v3309_v51 = vadd.f32 %v3258_v48, %v5759_v25  ;;  %v3260_v54 = vpop.f32.mrb[58].mxu0  ;;  %v3303_v53 = vpop.f32.mrb[58].mxu1  ;;  %v3311_v62 = vadd.f32 %v3301_v14, %v7875_v32 }
 0x969   :  { %v3994_v45 = vmul.f32 -1.442695, %v3308_v36  ;;  %v3312_v63 = vadd.f32 %v3260_v54, %v7873_v20  ;;  %v3262_v1 = vpop.f32.mrb[59].mxu0  ;;  %v3305_v57 = vpop.f32.mrb[59].mxu1  ;;  %v3314_v18 = vadd.f32 %v3303_v53, %v7874_v2 }
 0x96a   :  { %v3996_v16 = vmul.f32 -1.442695, %v3309_v51  ;;  %v3313_v49 = vadd.f32 %v3262_v1, %v5759_v25  ;;  %v3998_v39 = vmul.f32 -1.442695, %v3311_v62  ;;  %v3315_v40 = vadd.f32 %v3305_v57, %v7875_v32 }
 0x96b   :  { %4810 = vpow2.f32 %v3994_v45  ;;  %v3995_v52 = vmul.f32 -1.442695, %v3312_v63 }
 0x96c   :  { %4812 = vpow2.f32 %v3996_v16  ;;  %v3997_v46 = vmul.f32 -1.442695, %v3313_v49  ;;  %v3999_v4 = vmul.f32 -1.442695, %v3315_v40 }
 0x96d   :  { %4814 = vpow2.f32 %v3995_v52 }
 0x96e   :  { %4816 = vpow2.f32 %v3997_v46 }
 0x96f   :  { %4818 = vtanh.f32 %v3310_v0 }
 0x975   :  { %v4811_v30 = vpop.eup %4810 }
 0x976   :  { %v4813_v23 = vpop.eup %4812  ;;  %v3322_v13 = vadd.f32 1.0, %v4811_v30 }
 0x977   :  { %v3334_v19 = vadd.f32 1.0, %v4813_v23  ;;  %v4815_v37 = vpop.eup %4814 }
 0x978   :  { %4820 = vrcp.f32 %v3322_v13  ;;  %v3323_v61 = vadd.f32 1.0, %v4815_v37  ;;  %v4817_v5 = vpop.eup %4816 }
 0x979   :  { %4822 = vrcp.f32 %v3334_v19  ;;  %v3335_v28 = vadd.f32 1.0, %v4817_v5  ;;  %v4819_v11 = vpop.eup %4818 }
 0x97a   :  { %4824 = vtanh.f32 %v3314_v18 }
 0x97b   :  { %4826 = vrcp.f32 %v3323_v61 }
 0x97c   :  { %4828 = vpow2.f32 %v3998_v39 }
 0x97d   :  { %4830 = vrcp.f32 %v3335_v28 }
 0x97e   :  { %4832 = vpow2.f32 %v3999_v4 }
 0x982   :  { %v4821_v44 = vpop.eup %4820 }
 0x983   :  { %v4823_v3 = vpop.eup %4822  ;;  %v3356_v50 = vmul.f32 %v4821_v44, %v4819_v11 }
 0x984   :  { %v4825_v31 = vpop.eup %4824  ;;  %v3354_v9 = vmul.f32 %v4823_v3, %v6818_v47 }
 0x985   :  { %v4827_v7 = vpop.eup %4826 }
 0x986   :  { %v4829_v43 = vpop.eup %4828  ;;  %v6946_v6 = vadd.f32 %v3356_v50, %v3354_v9  ;;  %v3357_v42 = vmul.f32 %v4827_v7, %v4825_v31  ;;  %v3408_v56 = vpop.f32.mrb[28].mxu0 }
 0x987   :  { %v3451_v8 = vpop.f32.mrb[28].mxu1  ;;  %v4831_v33 = vpop.eup %4830  ;;  %v4078_v38 = vadd.f32 %v3408_v56, %v7551_v15  ;;  %v3348_v60 = vadd.f32 1.0, %v4829_v43 }
 0x988   :  { %v3410_v22 = vpop.f32.mrb[29].mxu0  ;;  %v3453_v34 = vpop.f32.mrb[29].mxu1  ;;  %v3355_v35 = vmul.f32 %v4831_v33, %v6824_v10 }
 0x989   :  { %v4079_v55 = vadd.f32 %v3410_v22, %v7552_v21  ;;  %v3412_v29 = vpop.f32.mrb[30].mxu0  ;;  %v3455_v59 = vpop.f32.mrb[30].mxu1  ;;  %v4000_v47 = vmul.f32 -1.442695, %v4078_v38  ;;  %v4111_v45 = vadd.f32 %v3453_v34, %v5631_v24 }
 0x98a   :  { %v4080_v17 = vadd.f32 %v3412_v29, %v7551_v15  ;;  %v3414_v58 = vpop.f32.mrb[31].mxu0  ;;  %v3457_v12 = vpop.f32.mrb[31].mxu1  ;;  %v6952_v48 = vadd.f32 %v3357_v42, %v3355_v35  ;;  %v4110_v15 = vadd.f32 %v3451_v8, %v7506_v26 }
 0x98b   :  { %v4833_v36 = vpop.eup %4832  ;;  %v4002_v14 = vmul.f32 -1.442695, %v4079_v55  ;;  %v4081_v51 = vadd.f32 %v3414_v58, %v7552_v21  ;;  %4834 = vpow2.f32 %v4000_v47  ;;  %v4004_v63 = vmul.f32 -1.442695, %v4111_v45  ;;  %v4389_v47 = vld [vmem:[%s7012_s6 + $0x18] sm:$0xff]   ;;  %v4391_v58 = vld [vmem:[%s7012_s6 + $0x28] sm:$0xff]  }
 0x98c   :  { %v4001_v54 = vmul.f32 -1.442695, %v4080_v17  ;;  %v3349_v53 = vadd.f32 1.0, %v4833_v36  ;;  %v4113_v1 = vadd.f32 %v3457_v12, %v5631_v24  ;;  %v4112_v21 = vadd.f32 %v3455_v59, %v7506_v26  ;;  %v4390_v17 = vld [vmem:[%s7012_s6 + $0x20] sm:$0xff]   ;;  %v4392_v12 = vld [vmem:[%s7012_s6 + $0x30] sm:$0xff]   ;;  %v4393_v36 = vld [vmem:[%s7012_s6 + $0x38] sm:$0xff]  }
 0x98d   :  { %4836 = vpow2.f32 %v4002_v14  ;;  %v4003_v10 = vmul.f32 -1.442695, %v4081_v51  ;;  %v5174_v59 = vmov 0.0  }
 0x98e   :  { %4838 = vrcp.f32 %v3348_v60  ;;  %v4005_v52 = vmul.f32 -1.442695, %v4113_v1  ;;  %4030 = vmatprep.subr.bf16.mxu0 %v5174_v59  ;;  %v4388_v60 = vld [vmem:[%s7012_s6 + $0x10] sm:$0xff]  }
 0x98f   :  { %4840 = vpow2.f32 %v4001_v54 }
 0x990   :  { %4842 = vtanh.f32 %v6946_v6 }
 0x991   :  { %4844 = vpow2.f32 %v4003_v10 }
 0x992   :  { %4846 = vrcp.f32 %v3349_v53 }
 0x993   :  { %4848 = vtanh.f32 %v6952_v48 }
 0x994   :  { %4850 = vtanh.f32 %v4110_v15 }
 0x995   :  { %v4835_v57 = vpop.eup %4834  ;;  %4852 = vpow2.f32 %v4004_v63 }
 0x996   :  { %v3474_v49 = vadd.f32 1.0, %v4835_v57  ;;  %4854 = vtanh.f32 %v4112_v21 }
 0x997   :  { %v4837_v16 = vpop.eup %4836 }
 0x998   :  { %v4839_v46 = vpop.eup %4838  ;;  %v3486_v0 = vadd.f32 1.0, %v4837_v16  ;;  %4856 = vrcp.f32 %v3474_v49 }
 0x999   :  { %v4841_v62 = vpop.eup %4840 }
 0x99a   :  { %v4843_v30 = vpop.eup %4842  ;;  %4858 = vrcp.f32 %v3486_v0  ;;  %v3475_v23 = vadd.f32 1.0, %v4841_v62 }
 0x99b   :  { %v4845_v13 = vpop.eup %4844  ;;  %4860 = vpow2.f32 %v4005_v52  ;;  %v3362_v19 = vmul.f32 %v4843_v30, %v4839_v46 }
 0x99c   :  { %v4847_v24 = vpop.eup %4846  ;;  %4862 = vrcp.f32 %v3475_v23  ;;  %v3487_v18 = vadd.f32 1.0, %v4845_v13 }
 0x99d   :  { %v4849_v26 = vpop.eup %4848 }
 0x99e   :  { %4864 = vrcp.f32 %v3487_v18  ;;  %v3363_v37 = vmul.f32 %v4849_v26, %v4847_v24  ;;  %v4851_v39 = vpop.eup %4850 }
 0x99f   :  { %v4853_v61 = vpop.eup %4852 }
 0x9a0   :  { %v3364_v40 = vpack.c.bf16 %v3363_v37, %v3362_v19  ;;  %v4855_v5 = vpop.eup %4854  ;;  %v3500_v44 = vadd.f32 1.0, %v4853_v61 }
 0x9a2   :  { %3549 = vmatprep.mubr.bf16.mxu0 %v3364_v40  ;;  %3592 = vmatprep.mubr.bf16.mxu1 %v3364_v40  ;;  %v4857_v28 = vpop.eup %4856  ;;  %4866 = vrcp.f32 %v3500_v44 }
 0x9a3   :  { %v3508_v11 = vmul.f32 %v4857_v28, %v4851_v39 }
 0x9a4   :  { %v4859_v4 = vpop.eup %4858 }
 0x9a5   :  { %v4861_v3 = vpop.eup %4860  ;;  %v3506_v50 = vmul.f32 %v4859_v4, %v6834_v27  ;;  %v4386_v27 = vld [vmem:[%s7012_s6] sm:$0xff]  }
 0x9a6   :  { %v4863_v31 = vpop.eup %4862  ;;  %v3501_v42 = vadd.f32 1.0, %v4861_v3 }
 0x9a7   :  { %v3510_v9 = vadd.f32 %v3508_v11, %v3506_v50  ;;  %v3509_v7 = vmul.f32 %v4863_v31, %v4855_v5 }
 0x9a8   :  { %v4865_v43 = vpop.eup %4864 }
 0x9a9   :  { %4868 = vtanh.f32 %v3510_v9  ;;  %v3507_v56 = vmul.f32 %v4865_v43, %v6838_v41  ;;  %v4387_v41 = vld [vmem:[%s7012_s6 + $0x8] sm:$0xff]  }
 0x9aa   :  { %4870 = vrcp.f32 %v3501_v42 }
 0x9ab   :  { %v3511_v8 = vadd.f32 %v3509_v7, %v3507_v56 }
 0x9ac   :  { %v4867_v33 = vpop.eup %4866 }
 0x9ad   :  { %4872 = vtanh.f32 %v3511_v8 }
 0x9b3   :  { %v4869_v38 = vpop.eup %4868 }
 0x9b4   :  { %v3514_v22 = vmul.f32 %v4869_v38, %v4867_v33  ;;  %v4871_v34 = vpop.eup %4870 }
 0x9b7   :  { %v4873_v35 = vpop.eup %4872 }
 0x9b8   :  { %v3515_v55 = vmul.f32 %v4873_v35, %v4871_v34 }
 0x9ba   :  { %v3516_v29 = vpack.c.bf16 %v3515_v55, %v3514_v22 }
 0x9bc   :  { %3550 = vmatmul.mubr.bf16.vlgmr.msra.gmra.mrb[60].mxu0 %v3516_v29  ;;  %3593 = vmatmul.mubr.bf16.vlgmr.msra.gmra.mrb[60].mxu1 %v3516_v29 }
 0x9bd   :  { %4031 = vmatpush3.bf16.msra.mxu0 %v4386_v27  ;;  %4046 = vmatprep.mubr.msk.bf16.mxu0 %vm5175_vm0, %v5174_v59 }
 0x9be   :  { %4032 = vmatprep.subr.bf16.mxu0 %v5174_v59 }
 0x9c1   :  { %4033 = vmatpush3.bf16.msra.mxu0 %v4387_v41 }
 0x9c2   :  { %4034 = vmatprep.subr.bf16.mxu0 %v5174_v59 }
 0x9c5   :  { %4035 = vmatpush3.bf16.msra.mxu0 %v4388_v60 }
 0x9c6   :  { %4036 = vmatprep.subr.bf16.mxu0 %v5174_v59 }
 0x9c9   :  { %4037 = vmatpush3.bf16.msra.mxu0 %v4389_v47 }
 0x9ca   :  { %4038 = vmatprep.subr.bf16.mxu0 %v5174_v59 }
 0x9cd   :  { %4039 = vmatpush3.bf16.msra.mxu0 %v4390_v17 }
 0x9ce   :  { %4040 = vmatprep.subr.bf16.mxu0 %v5174_v59 }
 0x9d1   :  { %4041 = vmatpush3.bf16.msra.mxu0 %v4391_v58 }
 0x9d2   :  { %4042 = vmatprep.subr.bf16.mxu0 %v5174_v59 }
 0x9d5   :  { %4043 = vmatpush3.bf16.msra.mxu0 %v4392_v12 }
 0x9d6   :  { %4044 = vmatprep.subr.bf16.mxu0 %v5174_v59 }
 0x9d9   :  { %4045 = vmatpush3.bf16.msra.mxu0 %v4393_v36 }
 0xa8f   :  { %v3551_v14 = vpop.f32.mrb[60].mxu0  ;;  %v3594_v51 = vpop.f32.mrb[60].mxu1 }
 0xa90   :  { %v3603_v54 = vadd.f32 %v3551_v14, %v7873_v20  ;;  %v3553_v10 = vpop.f32.mrb[61].mxu0  ;;  %v3596_v53 = vpop.f32.mrb[61].mxu1  ;;  %v3605_v30 = vadd.f32 %v3594_v51, %v7874_v2 }
 0xa91   :  { %v3604_v45 = vadd.f32 %v3553_v10, %v5759_v25  ;;  %v3555_v15 = vpop.f32.mrb[62].mxu0  ;;  %v3598_v63 = vpop.f32.mrb[62].mxu1  ;;  %v3606_v62 = vadd.f32 %v3596_v53, %v7875_v32 }
 0xa92   :  { %v4006_v1 = vmul.f32 -1.442695, %v3603_v54  ;;  %v3607_v21 = vadd.f32 %v3555_v15, %v7873_v20  ;;  %v3557_v57 = vpop.f32.mrb[63].mxu0  ;;  %v3600_v16 = vpop.f32.mrb[63].mxu1  ;;  %v3609_v20 = vadd.f32 %v3598_v63, %v7874_v2 }
 0xa93   :  { %v4008_v49 = vmul.f32 -1.442695, %v3604_v45  ;;  %v3608_v52 = vadd.f32 %v3557_v57, %v5759_v25  ;;  %v4010_v23 = vmul.f32 -1.442695, %v3606_v62  ;;  %v3610_v13 = vadd.f32 %v3600_v16, %v7875_v32 }
 0xa94   :  { %4874 = vpow2.f32 %v4006_v1  ;;  %v4007_v46 = vmul.f32 -1.442695, %v3607_v21 }
 0xa95   :  { %4876 = vpow2.f32 %v4008_v49  ;;  %v4009_v0 = vmul.f32 -1.442695, %v3608_v52  ;;  %v4011_v25 = vmul.f32 -1.442695, %v3610_v13 }
 0xa96   :  { %4878 = vpow2.f32 %v4007_v46 }
 0xa97   :  { %4880 = vpow2.f32 %v4009_v0 }
 0xa98   :  { %4882 = vtanh.f32 %v3605_v30 }
 0xa99   :  { %4884 = vpow2.f32 %v4010_v23 }
 0xa9a   :  { %4886 = vtanh.f32 %v3609_v20 }
 0xa9e   :  { %v4875_v24 = vpop.eup %4874 }
 0xa9f   :  { %v4877_v18 = vpop.eup %4876  ;;  %v3617_v26 = vadd.f32 1.0, %v4875_v24 }
 0xaa0   :  { %v3629_v19 = vadd.f32 1.0, %v4877_v18  ;;  %v4879_v37 = vpop.eup %4878 }
 0xaa1   :  { %4888 = vrcp.f32 %v3617_v26  ;;  %v3618_v39 = vadd.f32 1.0, %v4879_v37  ;;  %v4881_v40 = vpop.eup %4880 }
 0xaa2   :  { %4890 = vrcp.f32 %v3629_v19  ;;  %v3630_v61 = vadd.f32 1.0, %v4881_v40  ;;  %v4883_v32 = vpop.eup %4882 }
 0xaa3   :  { %4892 = vpow2.f32 %v4011_v25  ;;  %v4885_v5 = vpop.eup %4884 }
 0xaa4   :  { %4894 = vrcp.f32 %v3618_v39  ;;  %v4887_v2 = vpop.eup %4886  ;;  %v3643_v44 = vadd.f32 1.0, %v4885_v5 }
 0xaa5   :  { %4896 = vrcp.f32 %v3630_v61 }
 0xaa6   :  { %4898 = vrcp.f32 %v3643_v44 }
 0xaab   :  { %v4889_v28 = vpop.eup %4888 }
 0xaac   :  { %v4891_v4 = vpop.eup %4890  ;;  %v3651_v11 = vmul.f32 %v4889_v28, %v4883_v32 }
 0xaad   :  { %v4893_v3 = vpop.eup %4892  ;;  %v3649_v50 = vmul.f32 %v4891_v4, %v6946_v6  ;;  %v4012_v6 = vld [vmem:[%s7013_s7] ss:$0 sm:$0xff] }
 0xaae   :  { %v4895_v31 = vpop.eup %4894  ;;  %v3644_v42 = vadd.f32 1.0, %v4893_v3 }
 0xaaf   :  { %v3653_v9 = vadd.f32 %v3651_v11, %v3649_v50  ;;  %v3652_v7 = vmul.f32 %v4895_v31, %v4887_v2  ;;  %v4897_v43 = vpop.eup %4896 }
 0xab0   :  { %v3650_v56 = vmul.f32 %v4897_v43, %v6952_v48  ;;  %v4899_v33 = vpop.eup %4898 }
 0xab1   :  { %4900 = vtanh.f32 %v3653_v9 }
 0xab2   :  { %v3654_v8 = vadd.f32 %v3652_v7, %v3650_v56  ;;  %4902 = vrcp.f32 %v3644_v42 }
 0xab4   :  { %4904 = vtanh.f32 %v3654_v8 }
 0xabb   :  { %v4901_v38 = vpop.eup %4900 }
 0xabc   :  { %v3657_v22 = vmul.f32 %v4901_v38, %v4899_v33  ;;  %v4903_v34 = vpop.eup %4902 }
 0xabe   :  { %v4905_v35 = vpop.eup %4904 }
 0xabf   :  { %v3658_v55 = vmul.f32 %v4905_v35, %v4903_v34 }
 0xac1   :  { %v3659_v29 = vpack.c.bf16 %v3658_v55, %v3657_v22 }
 0xac3   :  { %4047 = vmatmul.mubr.bf16.vlgmr.msra.gmra.mrb[64].mxu0 %v3659_v29 }
 0xb96   :  { %v3765_v27 = vpop.f32.mrb[64].mxu0 }
 0xb97   :  { %v3766_v59 = vadd.f32 %v4012_v6, %v3765_v27  ;;  %v4048_v41 = vpop.f32.mrb[65].mxu0 }
 0xb98   :  { %v3768_v60 = vpop.f32.mrb[66].mxu0 }
 0xb99   :  { %3772 = vst [vmem:[%s7014_s8] sm:$0xff] %v3766_v59  ;;  %v3769_v48 = vadd.f32 %v4012_v6, %v3768_v60  ;;  %v4049_v47 = vpop.f32.mrb[67].mxu0 }
 0xb9b   :  { %3773 = vst [vmem:[%s7014_s8 + $0x8] sm:$0xff] %v3769_v48 }
 0xb9c   :  { %3778 = vsyncpa [#allocation4], 1 }
 0xb9d   :  { %3779 = vsyncpa [#allocation6], 1 }

</bundles_post_ra>
